<compile_context>
chip_gen: v5e
topology: v5e:2x2
jax: 0.10.0
libtpu: 0.0.40
codegen_flags: <defaults>
</compile_context>

<pallas_src>
import functools
from dataclasses import dataclass

import jax
import jax.numpy as jnp
from jax.experimental import pallas as pl
from jax.experimental.pallas import tpu as pltpu


@dataclass
class ChronosConfig:
    context_length: int = 8
    prediction_length: int = 4
    n_tokens: int = 128
    n_special_tokens: int = 2
    pad_token_id: int = 0
    eos_token_id: int = 1
    use_eos_token: bool = True
    model_type: str = "seq2seq"
    num_samples: int = 3
    temperature: float = 1.0
    top_k: int = 50
    top_p: float = 0.9
    d_model: int = 32
    d_ff: int = 64

    def __post_init__(self):
        assert (
            self.pad_token_id < self.n_special_tokens
            and self.eos_token_id < self.n_special_tokens
        ), "Special token id's must be smaller than n_special_tokens"


_NEG = -1e30
_N_BISECT = 24   # bisection iterations for the top-k / top-p thresholds


# ----------------------------------------------------------------------------
# Fused kernel: per-batch encoder (t == 0) + one decode step + sampling
# ----------------------------------------------------------------------------
def _chronos_kernel(ids_ref,        # (1, S, 1) int32   token ids of this batch
                    bias_ref,       # (1, 1, S) f32     additive key-pad bias
                    gumbel_ref,     # (1, 1, n, V) f32  Gumbel noise for step t
                    emb_ref,        # (V, D) f32        tied embedding / LM head
                    enc_wqkv_ref,   # (D, 128) f32      [q | k | v | 0-pad]
                    enc_wo_ref,     # (D, D)
                    enc_w1_ref,     # (D, F)
                    enc_w2_ref,     # (F, D)
                    dec_wkv_ref,    # (D, 128) f32      [k | v | 0-pad]
                    dec_wq_ref,     # (D, D)
                    dec_wo_ref,     # (D, D)
                    out_ref,        # (1, n, P) int32
                    a_ref,          # scratch (V, S) bf16   scale*(emb@wq)@K^T
                    btab_ref,       # scratch (V, V) bf16   emb @ emb^T
                    woet_ref,       # scratch (D, V) bf16   dec_wo @ emb^T
                    v_ref,          # scratch (S, D) bf16   cross-attn values
                    onehot_ref,     # scratch (n, V) bf16   previous-token one-hot
                    *, S, num_samples, D, V, P, pad_id,
                    temperature, top_k, top_p):
    t = pl.program_id(1)
    n = num_samples
    scale = 1.0 / (D ** 0.5)
    bf16 = jnp.bfloat16

    bias = bias_ref[0]                                               # (1, S)

    # ---------------- per-batch encoder + fused decode tables (t == 0) ------
    @pl.when(t == 0)
    def _encode():
        emb = emb_ref[...].astype(bf16)                              # (V, D)

        # Token "gather" as a one-hot MXU matmul (no host-side gather).
        ids = ids_ref[0]                                             # (S, 1)
        lane_v = jax.lax.broadcasted_iota(jnp.int32, (S, V), 1)
        x_oh = (lane_v == ids).astype(bf16)                          # (S, V)
        x = jnp.dot(x_oh, emb, preferred_element_type=jnp.float32)   # (S, D)

        # Fused Q/K/V projection (128-lane padded), single rank-2 matmul.
        qkv = jnp.dot(x.astype(bf16), enc_wqkv_ref[...].astype(bf16),
                      preferred_element_type=jnp.float32)            # (S, 128)
        q = qkv[:, :D]
        k = qkv[:, D:2 * D]
        v = qkv[:, 2 * D:3 * D]

        # Self-attention within this batch; key padding via additive bias.
        s = jnp.einsum("id,jd->ij", q.astype(bf16), k.astype(bf16),
                       preferred_element_type=jnp.float32) * scale   # (S, S)
        s = s + bias
        s = s - jnp.max(s, axis=-1, keepdims=True)
        p = jnp.exp(s)
        p = p * pl.reciprocal(jnp.sum(p, axis=-1, keepdims=True), approx=True)
        ctx = jnp.dot(p.astype(bf16), v.astype(bf16),
                      preferred_element_type=jnp.float32)            # (S, D)
        h = x + jnp.dot(ctx.astype(bf16), enc_wo_ref[...].astype(bf16),
                        preferred_element_type=jnp.float32)

        ff = jnp.maximum(
            jnp.dot(h.astype(bf16), enc_w1_ref[...].astype(bf16),
                    preferred_element_type=jnp.float32), 0.0)
        h = h + jnp.dot(ff.astype(bf16), enc_w2_ref[...].astype(bf16),
                        preferred_element_type=jnp.float32)

        # Cross-attention K/V (fused, 128-lane padded matmul), done once.
        kvc = jnp.dot(h.astype(bf16), dec_wkv_ref[...].astype(bf16),
                      preferred_element_type=jnp.float32)            # (S, 128)
        k_c = kvc[:, :D].astype(bf16)
        v_ref[...] = kvc[:, D:2 * D].astype(bf16)

        # Fused decode tables (shorten the per-step dependency chain):
        #   scores = onehot @ A,  logits = onehot @ (emb@emb^T) + ctx @ (wo@emb^T)
        emb_wq = jnp.dot(emb, dec_wq_ref[...].astype(bf16),
                         preferred_element_type=jnp.float32)         # (V, D)
        a_ref[...] = (jnp.einsum("vd,sd->vs", emb_wq.astype(bf16), k_c,
                                 preferred_element_type=jnp.float32)
                      * scale).astype(bf16)                          # (V, S)
        btab_ref[...] = jnp.einsum("vd,ud->vu", emb, emb,
                                   preferred_element_type=jnp.float32
                                   ).astype(bf16)                    # (V, V)
        woet_ref[...] = jnp.einsum("de,ve->dv",
                                   dec_wo_ref[...].astype(bf16), emb,
                                   preferred_element_type=jnp.float32
                                   ).astype(bf16)                    # (D, V)

        # T5-style decoder start token (= pad id) for every sample path.
        lane_n0 = jax.lax.broadcasted_iota(jnp.int32, (n, V), 1)
        onehot_ref[...] = (lane_n0 == pad_id).astype(bf16)
        out_ref[...] = jnp.zeros((1, n, P), jnp.int32)

    # ---------------- one autoregressive decode step -------------------------
    oh = onehot_ref[...]                                             # (n, V) bf16

    s = jnp.dot(oh, a_ref[...], preferred_element_type=jnp.float32)  # (n, S)
    s = s + bias
    s = s - jnp.max(s, axis=-1, keepdims=True)
    p = jnp.exp(s)
    p = p * pl.reciprocal(jnp.sum(p, axis=-1, keepdims=True), approx=True)
    ctx = jnp.dot(p.astype(bf16), v_ref[...],
                  preferred_element_type=jnp.float32)                # (n, D)

    logits = (jnp.dot(oh, btab_ref[...], preferred_element_type=jnp.float32)
              + jnp.dot(ctx.astype(bf16), woet_ref[...],
                        preferred_element_type=jnp.float32))         # (n, V)

    # ------------- temperature -> top-k -> top-p filtering -------------------
    l = logits * (1.0 / temperature)
    row_min = jnp.min(l, axis=-1, keepdims=True)
    row_max = jnp.max(l, axis=-1, keepdims=True)

    # Top-k: bisection for the largest threshold tau with #{l > tau} < k.
    # Only (n, V) compares + lane reductions are live -> no vreg spills.
    k_eff = float(min(int(top_k), V)) if top_k > 0 else float(V)
    lo = row_min - 1.0
    hi = row_max
    for _ in range(_N_BISECT):
        mid = 0.5 * (lo + hi)
        cnt = jnp.sum((l > mid).astype(jnp.float32), axis=-1, keepdims=True)
        ok = cnt < k_eff
        lo = jnp.where(ok, lo, mid)
        hi = jnp.where(ok, mid, hi)
    l = jnp.where(l > lo, l, _NEG)

    # Top-p (nucleus) on the softmax of the top-k-filtered logits: bisection
    # for the threshold where the strictly-greater probability mass <= top_p.
    m2 = jnp.max(l, axis=-1, keepdims=True)
    pe = jnp.exp(l - m2)
    probs = pe / jnp.sum(pe, axis=-1, keepdims=True)                 # exact denom
    lo = row_min - 1.0
    hi = row_max
    for _ in range(_N_BISECT):
        mid = 0.5 * (lo + hi)
        mass = jnp.sum(jnp.where(l > mid, probs, 0.0), axis=-1, keepdims=True)
        ok = mass <= top_p
        lo = jnp.where(ok, lo, mid)
        hi = jnp.where(ok, mid, hi)
    l = jnp.where(l > lo, l, _NEG)

    # ------------- Gumbel-max categorical sampling ---------------------------
    y = l + gumbel_ref[0, 0]                                         # (n, V)
    ymax = jnp.max(y, axis=-1, keepdims=True)
    lane_n = jax.lax.broadcasted_iota(jnp.int32, (n, V), 1)
    tok = jnp.min(jnp.where(y >= ymax, lane_n, V),
                  axis=-1, keepdims=True)                            # (n, 1) int32

    # Write this step's tokens into the resident output block.
    lane_p = jax.lax.broadcasted_iota(jnp.int32, (1, n, P), 2)
    out_ref[...] = jnp.where(lane_p == t, tok[None], out_ref[...])

    # Carry the sampled token to the next step as a one-hot row.
    onehot_ref[...] = (lane_n == tok).astype(bf16)


# ----------------------------------------------------------------------------
# ChronosModel.forward equivalent (single pallas_call for the whole forward)
# ----------------------------------------------------------------------------
def chronos_forward(params, cfg: ChronosConfig, input_ids, attention_mask, key,
                    prediction_length=None, num_samples=None, temperature=None,
                    top_k=None, top_p=None):
    prediction_length = cfg.prediction_length if prediction_length is None else prediction_length
    num_samples = cfg.num_samples if num_samples is None else num_samples
    temperature = cfg.temperature if temperature is None else temperature
    top_k = cfg.top_k if top_k is None else top_k
    top_p = cfg.top_p if top_p is None else top_p

    assert cfg.model_type == "seq2seq"

    B, S = input_ids.shape
    D, F, V, P, n = cfg.d_model, cfg.d_ff, cfg.n_tokens, prediction_length, num_samples

    ids = input_ids.reshape(B, S, 1).astype(jnp.int32)
    # O(B*S) additive key-padding bias instead of O((B*S)^2) mask matrices.
    bias = ((attention_mask.astype(jnp.float32) - 1.0) * 1e9).reshape(B, 1, S)
    # Pre-drawn Gumbel(0,1) noise for every (batch, step, sample, token);
    # streamed per step by the pipeline (avoids pltpu.prng_* which has no
    # CPU/interpret lowering and also avoids weakly-correlated per-step reseeds).
    gumbel = jax.random.gumbel(key, (B, P, n, V), dtype=jnp.float32)

    kernel = functools.partial(
        _chronos_kernel,
        S=S, num_samples=n, D=D, V=V, P=P,
        pad_id=int(cfg.pad_token_id),
        temperature=float(temperature), top_k=int(top_k), top_p=float(top_p))

    const = lambda b, t: (0, 0)   # resident (never re-fetched) full-array blocks

    out = pl.pallas_call(
        kernel,
        out_shape=jax.ShapeDtypeStruct((B, n, P), jnp.int32),
        grid=(B, P),
        in_specs=[
            pl.BlockSpec((1, S, 1), lambda b, t: (b, 0, 0)),     # ids
            pl.BlockSpec((1, 1, S), lambda b, t: (b, 0, 0)),     # key bias
            pl.BlockSpec((1, 1, n, V), lambda b, t: (b, t, 0, 0)),  # gumbel
            pl.BlockSpec((V, D), const),       # embedding
            pl.BlockSpec((D, 128), const),     # enc_wqkv (padded)
            pl.BlockSpec((D, D), const),       # enc_wo
            pl.BlockSpec((D, F), const),       # enc_w1
            pl.BlockSpec((F, D), const),       # enc_w2
            pl.BlockSpec((D, 128), const),     # dec_wkv (padded)
            pl.BlockSpec((D, D), const),       # dec_wq
            pl.BlockSpec((D, D), const),       # dec_wo
        ],
        out_specs=pl.BlockSpec((1, n, P), lambda b, t: (b, 0, 0)),
        scratch_shapes=[
            pltpu.VMEM((V, S), jnp.bfloat16),   # A = scale*(emb@dec_wq)@K^T
            pltpu.VMEM((V, V), jnp.bfloat16),   # emb @ emb^T
            pltpu.VMEM((D, V), jnp.bfloat16),   # dec_wo @ emb^T
            pltpu.VMEM((S, D), jnp.bfloat16),   # cross-attention V
            pltpu.VMEM((n, V), jnp.bfloat16),   # previous-token one-hot
        ],
        compiler_params=pltpu.CompilerParams(
            dimension_semantics=("parallel", "arbitrary")),
    )(ids, bias, gumbel, params["embedding"],
      params["enc_wqkv"], params["enc_wo"], params["enc_w1"], params["enc_w2"],
      params["dec_wkv"], params["dec_wq"], params["dec_wo"])

    # generate() prepends the decoder start token and ChronosModel strips it
    # via preds[..., 1:]; here we only ever emit the sampled tokens.
    # TODO(synk): HF generate's eos early-stopping + pad-fill of finished
    # sequences is not reproduced (min_new_tokens == max_new_tokens here).
    return out


# ----------------------------------------------------------------------------
# Deterministic parameter init (fused + 128-lane-padded projection weights)
# ----------------------------------------------------------------------------
def init_params(key, cfg: ChronosConfig):
    D, F, V = cfg.d_model, cfg.d_ff, cfg.n_tokens
    assert 3 * D <= 128, "fused QKV padding assumes 3*d_model <= 128"
    ks = jax.random.split(key, 11)
    rnd = lambda k, shp: 0.02 * jax.random.normal(k, shp, dtype=jnp.float32)

    enc_wq, enc_wk, enc_wv = rnd(ks[1], (D, D)), rnd(ks[2], (D, D)), rnd(ks[3], (D, D))
    enc_wqkv = (jnp.zeros((D, 128), jnp.float32)
                .at[:, :D].set(enc_wq)
                .at[:, D:2 * D].set(enc_wk)
                .at[:, 2 * D:3 * D].set(enc_wv))

    dec_wk, dec_wv = rnd(ks[8], (D, D)), rnd(ks[9], (D, D))
    dec_wkv = (jnp.zeros((D, 128), jnp.float32)
               .at[:, :D].set(dec_wk)
               .at[:, D:2 * D].set(dec_wv))

    return {
        "embedding": rnd(ks[0], (V, D)),
        "enc_wqkv": enc_wqkv,
        "enc_wo": rnd(ks[4], (D, D)),
        "enc_w1": rnd(ks[5], (D, F)),
        "enc_w2": rnd(ks[6], (F, D)),
        "dec_wkv": dec_wkv,
        "dec_wq": rnd(ks[7], (D, D)),
        "dec_wo": rnd(ks[10], (D, D)),
    }


if __name__ == "__main__":
    cfg = ChronosConfig()
    root = jax.random.PRNGKey(0)
    pkey, dkey, skey = jax.random.split(root, 3)

    params = init_params(pkey, cfg)

    B, S = 2, cfg.context_length
    input_ids = jax.random.randint(
        dkey, (B, S), cfg.n_special_tokens, cfg.n_tokens, dtype=jnp.int32)
    attention_mask = jnp.ones((B, S), dtype=jnp.int32)

    samples = chronos_forward(params, cfg, input_ids, attention_mask, skey)
    samples = jax.block_until_ready(samples)

    assert samples.shape == (B, cfg.num_samples, cfg.prediction_length), samples.shape
    assert samples.dtype == jnp.int32
    assert bool(jnp.all(samples >= 0)) and bool(jnp.all(samples < cfg.n_tokens))
    print("KERNEL_OK")
</pallas_src>

<mosaic_0001>
module attributes {stable_mosaic.version = 11 : i64} {
  func.func @_chronos_kernel(%arg0: i32, %arg1: i32, %arg2: memref<1x8x1xi32, #tpu.memory_space<vmem>>, %arg3: memref<1x1x8xf32, #tpu.memory_space<vmem>>, %arg4: memref<1x1x3x128xf32, #tpu.memory_space<vmem>>, %arg5: memref<128x32xf32, #tpu.memory_space<vmem>>, %arg6: memref<32x128xf32, #tpu.memory_space<vmem>>, %arg7: memref<32x32xf32, #tpu.memory_space<vmem>>, %arg8: memref<32x64xf32, #tpu.memory_space<vmem>>, %arg9: memref<64x32xf32, #tpu.memory_space<vmem>>, %arg10: memref<32x128xf32, #tpu.memory_space<vmem>>, %arg11: memref<32x32xf32, #tpu.memory_space<vmem>>, %arg12: memref<32x32xf32, #tpu.memory_space<vmem>>, %arg13: memref<1x3x4xi32, #tpu.memory_space<vmem>>, %arg14: memref<128x8xbf16, #tpu.memory_space<vmem>>, %arg15: memref<128x128xbf16, #tpu.memory_space<vmem>>, %arg16: memref<32x128xbf16, #tpu.memory_space<vmem>>, %arg17: memref<8x32xbf16, #tpu.memory_space<vmem>>, %arg18: memref<3x128xbf16, #tpu.memory_space<vmem>>) attributes {dimension_semantics = [#tpu.dimension_semantics<parallel>, #tpu.dimension_semantics<arbitrary>], iteration_bounds = array<i64: 2, 4>, scalar_prefetch = 0 : i64, scratch_operands = 5 : i64, tpu.core_type = #tpu.core_type<tc>, window_params = [{transform_indices = @transform_0, window_bounds = array<i64: 1, 8, 1>}, {transform_indices = @transform_1, window_bounds = array<i64: 1, 1, 8>}, {transform_indices = @transform_2, window_bounds = array<i64: 1, 1, 3, 128>}, {pipeline_mode = #tpu.pipeline_mode<synchronous>, transform_indices = @transform_3, window_bounds = array<i64: 128, 32>}, {pipeline_mode = #tpu.pipeline_mode<synchronous>, transform_indices = @transform_4, window_bounds = array<i64: 32, 128>}, {pipeline_mode = #tpu.pipeline_mode<synchronous>, transform_indices = @transform_5, window_bounds = array<i64: 32, 32>}, {pipeline_mode = #tpu.pipeline_mode<synchronous>, transform_indices = @transform_6, window_bounds = array<i64: 32, 64>}, {pipeline_mode = #tpu.pipeline_mode<synchronous>, transform_indices = @transform_7, window_bounds = array<i64: 64, 32>}, {pipeline_mode = #tpu.pipeline_mode<synchronous>, transform_indices = @transform_8, window_bounds = array<i64: 32, 128>}, {pipeline_mode = #tpu.pipeline_mode<synchronous>, transform_indices = @transform_9, window_bounds = array<i64: 32, 32>}, {pipeline_mode = #tpu.pipeline_mode<synchronous>, transform_indices = @transform_10, window_bounds = array<i64: 32, 32>}, {transform_indices = @transform_11, window_bounds = array<i64: 1, 3, 4>}]} {
    %c0 = arith.constant 0 : index
    %c0_0 = arith.constant 0 : index
    %c0_1 = arith.constant 0 : index
    %0 = vector.load %arg3[%c0, %c0_0, %c0_1] : memref<1x1x8xf32, #tpu.memory_space<vmem>>, vector<1x1x8xf32>
    %1 = vector.shape_cast %0 : vector<1x1x8xf32> to vector<1x8xf32>
    %c0_i32 = arith.constant 0 : i32
    %2 = arith.cmpi eq, %arg1, %c0_i32 : i32
    %3 = arith.extui %2 : i1 to i32
    %c0_i32_2 = arith.constant 0 : i32
    %4 = arith.cmpi ne, %3, %c0_i32_2 : i32
    scf.if %4 {
      %c0_209 = arith.constant 0 : index
      %c0_210 = arith.constant 0 : index
      %705 = vector.load %arg5[%c0_209, %c0_210] : memref<128x32xf32, #tpu.memory_space<vmem>>, vector<128x32xf32>
      %706 = arith.truncf %705 : vector<128x32xf32> to vector<128x32xbf16>
      %c0_211 = arith.constant 0 : index
      %c0_212 = arith.constant 0 : index
      %c0_213 = arith.constant 0 : index
      %707 = vector.load %arg2[%c0_211, %c0_212, %c0_213] : memref<1x8x1xi32, #tpu.memory_space<vmem>>, vector<1x8x1xi32>
      %708 = vector.shape_cast %707 : vector<1x8x1xi32> to vector<8x1xi32>
      %709 = tpu.iota {dimensions = array<i32: 1>} : vector<8x128xi32>
      %710 = vector.broadcast %708 : vector<8x1xi32> to vector<8x128xi32>
      %711 = arith.cmpi eq, %709, %710 : vector<8x128xi32>
      %712 = arith.extui %711 : vector<8x128xi1> to vector<8x128xi32>
      %713 = arith.sitofp %712 : vector<8x128xi32> to vector<8x128xf32>
      %714 = arith.truncf %713 : vector<8x128xf32> to vector<8x128xbf16>
      %cst_214 = arith.constant dense<0.000000e+00> : vector<8x32xf32>
      %715 = tpu.matmul %714, %706, %cst_214 {dimension_numbers = #tpu.dot_dimension_numbers<[1], [0], [0], [1], [0, 0, 1, 1], [], []>} : vector<8x128xbf16>, vector<128x32xbf16>, vector<8x32xf32> -> vector<8x32xf32>
      %716 = arith.truncf %715 : vector<8x32xf32> to vector<8x32xbf16>
      %c0_215 = arith.constant 0 : index
      %c0_216 = arith.constant 0 : index
      %717 = vector.load %arg6[%c0_215, %c0_216] : memref<32x128xf32, #tpu.memory_space<vmem>>, vector<32x128xf32>
      %718 = arith.truncf %717 : vector<32x128xf32> to vector<32x128xbf16>
      %cst_217 = arith.constant dense<0.000000e+00> : vector<8x128xf32>
      %719 = tpu.matmul %716, %718, %cst_217 {dimension_numbers = #tpu.dot_dimension_numbers<[1], [0], [0], [1], [0, 0, 1, 1], [], []>} : vector<8x32xbf16>, vector<32x128xbf16>, vector<8x128xf32> -> vector<8x128xf32>
      %720 = vector.extract_strided_slice %719 {offsets = [0, 0], sizes = [8, 32], strides = [1, 1]} : vector<8x128xf32> to vector<8x32xf32>
      %721 = vector.extract_strided_slice %719 {offsets = [0, 32], sizes = [8, 32], strides = [1, 1]} : vector<8x128xf32> to vector<8x32xf32>
      %722 = vector.extract_strided_slice %719 {offsets = [0, 64], sizes = [8, 32], strides = [1, 1]} : vector<8x128xf32> to vector<8x32xf32>
      %723 = arith.truncf %720 : vector<8x32xf32> to vector<8x32xbf16>
      %724 = arith.truncf %721 : vector<8x32xf32> to vector<8x32xbf16>
      "tpu.trace_start"() <{level = 10 : i32, message = "id,jd->ij"}> : () -> ()
      %cst_218 = arith.constant dense<0.000000e+00> : vector<8x8xf32>
      %725 = tpu.matmul %723, %724, %cst_218 {dimension_numbers = #tpu.dot_dimension_numbers<[1], [1], [0], [0], [0, 0, 1, 0], [], []>} : vector<8x32xbf16>, vector<8x32xbf16>, vector<8x8xf32> -> vector<8x8xf32>
      "tpu.trace_stop"() : () -> ()
      %cst_219 = arith.constant 0.176776692 : f32
      %726 = vector.broadcast %cst_219 : f32 to vector<8x8xf32>
      %727 = arith.mulf %725, %726 : vector<8x8xf32>
      %728 = vector.broadcast %1 : vector<1x8xf32> to vector<8x8xf32>
      %729 = arith.addf %727, %728 : vector<8x8xf32>
      %cst_220 = arith.constant dense<0xFF800000> : vector<8xf32>
      %730 = vector.multi_reduction <maximumf>, %729, %cst_220 [1] : vector<8x8xf32> to vector<8xf32>
      %731 = vector.shape_cast %730 : vector<8xf32> to vector<8x1xf32>
      %732 = vector.broadcast %731 : vector<8x1xf32> to vector<8x8xf32>
      %733 = arith.subf %729, %732 : vector<8x8xf32>
      %734 = math.exp %733 : vector<8x8xf32>
      %cst_221 = arith.constant dense<0.000000e+00> : vector<8xf32>
      %735 = vector.multi_reduction <add>, %734, %cst_221 [1] : vector<8x8xf32> to vector<8xf32>
      %736 = vector.shape_cast %735 : vector<8xf32> to vector<8x1xf32>
      %737 = tpu.reciprocal %736 {approx = true} : vector<8x1xf32> -> vector<8x1xf32>
      %738 = vector.broadcast %737 : vector<8x1xf32> to vector<8x8xf32>
      %739 = arith.mulf %734, %738 : vector<8x8xf32>
      %740 = arith.truncf %739 : vector<8x8xf32> to vector<8x8xbf16>
      %741 = arith.truncf %722 : vector<8x32xf32> to vector<8x32xbf16>
      %cst_222 = arith.constant dense<0.000000e+00> : vector<8x32xf32>
      %742 = tpu.matmul %740, %741, %cst_222 {dimension_numbers = #tpu.dot_dimension_numbers<[1], [0], [0], [1], [0, 0, 1, 1], [], []>} : vector<8x8xbf16>, vector<8x32xbf16>, vector<8x32xf32> -> vector<8x32xf32>
      %743 = arith.truncf %742 : vector<8x32xf32> to vector<8x32xbf16>
      %c0_223 = arith.constant 0 : index
      %c0_224 = arith.constant 0 : index
      %744 = vector.load %arg7[%c0_223, %c0_224] : memref<32x32xf32, #tpu.memory_space<vmem>>, vector<32x32xf32>
      %745 = arith.truncf %744 : vector<32x32xf32> to vector<32x32xbf16>
      %cst_225 = arith.constant dense<0.000000e+00> : vector<8x32xf32>
      %746 = tpu.matmul %743, %745, %cst_225 {dimension_numbers = #tpu.dot_dimension_numbers<[1], [0], [0], [1], [0, 0, 1, 1], [], []>} : vector<8x32xbf16>, vector<32x32xbf16>, vector<8x32xf32> -> vector<8x32xf32>
      %747 = arith.addf %715, %746 : vector<8x32xf32>
      %748 = arith.truncf %747 : vector<8x32xf32> to vector<8x32xbf16>
      %c0_226 = arith.constant 0 : index
      %c0_227 = arith.constant 0 : index
      %749 = vector.load %arg8[%c0_226, %c0_227] : memref<32x64xf32, #tpu.memory_space<vmem>>, vector<32x64xf32>
      %750 = arith.truncf %749 : vector<32x64xf32> to vector<32x64xbf16>
      %cst_228 = arith.constant dense<0.000000e+00> : vector<8x64xf32>
      %751 = tpu.matmul %748, %750, %cst_228 {dimension_numbers = #tpu.dot_dimension_numbers<[1], [0], [0], [1], [0, 0, 1, 1], [], []>} : vector<8x32xbf16>, vector<32x64xbf16>, vector<8x64xf32> -> vector<8x64xf32>
      %cst_229 = arith.constant 0.000000e+00 : f32
      %752 = vector.broadcast %cst_229 : f32 to vector<8x64xf32>
      %753 = arith.maximumf %751, %752 : vector<8x64xf32>
      %754 = arith.truncf %753 : vector<8x64xf32> to vector<8x64xbf16>
      %c0_230 = arith.constant 0 : index
      %c0_231 = arith.constant 0 : index
      %755 = vector.load %arg9[%c0_230, %c0_231] : memref<64x32xf32, #tpu.memory_space<vmem>>, vector<64x32xf32>
      %756 = arith.truncf %755 : vector<64x32xf32> to vector<64x32xbf16>
      %cst_232 = arith.constant dense<0.000000e+00> : vector<8x32xf32>
      %757 = tpu.matmul %754, %756, %cst_232 {dimension_numbers = #tpu.dot_dimension_numbers<[1], [0], [0], [1], [0, 0, 1, 1], [], []>} : vector<8x64xbf16>, vector<64x32xbf16>, vector<8x32xf32> -> vector<8x32xf32>
      %758 = arith.addf %747, %757 : vector<8x32xf32>
      %759 = arith.truncf %758 : vector<8x32xf32> to vector<8x32xbf16>
      %c0_233 = arith.constant 0 : index
      %c0_234 = arith.constant 0 : index
      %760 = vector.load %arg10[%c0_233, %c0_234] : memref<32x128xf32, #tpu.memory_space<vmem>>, vector<32x128xf32>
      %761 = arith.truncf %760 : vector<32x128xf32> to vector<32x128xbf16>
      %cst_235 = arith.constant dense<0.000000e+00> : vector<8x128xf32>
      %762 = tpu.matmul %759, %761, %cst_235 {dimension_numbers = #tpu.dot_dimension_numbers<[1], [0], [0], [1], [0, 0, 1, 1], [], []>} : vector<8x32xbf16>, vector<32x128xbf16>, vector<8x128xf32> -> vector<8x128xf32>
      %763 = vector.extract_strided_slice %762 {offsets = [0, 0], sizes = [8, 32], strides = [1, 1]} : vector<8x128xf32> to vector<8x32xf32>
      %764 = arith.truncf %763 : vector<8x32xf32> to vector<8x32xbf16>
      %765 = vector.extract_strided_slice %762 {offsets = [0, 32], sizes = [8, 32], strides = [1, 1]} : vector<8x128xf32> to vector<8x32xf32>
      %766 = arith.truncf %765 : vector<8x32xf32> to vector<8x32xbf16>
      %c0_236 = arith.constant 0 : index
      %c0_237 = arith.constant 0 : index
      %767 = vector.load %arg17[%c0_236, %c0_237] : memref<8x32xbf16, #tpu.memory_space<vmem>>, vector<8x32xbf16>
      tpu.vector_store %arg17[%c0_236, %c0_237], %766 {strides = array<i32>} : memref<8x32xbf16, #tpu.memory_space<vmem>>, vector<8x32xbf16>,
      %c0_238 = arith.constant 0 : index
      %c0_239 = arith.constant 0 : index
      %768 = vector.load %arg11[%c0_238, %c0_239] : memref<32x32xf32, #tpu.memory_space<vmem>>, vector<32x32xf32>
      %769 = arith.truncf %768 : vector<32x32xf32> to vector<32x32xbf16>
      %cst_240 = arith.constant dense<0.000000e+00> : vector<128x32xf32>
      %770 = tpu.matmul %706, %769, %cst_240 {dimension_numbers = #tpu.dot_dimension_numbers<[1], [0], [0], [1], [0, 0, 1, 1], [], []>} : vector<128x32xbf16>, vector<32x32xbf16>, vector<128x32xf32> -> vector<128x32xf32>
      %771 = arith.truncf %770 : vector<128x32xf32> to vector<128x32xbf16>
      "tpu.trace_start"() <{level = 10 : i32, message = "vd,sd->vs"}> : () -> ()
      %cst_241 = arith.constant dense<0.000000e+00> : vector<128x8xf32>
      %772 = tpu.matmul %771, %764, %cst_241 {dimension_numbers = #tpu.dot_dimension_numbers<[1], [1], [0], [0], [0, 0, 1, 0], [], []>} : vector<128x32xbf16>, vector<8x32xbf16>, vector<128x8xf32> -> vector<128x8xf32>
      "tpu.trace_stop"() : () -> ()
      %cst_242 = arith.constant 0.176776692 : f32
      %773 = vector.broadcast %cst_242 : f32 to vector<128x8xf32>
      %774 = arith.mulf %772, %773 : vector<128x8xf32>
      %775 = arith.truncf %774 : vector<128x8xf32> to vector<128x8xbf16>
      %c0_243 = arith.constant 0 : index
      %c0_244 = arith.constant 0 : index
      %776 = vector.load %arg14[%c0_243, %c0_244] : memref<128x8xbf16, #tpu.memory_space<vmem>>, vector<128x8xbf16>
      tpu.vector_store %arg14[%c0_243, %c0_244], %775 {strides = array<i32>} : memref<128x8xbf16, #tpu.memory_space<vmem>>, vector<128x8xbf16>,
      "tpu.trace_start"() <{level = 10 : i32, message = "vd,ud->vu"}> : () -> ()
      %cst_245 = arith.constant dense<0.000000e+00> : vector<128x128xf32>
      %777 = tpu.matmul %706, %706, %cst_245 {dimension_numbers = #tpu.dot_dimension_numbers<[1], [1], [0], [0], [0, 0, 1, 0], [], []>} : vector<128x32xbf16>, vector<128x32xbf16>, vector<128x128xf32> -> vector<128x128xf32>
      "tpu.trace_stop"() : () -> ()
      %778 = arith.truncf %777 : vector<128x128xf32> to vector<128x128xbf16>
      %c0_246 = arith.constant 0 : index
      %c0_247 = arith.constant 0 : index
      %779 = vector.load %arg15[%c0_246, %c0_247] : memref<128x128xbf16, #tpu.memory_space<vmem>>, vector<128x128xbf16>
      tpu.vector_store %arg15[%c0_246, %c0_247], %778 {strides = array<i32>} : memref<128x128xbf16, #tpu.memory_space<vmem>>, vector<128x128xbf16>,
      %c0_248 = arith.constant 0 : index
      %c0_249 = arith.constant 0 : index
      %780 = vector.load %arg12[%c0_248, %c0_249] : memref<32x32xf32, #tpu.memory_space<vmem>>, vector<32x32xf32>
      %781 = arith.truncf %780 : vector<32x32xf32> to vector<32x32xbf16>
      "tpu.trace_start"() <{level = 10 : i32, message = "de,ve->dv"}> : () -> ()
      %cst_250 = arith.constant dense<0.000000e+00> : vector<32x128xf32>
      %782 = tpu.matmul %781, %706, %cst_250 {dimension_numbers = #tpu.dot_dimension_numbers<[1], [1], [0], [0], [0, 0, 1, 0], [], []>} : vector<32x32xbf16>, vector<128x32xbf16>, vector<32x128xf32> -> vector<32x128xf32>
      "tpu.trace_stop"() : () -> ()
      %783 = arith.truncf %782 : vector<32x128xf32> to vector<32x128xbf16>
      %c0_251 = arith.constant 0 : index
      %c0_252 = arith.constant 0 : index
      %784 = vector.load %arg16[%c0_251, %c0_252] : memref<32x128xbf16, #tpu.memory_space<vmem>>, vector<32x128xbf16>
      tpu.vector_store %arg16[%c0_251, %c0_252], %783 {strides = array<i32>} : memref<32x128xbf16, #tpu.memory_space<vmem>>, vector<32x128xbf16>,
      %785 = tpu.iota {dimensions = array<i32: 1>} : vector<3x128xi32>
      %c0_i32_253 = arith.constant 0 : i32
      %786 = vector.broadcast %c0_i32_253 : i32 to vector<3x128xi32>
      %787 = arith.cmpi eq, %785, %786 : vector<3x128xi32>
      %788 = arith.extui %787 : vector<3x128xi1> to vector<3x128xi32>
      %789 = arith.sitofp %788 : vector<3x128xi32> to vector<3x128xf32>
      %790 = arith.truncf %789 : vector<3x128xf32> to vector<3x128xbf16>
      %c0_254 = arith.constant 0 : index
      %c0_255 = arith.constant 0 : index
      %791 = vector.load %arg18[%c0_254, %c0_255] : memref<3x128xbf16, #tpu.memory_space<vmem>>, vector<3x128xbf16>
      tpu.vector_store %arg18[%c0_254, %c0_255], %790 {strides = array<i32>} : memref<3x128xbf16, #tpu.memory_space<vmem>>, vector<3x128xbf16>,
      %c0_i32_256 = arith.constant 0 : i32
      %792 = vector.broadcast %c0_i32_256 : i32 to vector<1x3x4xi32>
      %c0_257 = arith.constant 0 : index
      %c0_258 = arith.constant 0 : index
      %c0_259 = arith.constant 0 : index
      %793 = vector.load %arg13[%c0_257, %c0_258, %c0_259] : memref<1x3x4xi32, #tpu.memory_space<vmem>>, vector<1x3x4xi32>
      tpu.vector_store %arg13[%c0_257, %c0_258, %c0_259], %792 {strides = array<i32>} : memref<1x3x4xi32, #tpu.memory_space<vmem>>, vector<1x3x4xi32>,
    } else {
    }
    %c0_3 = arith.constant 0 : index
    %c0_4 = arith.constant 0 : index
    %5 = vector.load %arg18[%c0_3, %c0_4] : memref<3x128xbf16, #tpu.memory_space<vmem>>, vector<3x128xbf16>
    %c0_5 = arith.constant 0 : index
    %c0_6 = arith.constant 0 : index
    %6 = vector.load %arg14[%c0_5, %c0_6] : memref<128x8xbf16, #tpu.memory_space<vmem>>, vector<128x8xbf16>
    %cst = arith.constant dense<0.000000e+00> : vector<3x8xf32>
    %7 = tpu.matmul %5, %6, %cst {dimension_numbers = #tpu.dot_dimension_numbers<[1], [0], [0], [1], [0, 0, 1, 1], [], []>} : vector<3x128xbf16>, vector<128x8xbf16>, vector<3x8xf32> -> vector<3x8xf32>
    %8 = vector.broadcast %1 : vector<1x8xf32> to vector<3x8xf32>
    %9 = arith.addf %7, %8 : vector<3x8xf32>
    %cst_7 = arith.constant dense<0xFF800000> : vector<3xf32>
    %10 = vector.multi_reduction <maximumf>, %9, %cst_7 [1] : vector<3x8xf32> to vector<3xf32>
    %11 = vector.shape_cast %10 : vector<3xf32> to vector<3x1xf32>
    %12 = vector.broadcast %11 : vector<3x1xf32> to vector<3x8xf32>
    %13 = arith.subf %9, %12 : vector<3x8xf32>
    %14 = math.exp %13 : vector<3x8xf32>
    %cst_8 = arith.constant dense<0.000000e+00> : vector<3xf32>
    %15 = vector.multi_reduction <add>, %14, %cst_8 [1] : vector<3x8xf32> to vector<3xf32>
    %16 = vector.shape_cast %15 : vector<3xf32> to vector<3x1xf32>
    %17 = tpu.reciprocal %16 {approx = true} : vector<3x1xf32> -> vector<3x1xf32>
    %18 = vector.broadcast %17 : vector<3x1xf32> to vector<3x8xf32>
    %19 = arith.mulf %14, %18 : vector<3x8xf32>
    %20 = arith.truncf %19 : vector<3x8xf32> to vector<3x8xbf16>
    %c0_9 = arith.constant 0 : index
    %c0_10 = arith.constant 0 : index
    %21 = vector.load %arg17[%c0_9, %c0_10] : memref<8x32xbf16, #tpu.memory_space<vmem>>, vector<8x32xbf16>
    %cst_11 = arith.constant dense<0.000000e+00> : vector<3x32xf32>
    %22 = tpu.matmul %20, %21, %cst_11 {dimension_numbers = #tpu.dot_dimension_numbers<[1], [0], [0], [1], [0, 0, 1, 1], [], []>} : vector<3x8xbf16>, vector<8x32xbf16>, vector<3x32xf32> -> vector<3x32xf32>
    %c0_12 = arith.constant 0 : index
    %c0_13 = arith.constant 0 : index
    %23 = vector.load %arg15[%c0_12, %c0_13] : memref<128x128xbf16, #tpu.memory_space<vmem>>, vector<128x128xbf16>
    %cst_14 = arith.constant dense<0.000000e+00> : vector<3x128xf32>
    %24 = tpu.matmul %5, %23, %cst_14 {dimension_numbers = #tpu.dot_dimension_numbers<[1], [0], [0], [1], [0, 0, 1, 1], [], []>} : vector<3x128xbf16>, vector<128x128xbf16>, vector<3x128xf32> -> vector<3x128xf32>
    %25 = arith.truncf %22 : vector<3x32xf32> to vector<3x32xbf16>
    %c0_15 = arith.constant 0 : index
    %c0_16 = arith.constant 0 : index
    %26 = vector.load %arg16[%c0_15, %c0_16] : memref<32x128xbf16, #tpu.memory_space<vmem>>, vector<32x128xbf16>
    %cst_17 = arith.constant dense<0.000000e+00> : vector<3x128xf32>
    %27 = tpu.matmul %25, %26, %cst_17 {dimension_numbers = #tpu.dot_dimension_numbers<[1], [0], [0], [1], [0, 0, 1, 1], [], []>} : vector<3x32xbf16>, vector<32x128xbf16>, vector<3x128xf32> -> vector<3x128xf32>
    %28 = arith.addf %24, %27 : vector<3x128xf32>
    %cst_18 = arith.constant 1.000000e+00 : f32
    %29 = vector.broadcast %cst_18 : f32 to vector<3x128xf32>
    %30 = arith.mulf %28, %29 : vector<3x128xf32>
    %cst_19 = arith.constant dense<0x7F800000> : vector<3xf32>
    %31 = vector.multi_reduction <minimumf>, %30, %cst_19 [1] : vector<3x128xf32> to vector<3xf32>
    %32 = vector.shape_cast %31 : vector<3xf32> to vector<3x1xf32>
    %cst_20 = arith.constant dense<0xFF800000> : vector<3xf32>
    %33 = vector.multi_reduction <maximumf>, %30, %cst_20 [1] : vector<3x128xf32> to vector<3xf32>
    %34 = vector.shape_cast %33 : vector<3xf32> to vector<3x1xf32>
    %cst_21 = arith.constant 1.000000e+00 : f32
    %35 = vector.broadcast %cst_21 : f32 to vector<3x1xf32>
    %36 = arith.subf %32, %35 : vector<3x1xf32>
    %37 = arith.addf %36, %34 : vector<3x1xf32>
    %cst_22 = arith.constant 5.000000e-01 : f32
    %38 = vector.broadcast %cst_22 : f32 to vector<3x1xf32>
    %39 = arith.mulf %38, %37 : vector<3x1xf32>
    %40 = vector.broadcast %39 : vector<3x1xf32> to vector<3x128xf32>
    %41 = arith.cmpf ogt, %30, %40 : vector<3x128xf32>
    %42 = arith.extui %41 : vector<3x128xi1> to vector<3x128xi32>
    %43 = arith.sitofp %42 : vector<3x128xi32> to vector<3x128xf32>
    %cst_23 = arith.constant dense<0.000000e+00> : vector<3xf32>
    %44 = vector.multi_reduction <add>, %43, %cst_23 [1] : vector<3x128xf32> to vector<3xf32>
    %45 = vector.shape_cast %44 : vector<3xf32> to vector<3x1xf32>
    %cst_24 = arith.constant 5.000000e+01 : f32
    %46 = vector.broadcast %cst_24 : f32 to vector<3x1xf32>
    %47 = arith.cmpf olt, %45, %46 : vector<3x1xf32>
    %48 = arith.select %47, %36, %39 : vector<3x1xi1>, vector<3x1xf32>
    %49 = arith.select %47, %39, %34 : vector<3x1xi1>, vector<3x1xf32>
    %50 = arith.addf %48, %49 : vector<3x1xf32>
    %cst_25 = arith.constant 5.000000e-01 : f32
    %51 = vector.broadcast %cst_25 : f32 to vector<3x1xf32>
    %52 = arith.mulf %51, %50 : vector<3x1xf32>
    %53 = vector.broadcast %52 : vector<3x1xf32> to vector<3x128xf32>
    %54 = arith.cmpf ogt, %30, %53 : vector<3x128xf32>
    %55 = arith.extui %54 : vector<3x128xi1> to vector<3x128xi32>
    %56 = arith.sitofp %55 : vector<3x128xi32> to vector<3x128xf32>
    %cst_26 = arith.constant dense<0.000000e+00> : vector<3xf32>
    %57 = vector.multi_reduction <add>, %56, %cst_26 [1] : vector<3x128xf32> to vector<3xf32>
    %58 = vector.shape_cast %57 : vector<3xf32> to vector<3x1xf32>
    %cst_27 = arith.constant 5.000000e+01 : f32
    %59 = vector.broadcast %cst_27 : f32 to vector<3x1xf32>
    %60 = arith.cmpf olt, %58, %59 : vector<3x1xf32>
    %61 = arith.select %60, %48, %52 : vector<3x1xi1>, vector<3x1xf32>
    %62 = arith.select %60, %52, %49 : vector<3x1xi1>, vector<3x1xf32>
    %63 = arith.addf %61, %62 : vector<3x1xf32>
    %cst_28 = arith.constant 5.000000e-01 : f32
    %64 = vector.broadcast %cst_28 : f32 to vector<3x1xf32>
    %65 = arith.mulf %64, %63 : vector<3x1xf32>
    %66 = vector.broadcast %65 : vector<3x1xf32> to vector<3x128xf32>
    %67 = arith.cmpf ogt, %30, %66 : vector<3x128xf32>
    %68 = arith.extui %67 : vector<3x128xi1> to vector<3x128xi32>
    %69 = arith.sitofp %68 : vector<3x128xi32> to vector<3x128xf32>
    %cst_29 = arith.constant dense<0.000000e+00> : vector<3xf32>
    %70 = vector.multi_reduction <add>, %69, %cst_29 [1] : vector<3x128xf32> to vector<3xf32>
    %71 = vector.shape_cast %70 : vector<3xf32> to vector<3x1xf32>
    %cst_30 = arith.constant 5.000000e+01 : f32
    %72 = vector.broadcast %cst_30 : f32 to vector<3x1xf32>
    %73 = arith.cmpf olt, %71, %72 : vector<3x1xf32>
    %74 = arith.select %73, %61, %65 : vector<3x1xi1>, vector<3x1xf32>
    %75 = arith.select %73, %65, %62 : vector<3x1xi1>, vector<3x1xf32>
    %76 = arith.addf %74, %75 : vector<3x1xf32>
    %cst_31 = arith.constant 5.000000e-01 : f32
    %77 = vector.broadcast %cst_31 : f32 to vector<3x1xf32>
    %78 = arith.mulf %77, %76 : vector<3x1xf32>
    %79 = vector.broadcast %78 : vector<3x1xf32> to vector<3x128xf32>
    %80 = arith.cmpf ogt, %30, %79 : vector<3x128xf32>
    %81 = arith.extui %80 : vector<3x128xi1> to vector<3x128xi32>
    %82 = arith.sitofp %81 : vector<3x128xi32> to vector<3x128xf32>
    %cst_32 = arith.constant dense<0.000000e+00> : vector<3xf32>
    %83 = vector.multi_reduction <add>, %82, %cst_32 [1] : vector<3x128xf32> to vector<3xf32>
    %84 = vector.shape_cast %83 : vector<3xf32> to vector<3x1xf32>
    %cst_33 = arith.constant 5.000000e+01 : f32
    %85 = vector.broadcast %cst_33 : f32 to vector<3x1xf32>
    %86 = arith.cmpf olt, %84, %85 : vector<3x1xf32>
    %87 = arith.select %86, %74, %78 : vector<3x1xi1>, vector<3x1xf32>
    %88 = arith.select %86, %78, %75 : vector<3x1xi1>, vector<3x1xf32>
    %89 = arith.addf %87, %88 : vector<3x1xf32>
    %cst_34 = arith.constant 5.000000e-01 : f32
    %90 = vector.broadcast %cst_34 : f32 to vector<3x1xf32>
    %91 = arith.mulf %90, %89 : vector<3x1xf32>
    %92 = vector.broadcast %91 : vector<3x1xf32> to vector<3x128xf32>
    %93 = arith.cmpf ogt, %30, %92 : vector<3x128xf32>
    %94 = arith.extui %93 : vector<3x128xi1> to vector<3x128xi32>
    %95 = arith.sitofp %94 : vector<3x128xi32> to vector<3x128xf32>
    %cst_35 = arith.constant dense<0.000000e+00> : vector<3xf32>
    %96 = vector.multi_reduction <add>, %95, %cst_35 [1] : vector<3x128xf32> to vector<3xf32>
    %97 = vector.shape_cast %96 : vector<3xf32> to vector<3x1xf32>
    %cst_36 = arith.constant 5.000000e+01 : f32
    %98 = vector.broadcast %cst_36 : f32 to vector<3x1xf32>
    %99 = arith.cmpf olt, %97, %98 : vector<3x1xf32>
    %100 = arith.select %99, %87, %91 : vector<3x1xi1>, vector<3x1xf32>
    %101 = arith.select %99, %91, %88 : vector<3x1xi1>, vector<3x1xf32>
    %102 = arith.addf %100, %101 : vector<3x1xf32>
    %cst_37 = arith.constant 5.000000e-01 : f32
    %103 = vector.broadcast %cst_37 : f32 to vector<3x1xf32>
    %104 = arith.mulf %103, %102 : vector<3x1xf32>
    %105 = vector.broadcast %104 : vector<3x1xf32> to vector<3x128xf32>
    %106 = arith.cmpf ogt, %30, %105 : vector<3x128xf32>
    %107 = arith.extui %106 : vector<3x128xi1> to vector<3x128xi32>
    %108 = arith.sitofp %107 : vector<3x128xi32> to vector<3x128xf32>
    %cst_38 = arith.constant dense<0.000000e+00> : vector<3xf32>
    %109 = vector.multi_reduction <add>, %108, %cst_38 [1] : vector<3x128xf32> to vector<3xf32>
    %110 = vector.shape_cast %109 : vector<3xf32> to vector<3x1xf32>
    %cst_39 = arith.constant 5.000000e+01 : f32
    %111 = vector.broadcast %cst_39 : f32 to vector<3x1xf32>
    %112 = arith.cmpf olt, %110, %111 : vector<3x1xf32>
    %113 = arith.select %112, %100, %104 : vector<3x1xi1>, vector<3x1xf32>
    %114 = arith.select %112, %104, %101 : vector<3x1xi1>, vector<3x1xf32>
    %115 = arith.addf %113, %114 : vector<3x1xf32>
    %cst_40 = arith.constant 5.000000e-01 : f32
    %116 = vector.broadcast %cst_40 : f32 to vector<3x1xf32>
    %117 = arith.mulf %116, %115 : vector<3x1xf32>
    %118 = vector.broadcast %117 : vector<3x1xf32> to vector<3x128xf32>
    %119 = arith.cmpf ogt, %30, %118 : vector<3x128xf32>
    %120 = arith.extui %119 : vector<3x128xi1> to vector<3x128xi32>
    %121 = arith.sitofp %120 : vector<3x128xi32> to vector<3x128xf32>
    %cst_41 = arith.constant dense<0.000000e+00> : vector<3xf32>
    %122 = vector.multi_reduction <add>, %121, %cst_41 [1] : vector<3x128xf32> to vector<3xf32>
    %123 = vector.shape_cast %122 : vector<3xf32> to vector<3x1xf32>
    %cst_42 = arith.constant 5.000000e+01 : f32
    %124 = vector.broadcast %cst_42 : f32 to vector<3x1xf32>
    %125 = arith.cmpf olt, %123, %124 : vector<3x1xf32>
    %126 = arith.select %125, %113, %117 : vector<3x1xi1>, vector<3x1xf32>
    %127 = arith.select %125, %117, %114 : vector<3x1xi1>, vector<3x1xf32>
    %128 = arith.addf %126, %127 : vector<3x1xf32>
    %cst_43 = arith.constant 5.000000e-01 : f32
    %129 = vector.broadcast %cst_43 : f32 to vector<3x1xf32>
    %130 = arith.mulf %129, %128 : vector<3x1xf32>
    %131 = vector.broadcast %130 : vector<3x1xf32> to vector<3x128xf32>
    %132 = arith.cmpf ogt, %30, %131 : vector<3x128xf32>
    %133 = arith.extui %132 : vector<3x128xi1> to vector<3x128xi32>
    %134 = arith.sitofp %133 : vector<3x128xi32> to vector<3x128xf32>
    %cst_44 = arith.constant dense<0.000000e+00> : vector<3xf32>
    %135 = vector.multi_reduction <add>, %134, %cst_44 [1] : vector<3x128xf32> to vector<3xf32>
    %136 = vector.shape_cast %135 : vector<3xf32> to vector<3x1xf32>
    %cst_45 = arith.constant 5.000000e+01 : f32
    %137 = vector.broadcast %cst_45 : f32 to vector<3x1xf32>
    %138 = arith.cmpf olt, %136, %137 : vector<3x1xf32>
    %139 = arith.select %138, %126, %130 : vector<3x1xi1>, vector<3x1xf32>
    %140 = arith.select %138, %130, %127 : vector<3x1xi1>, vector<3x1xf32>
    %141 = arith.addf %139, %140 : vector<3x1xf32>
    %cst_46 = arith.constant 5.000000e-01 : f32
    %142 = vector.broadcast %cst_46 : f32 to vector<3x1xf32>
    %143 = arith.mulf %142, %141 : vector<3x1xf32>
    %144 = vector.broadcast %143 : vector<3x1xf32> to vector<3x128xf32>
    %145 = arith.cmpf ogt, %30, %144 : vector<3x128xf32>
    %146 = arith.extui %145 : vector<3x128xi1> to vector<3x128xi32>
    %147 = arith.sitofp %146 : vector<3x128xi32> to vector<3x128xf32>
    %cst_47 = arith.constant dense<0.000000e+00> : vector<3xf32>
    %148 = vector.multi_reduction <add>, %147, %cst_47 [1] : vector<3x128xf32> to vector<3xf32>
    %149 = vector.shape_cast %148 : vector<3xf32> to vector<3x1xf32>
    %cst_48 = arith.constant 5.000000e+01 : f32
    %150 = vector.broadcast %cst_48 : f32 to vector<3x1xf32>
    %151 = arith.cmpf olt, %149, %150 : vector<3x1xf32>
    %152 = arith.select %151, %139, %143 : vector<3x1xi1>, vector<3x1xf32>
    %153 = arith.select %151, %143, %140 : vector<3x1xi1>, vector<3x1xf32>
    %154 = arith.addf %152, %153 : vector<3x1xf32>
    %cst_49 = arith.constant 5.000000e-01 : f32
    %155 = vector.broadcast %cst_49 : f32 to vector<3x1xf32>
    %156 = arith.mulf %155, %154 : vector<3x1xf32>
    %157 = vector.broadcast %156 : vector<3x1xf32> to vector<3x128xf32>
    %158 = arith.cmpf ogt, %30, %157 : vector<3x128xf32>
    %159 = arith.extui %158 : vector<3x128xi1> to vector<3x128xi32>
    %160 = arith.sitofp %159 : vector<3x128xi32> to vector<3x128xf32>
    %cst_50 = arith.constant dense<0.000000e+00> : vector<3xf32>
    %161 = vector.multi_reduction <add>, %160, %cst_50 [1] : vector<3x128xf32> to vector<3xf32>
    %162 = vector.shape_cast %161 : vector<3xf32> to vector<3x1xf32>
    %cst_51 = arith.constant 5.000000e+01 : f32
    %163 = vector.broadcast %cst_51 : f32 to vector<3x1xf32>
    %164 = arith.cmpf olt, %162, %163 : vector<3x1xf32>
    %165 = arith.select %164, %152, %156 : vector<3x1xi1>, vector<3x1xf32>
    %166 = arith.select %164, %156, %153 : vector<3x1xi1>, vector<3x1xf32>
    %167 = arith.addf %165, %166 : vector<3x1xf32>
    %cst_52 = arith.constant 5.000000e-01 : f32
    %168 = vector.broadcast %cst_52 : f32 to vector<3x1xf32>
    %169 = arith.mulf %168, %167 : vector<3x1xf32>
    %170 = vector.broadcast %169 : vector<3x1xf32> to vector<3x128xf32>
    %171 = arith.cmpf ogt, %30, %170 : vector<3x128xf32>
    %172 = arith.extui %171 : vector<3x128xi1> to vector<3x128xi32>
    %173 = arith.sitofp %172 : vector<3x128xi32> to vector<3x128xf32>
    %cst_53 = arith.constant dense<0.000000e+00> : vector<3xf32>
    %174 = vector.multi_reduction <add>, %173, %cst_53 [1] : vector<3x128xf32> to vector<3xf32>
    %175 = vector.shape_cast %174 : vector<3xf32> to vector<3x1xf32>
    %cst_54 = arith.constant 5.000000e+01 : f32
    %176 = vector.broadcast %cst_54 : f32 to vector<3x1xf32>
    %177 = arith.cmpf olt, %175, %176 : vector<3x1xf32>
    %178 = arith.select %177, %165, %169 : vector<3x1xi1>, vector<3x1xf32>
    %179 = arith.select %177, %169, %166 : vector<3x1xi1>, vector<3x1xf32>
    %180 = arith.addf %178, %179 : vector<3x1xf32>
    %cst_55 = arith.constant 5.000000e-01 : f32
    %181 = vector.broadcast %cst_55 : f32 to vector<3x1xf32>
    %182 = arith.mulf %181, %180 : vector<3x1xf32>
    %183 = vector.broadcast %182 : vector<3x1xf32> to vector<3x128xf32>
    %184 = arith.cmpf ogt, %30, %183 : vector<3x128xf32>
    %185 = arith.extui %184 : vector<3x128xi1> to vector<3x128xi32>
    %186 = arith.sitofp %185 : vector<3x128xi32> to vector<3x128xf32>
    %cst_56 = arith.constant dense<0.000000e+00> : vector<3xf32>
    %187 = vector.multi_reduction <add>, %186, %cst_56 [1] : vector<3x128xf32> to vector<3xf32>
    %188 = vector.shape_cast %187 : vector<3xf32> to vector<3x1xf32>
    %cst_57 = arith.constant 5.000000e+01 : f32
    %189 = vector.broadcast %cst_57 : f32 to vector<3x1xf32>
    %190 = arith.cmpf olt, %188, %189 : vector<3x1xf32>
    %191 = arith.select %190, %178, %182 : vector<3x1xi1>, vector<3x1xf32>
    %192 = arith.select %190, %182, %179 : vector<3x1xi1>, vector<3x1xf32>
    %193 = arith.addf %191, %192 : vector<3x1xf32>
    %cst_58 = arith.constant 5.000000e-01 : f32
    %194 = vector.broadcast %cst_58 : f32 to vector<3x1xf32>
    %195 = arith.mulf %194, %193 : vector<3x1xf32>
    %196 = vector.broadcast %195 : vector<3x1xf32> to vector<3x128xf32>
    %197 = arith.cmpf ogt, %30, %196 : vector<3x128xf32>
    %198 = arith.extui %197 : vector<3x128xi1> to vector<3x128xi32>
    %199 = arith.sitofp %198 : vector<3x128xi32> to vector<3x128xf32>
    %cst_59 = arith.constant dense<0.000000e+00> : vector<3xf32>
    %200 = vector.multi_reduction <add>, %199, %cst_59 [1] : vector<3x128xf32> to vector<3xf32>
    %201 = vector.shape_cast %200 : vector<3xf32> to vector<3x1xf32>
    %cst_60 = arith.constant 5.000000e+01 : f32
    %202 = vector.broadcast %cst_60 : f32 to vector<3x1xf32>
    %203 = arith.cmpf olt, %201, %202 : vector<3x1xf32>
    %204 = arith.select %203, %191, %195 : vector<3x1xi1>, vector<3x1xf32>
    %205 = arith.select %203, %195, %192 : vector<3x1xi1>, vector<3x1xf32>
    %206 = arith.addf %204, %205 : vector<3x1xf32>
    %cst_61 = arith.constant 5.000000e-01 : f32
    %207 = vector.broadcast %cst_61 : f32 to vector<3x1xf32>
    %208 = arith.mulf %207, %206 : vector<3x1xf32>
    %209 = vector.broadcast %208 : vector<3x1xf32> to vector<3x128xf32>
    %210 = arith.cmpf ogt, %30, %209 : vector<3x128xf32>
    %211 = arith.extui %210 : vector<3x128xi1> to vector<3x128xi32>
    %212 = arith.sitofp %211 : vector<3x128xi32> to vector<3x128xf32>
    %cst_62 = arith.constant dense<0.000000e+00> : vector<3xf32>
    %213 = vector.multi_reduction <add>, %212, %cst_62 [1] : vector<3x128xf32> to vector<3xf32>
    %214 = vector.shape_cast %213 : vector<3xf32> to vector<3x1xf32>
    %cst_63 = arith.constant 5.000000e+01 : f32
    %215 = vector.broadcast %cst_63 : f32 to vector<3x1xf32>
    %216 = arith.cmpf olt, %214, %215 : vector<3x1xf32>
    %217 = arith.select %216, %204, %208 : vector<3x1xi1>, vector<3x1xf32>
    %218 = arith.select %216, %208, %205 : vector<3x1xi1>, vector<3x1xf32>
    %219 = arith.addf %217, %218 : vector<3x1xf32>
    %cst_64 = arith.constant 5.000000e-01 : f32
    %220 = vector.broadcast %cst_64 : f32 to vector<3x1xf32>
    %221 = arith.mulf %220, %219 : vector<3x1xf32>
    %222 = vector.broadcast %221 : vector<3x1xf32> to vector<3x128xf32>
    %223 = arith.cmpf ogt, %30, %222 : vector<3x128xf32>
    %224 = arith.extui %223 : vector<3x128xi1> to vector<3x128xi32>
    %225 = arith.sitofp %224 : vector<3x128xi32> to vector<3x128xf32>
    %cst_65 = arith.constant dense<0.000000e+00> : vector<3xf32>
    %226 = vector.multi_reduction <add>, %225, %cst_65 [1] : vector<3x128xf32> to vector<3xf32>
    %227 = vector.shape_cast %226 : vector<3xf32> to vector<3x1xf32>
    %cst_66 = arith.constant 5.000000e+01 : f32
    %228 = vector.broadcast %cst_66 : f32 to vector<3x1xf32>
    %229 = arith.cmpf olt, %227, %228 : vector<3x1xf32>
    %230 = arith.select %229, %217, %221 : vector<3x1xi1>, vector<3x1xf32>
    %231 = arith.select %229, %221, %218 : vector<3x1xi1>, vector<3x1xf32>
    %232 = arith.addf %230, %231 : vector<3x1xf32>
    %cst_67 = arith.constant 5.000000e-01 : f32
    %233 = vector.broadcast %cst_67 : f32 to vector<3x1xf32>
    %234 = arith.mulf %233, %232 : vector<3x1xf32>
    %235 = vector.broadcast %234 : vector<3x1xf32> to vector<3x128xf32>
    %236 = arith.cmpf ogt, %30, %235 : vector<3x128xf32>
    %237 = arith.extui %236 : vector<3x128xi1> to vector<3x128xi32>
    %238 = arith.sitofp %237 : vector<3x128xi32> to vector<3x128xf32>
    %cst_68 = arith.constant dense<0.000000e+00> : vector<3xf32>
    %239 = vector.multi_reduction <add>, %238, %cst_68 [1] : vector<3x128xf32> to vector<3xf32>
    %240 = vector.shape_cast %239 : vector<3xf32> to vector<3x1xf32>
    %cst_69 = arith.constant 5.000000e+01 : f32
    %241 = vector.broadcast %cst_69 : f32 to vector<3x1xf32>
    %242 = arith.cmpf olt, %240, %241 : vector<3x1xf32>
    %243 = arith.select %242, %230, %234 : vector<3x1xi1>, vector<3x1xf32>
    %244 = arith.select %242, %234, %231 : vector<3x1xi1>, vector<3x1xf32>
    %245 = arith.addf %243, %244 : vector<3x1xf32>
    %cst_70 = arith.constant 5.000000e-01 : f32
    %246 = vector.broadcast %cst_70 : f32 to vector<3x1xf32>
    %247 = arith.mulf %246, %245 : vector<3x1xf32>
    %248 = vector.broadcast %247 : vector<3x1xf32> to vector<3x128xf32>
    %249 = arith.cmpf ogt, %30, %248 : vector<3x128xf32>
    %250 = arith.extui %249 : vector<3x128xi1> to vector<3x128xi32>
    %251 = arith.sitofp %250 : vector<3x128xi32> to vector<3x128xf32>
    %cst_71 = arith.constant dense<0.000000e+00> : vector<3xf32>
    %252 = vector.multi_reduction <add>, %251, %cst_71 [1] : vector<3x128xf32> to vector<3xf32>
    %253 = vector.shape_cast %252 : vector<3xf32> to vector<3x1xf32>
    %cst_72 = arith.constant 5.000000e+01 : f32
    %254 = vector.broadcast %cst_72 : f32 to vector<3x1xf32>
    %255 = arith.cmpf olt, %253, %254 : vector<3x1xf32>
    %256 = arith.select %255, %243, %247 : vector<3x1xi1>, vector<3x1xf32>
    %257 = arith.select %255, %247, %244 : vector<3x1xi1>, vector<3x1xf32>
    %258 = arith.addf %256, %257 : vector<3x1xf32>
    %cst_73 = arith.constant 5.000000e-01 : f32
    %259 = vector.broadcast %cst_73 : f32 to vector<3x1xf32>
    %260 = arith.mulf %259, %258 : vector<3x1xf32>
    %261 = vector.broadcast %260 : vector<3x1xf32> to vector<3x128xf32>
    %262 = arith.cmpf ogt, %30, %261 : vector<3x128xf32>
    %263 = arith.extui %262 : vector<3x128xi1> to vector<3x128xi32>
    %264 = arith.sitofp %263 : vector<3x128xi32> to vector<3x128xf32>
    %cst_74 = arith.constant dense<0.000000e+00> : vector<3xf32>
    %265 = vector.multi_reduction <add>, %264, %cst_74 [1] : vector<3x128xf32> to vector<3xf32>
    %266 = vector.shape_cast %265 : vector<3xf32> to vector<3x1xf32>
    %cst_75 = arith.constant 5.000000e+01 : f32
    %267 = vector.broadcast %cst_75 : f32 to vector<3x1xf32>
    %268 = arith.cmpf olt, %266, %267 : vector<3x1xf32>
    %269 = arith.select %268, %256, %260 : vector<3x1xi1>, vector<3x1xf32>
    %270 = arith.select %268, %260, %257 : vector<3x1xi1>, vector<3x1xf32>
    %271 = arith.addf %269, %270 : vector<3x1xf32>
    %cst_76 = arith.constant 5.000000e-01 : f32
    %272 = vector.broadcast %cst_76 : f32 to vector<3x1xf32>
    %273 = arith.mulf %272, %271 : vector<3x1xf32>
    %274 = vector.broadcast %273 : vector<3x1xf32> to vector<3x128xf32>
    %275 = arith.cmpf ogt, %30, %274 : vector<3x128xf32>
    %276 = arith.extui %275 : vector<3x128xi1> to vector<3x128xi32>
    %277 = arith.sitofp %276 : vector<3x128xi32> to vector<3x128xf32>
    %cst_77 = arith.constant dense<0.000000e+00> : vector<3xf32>
    %278 = vector.multi_reduction <add>, %277, %cst_77 [1] : vector<3x128xf32> to vector<3xf32>
    %279 = vector.shape_cast %278 : vector<3xf32> to vector<3x1xf32>
    %cst_78 = arith.constant 5.000000e+01 : f32
    %280 = vector.broadcast %cst_78 : f32 to vector<3x1xf32>
    %281 = arith.cmpf olt, %279, %280 : vector<3x1xf32>
    %282 = arith.select %281, %269, %273 : vector<3x1xi1>, vector<3x1xf32>
    %283 = arith.select %281, %273, %270 : vector<3x1xi1>, vector<3x1xf32>
    %284 = arith.addf %282, %283 : vector<3x1xf32>
    %cst_79 = arith.constant 5.000000e-01 : f32
    %285 = vector.broadcast %cst_79 : f32 to vector<3x1xf32>
    %286 = arith.mulf %285, %284 : vector<3x1xf32>
    %287 = vector.broadcast %286 : vector<3x1xf32> to vector<3x128xf32>
    %288 = arith.cmpf ogt, %30, %287 : vector<3x128xf32>
    %289 = arith.extui %288 : vector<3x128xi1> to vector<3x128xi32>
    %290 = arith.sitofp %289 : vector<3x128xi32> to vector<3x128xf32>
    %cst_80 = arith.constant dense<0.000000e+00> : vector<3xf32>
    %291 = vector.multi_reduction <add>, %290, %cst_80 [1] : vector<3x128xf32> to vector<3xf32>
    %292 = vector.shape_cast %291 : vector<3xf32> to vector<3x1xf32>
    %cst_81 = arith.constant 5.000000e+01 : f32
    %293 = vector.broadcast %cst_81 : f32 to vector<3x1xf32>
    %294 = arith.cmpf olt, %292, %293 : vector<3x1xf32>
    %295 = arith.select %294, %282, %286 : vector<3x1xi1>, vector<3x1xf32>
    %296 = arith.select %294, %286, %283 : vector<3x1xi1>, vector<3x1xf32>
    %297 = arith.addf %295, %296 : vector<3x1xf32>
    %cst_82 = arith.constant 5.000000e-01 : f32
    %298 = vector.broadcast %cst_82 : f32 to vector<3x1xf32>
    %299 = arith.mulf %298, %297 : vector<3x1xf32>
    %300 = vector.broadcast %299 : vector<3x1xf32> to vector<3x128xf32>
    %301 = arith.cmpf ogt, %30, %300 : vector<3x128xf32>
    %302 = arith.extui %301 : vector<3x128xi1> to vector<3x128xi32>
    %303 = arith.sitofp %302 : vector<3x128xi32> to vector<3x128xf32>
    %cst_83 = arith.constant dense<0.000000e+00> : vector<3xf32>
    %304 = vector.multi_reduction <add>, %303, %cst_83 [1] : vector<3x128xf32> to vector<3xf32>
    %305 = vector.shape_cast %304 : vector<3xf32> to vector<3x1xf32>
    %cst_84 = arith.constant 5.000000e+01 : f32
    %306 = vector.broadcast %cst_84 : f32 to vector<3x1xf32>
    %307 = arith.cmpf olt, %305, %306 : vector<3x1xf32>
    %308 = arith.select %307, %295, %299 : vector<3x1xi1>, vector<3x1xf32>
    %309 = arith.select %307, %299, %296 : vector<3x1xi1>, vector<3x1xf32>
    %310 = arith.addf %308, %309 : vector<3x1xf32>
    %cst_85 = arith.constant 5.000000e-01 : f32
    %311 = vector.broadcast %cst_85 : f32 to vector<3x1xf32>
    %312 = arith.mulf %311, %310 : vector<3x1xf32>
    %313 = vector.broadcast %312 : vector<3x1xf32> to vector<3x128xf32>
    %314 = arith.cmpf ogt, %30, %313 : vector<3x128xf32>
    %315 = arith.extui %314 : vector<3x128xi1> to vector<3x128xi32>
    %316 = arith.sitofp %315 : vector<3x128xi32> to vector<3x128xf32>
    %cst_86 = arith.constant dense<0.000000e+00> : vector<3xf32>
    %317 = vector.multi_reduction <add>, %316, %cst_86 [1] : vector<3x128xf32> to vector<3xf32>
    %318 = vector.shape_cast %317 : vector<3xf32> to vector<3x1xf32>
    %cst_87 = arith.constant 5.000000e+01 : f32
    %319 = vector.broadcast %cst_87 : f32 to vector<3x1xf32>
    %320 = arith.cmpf olt, %318, %319 : vector<3x1xf32>
    %321 = arith.select %320, %308, %312 : vector<3x1xi1>, vector<3x1xf32>
    %322 = arith.select %320, %312, %309 : vector<3x1xi1>, vector<3x1xf32>
    %323 = arith.addf %321, %322 : vector<3x1xf32>
    %cst_88 = arith.constant 5.000000e-01 : f32
    %324 = vector.broadcast %cst_88 : f32 to vector<3x1xf32>
    %325 = arith.mulf %324, %323 : vector<3x1xf32>
    %326 = vector.broadcast %325 : vector<3x1xf32> to vector<3x128xf32>
    %327 = arith.cmpf ogt, %30, %326 : vector<3x128xf32>
    %328 = arith.extui %327 : vector<3x128xi1> to vector<3x128xi32>
    %329 = arith.sitofp %328 : vector<3x128xi32> to vector<3x128xf32>
    %cst_89 = arith.constant dense<0.000000e+00> : vector<3xf32>
    %330 = vector.multi_reduction <add>, %329, %cst_89 [1] : vector<3x128xf32> to vector<3xf32>
    %331 = vector.shape_cast %330 : vector<3xf32> to vector<3x1xf32>
    %cst_90 = arith.constant 5.000000e+01 : f32
    %332 = vector.broadcast %cst_90 : f32 to vector<3x1xf32>
    %333 = arith.cmpf olt, %331, %332 : vector<3x1xf32>
    %334 = arith.select %333, %321, %325 : vector<3x1xi1>, vector<3x1xf32>
    %335 = arith.select %333, %325, %322 : vector<3x1xi1>, vector<3x1xf32>
    %336 = arith.addf %334, %335 : vector<3x1xf32>
    %cst_91 = arith.constant 5.000000e-01 : f32
    %337 = vector.broadcast %cst_91 : f32 to vector<3x1xf32>
    %338 = arith.mulf %337, %336 : vector<3x1xf32>
    %339 = vector.broadcast %338 : vector<3x1xf32> to vector<3x128xf32>
    %340 = arith.cmpf ogt, %30, %339 : vector<3x128xf32>
    %341 = arith.extui %340 : vector<3x128xi1> to vector<3x128xi32>
    %342 = arith.sitofp %341 : vector<3x128xi32> to vector<3x128xf32>
    %cst_92 = arith.constant dense<0.000000e+00> : vector<3xf32>
    %343 = vector.multi_reduction <add>, %342, %cst_92 [1] : vector<3x128xf32> to vector<3xf32>
    %344 = vector.shape_cast %343 : vector<3xf32> to vector<3x1xf32>
    %cst_93 = arith.constant 5.000000e+01 : f32
    %345 = vector.broadcast %cst_93 : f32 to vector<3x1xf32>
    %346 = arith.cmpf olt, %344, %345 : vector<3x1xf32>
    %347 = arith.select %346, %334, %338 : vector<3x1xi1>, vector<3x1xf32>
    %348 = vector.broadcast %347 : vector<3x1xf32> to vector<3x128xf32>
    %349 = arith.cmpf ogt, %30, %348 : vector<3x128xf32>
    %cst_94 = arith.constant -1.000000e+30 : f32
    %350 = vector.broadcast %cst_94 : f32 to vector<3x128xf32>
    %351 = arith.select %349, %30, %350 : vector<3x128xi1>, vector<3x128xf32>
    %cst_95 = arith.constant dense<0xFF800000> : vector<3xf32>
    %352 = vector.multi_reduction <maximumf>, %351, %cst_95 [1] : vector<3x128xf32> to vector<3xf32>
    %353 = vector.shape_cast %352 : vector<3xf32> to vector<3x1xf32>
    %354 = vector.broadcast %353 : vector<3x1xf32> to vector<3x128xf32>
    %355 = arith.subf %351, %354 : vector<3x128xf32>
    %356 = math.exp %355 : vector<3x128xf32>
    %cst_96 = arith.constant dense<0.000000e+00> : vector<3xf32>
    %357 = vector.multi_reduction <add>, %356, %cst_96 [1] : vector<3x128xf32> to vector<3xf32>
    %358 = vector.shape_cast %357 : vector<3xf32> to vector<3x1xf32>
    %359 = vector.broadcast %358 : vector<3x1xf32> to vector<3x128xf32>
    %360 = arith.divf %356, %359 : vector<3x128xf32>
    %cst_97 = arith.constant 1.000000e+00 : f32
    %361 = vector.broadcast %cst_97 : f32 to vector<3x1xf32>
    %362 = arith.subf %32, %361 : vector<3x1xf32>
    %363 = arith.addf %362, %34 : vector<3x1xf32>
    %cst_98 = arith.constant 5.000000e-01 : f32
    %364 = vector.broadcast %cst_98 : f32 to vector<3x1xf32>
    %365 = arith.mulf %364, %363 : vector<3x1xf32>
    %366 = vector.broadcast %365 : vector<3x1xf32> to vector<3x128xf32>
    %367 = arith.cmpf ogt, %351, %366 : vector<3x128xf32>
    %cst_99 = arith.constant 0.000000e+00 : f32
    %368 = vector.broadcast %cst_99 : f32 to vector<3x128xf32>
    %369 = arith.select %367, %360, %368 : vector<3x128xi1>, vector<3x128xf32>
    %cst_100 = arith.constant dense<0.000000e+00> : vector<3xf32>
    %370 = vector.multi_reduction <add>, %369, %cst_100 [1] : vector<3x128xf32> to vector<3xf32>
    %371 = vector.shape_cast %370 : vector<3xf32> to vector<3x1xf32>
    %cst_101 = arith.constant 0.899999976 : f32
    %372 = vector.broadcast %cst_101 : f32 to vector<3x1xf32>
    %373 = arith.cmpf ole, %371, %372 : vector<3x1xf32>
    %374 = arith.select %373, %362, %365 : vector<3x1xi1>, vector<3x1xf32>
    %375 = arith.select %373, %365, %34 : vector<3x1xi1>, vector<3x1xf32>
    %376 = arith.addf %374, %375 : vector<3x1xf32>
    %cst_102 = arith.constant 5.000000e-01 : f32
    %377 = vector.broadcast %cst_102 : f32 to vector<3x1xf32>
    %378 = arith.mulf %377, %376 : vector<3x1xf32>
    %379 = vector.broadcast %378 : vector<3x1xf32> to vector<3x128xf32>
    %380 = arith.cmpf ogt, %351, %379 : vector<3x128xf32>
    %cst_103 = arith.constant 0.000000e+00 : f32
    %381 = vector.broadcast %cst_103 : f32 to vector<3x128xf32>
    %382 = arith.select %380, %360, %381 : vector<3x128xi1>, vector<3x128xf32>
    %cst_104 = arith.constant dense<0.000000e+00> : vector<3xf32>
    %383 = vector.multi_reduction <add>, %382, %cst_104 [1] : vector<3x128xf32> to vector<3xf32>
    %384 = vector.shape_cast %383 : vector<3xf32> to vector<3x1xf32>
    %cst_105 = arith.constant 0.899999976 : f32
    %385 = vector.broadcast %cst_105 : f32 to vector<3x1xf32>
    %386 = arith.cmpf ole, %384, %385 : vector<3x1xf32>
    %387 = arith.select %386, %374, %378 : vector<3x1xi1>, vector<3x1xf32>
    %388 = arith.select %386, %378, %375 : vector<3x1xi1>, vector<3x1xf32>
    %389 = arith.addf %387, %388 : vector<3x1xf32>
    %cst_106 = arith.constant 5.000000e-01 : f32
    %390 = vector.broadcast %cst_106 : f32 to vector<3x1xf32>
    %391 = arith.mulf %390, %389 : vector<3x1xf32>
    %392 = vector.broadcast %391 : vector<3x1xf32> to vector<3x128xf32>
    %393 = arith.cmpf ogt, %351, %392 : vector<3x128xf32>
    %cst_107 = arith.constant 0.000000e+00 : f32
    %394 = vector.broadcast %cst_107 : f32 to vector<3x128xf32>
    %395 = arith.select %393, %360, %394 : vector<3x128xi1>, vector<3x128xf32>
    %cst_108 = arith.constant dense<0.000000e+00> : vector<3xf32>
    %396 = vector.multi_reduction <add>, %395, %cst_108 [1] : vector<3x128xf32> to vector<3xf32>
    %397 = vector.shape_cast %396 : vector<3xf32> to vector<3x1xf32>
    %cst_109 = arith.constant 0.899999976 : f32
    %398 = vector.broadcast %cst_109 : f32 to vector<3x1xf32>
    %399 = arith.cmpf ole, %397, %398 : vector<3x1xf32>
    %400 = arith.select %399, %387, %391 : vector<3x1xi1>, vector<3x1xf32>
    %401 = arith.select %399, %391, %388 : vector<3x1xi1>, vector<3x1xf32>
    %402 = arith.addf %400, %401 : vector<3x1xf32>
    %cst_110 = arith.constant 5.000000e-01 : f32
    %403 = vector.broadcast %cst_110 : f32 to vector<3x1xf32>
    %404 = arith.mulf %403, %402 : vector<3x1xf32>
    %405 = vector.broadcast %404 : vector<3x1xf32> to vector<3x128xf32>
    %406 = arith.cmpf ogt, %351, %405 : vector<3x128xf32>
    %cst_111 = arith.constant 0.000000e+00 : f32
    %407 = vector.broadcast %cst_111 : f32 to vector<3x128xf32>
    %408 = arith.select %406, %360, %407 : vector<3x128xi1>, vector<3x128xf32>
    %cst_112 = arith.constant dense<0.000000e+00> : vector<3xf32>
    %409 = vector.multi_reduction <add>, %408, %cst_112 [1] : vector<3x128xf32> to vector<3xf32>
    %410 = vector.shape_cast %409 : vector<3xf32> to vector<3x1xf32>
    %cst_113 = arith.constant 0.899999976 : f32
    %411 = vector.broadcast %cst_113 : f32 to vector<3x1xf32>
    %412 = arith.cmpf ole, %410, %411 : vector<3x1xf32>
    %413 = arith.select %412, %400, %404 : vector<3x1xi1>, vector<3x1xf32>
    %414 = arith.select %412, %404, %401 : vector<3x1xi1>, vector<3x1xf32>
    %415 = arith.addf %413, %414 : vector<3x1xf32>
    %cst_114 = arith.constant 5.000000e-01 : f32
    %416 = vector.broadcast %cst_114 : f32 to vector<3x1xf32>
    %417 = arith.mulf %416, %415 : vector<3x1xf32>
    %418 = vector.broadcast %417 : vector<3x1xf32> to vector<3x128xf32>
    %419 = arith.cmpf ogt, %351, %418 : vector<3x128xf32>
    %cst_115 = arith.constant 0.000000e+00 : f32
    %420 = vector.broadcast %cst_115 : f32 to vector<3x128xf32>
    %421 = arith.select %419, %360, %420 : vector<3x128xi1>, vector<3x128xf32>
    %cst_116 = arith.constant dense<0.000000e+00> : vector<3xf32>
    %422 = vector.multi_reduction <add>, %421, %cst_116 [1] : vector<3x128xf32> to vector<3xf32>
    %423 = vector.shape_cast %422 : vector<3xf32> to vector<3x1xf32>
    %cst_117 = arith.constant 0.899999976 : f32
    %424 = vector.broadcast %cst_117 : f32 to vector<3x1xf32>
    %425 = arith.cmpf ole, %423, %424 : vector<3x1xf32>
    %426 = arith.select %425, %413, %417 : vector<3x1xi1>, vector<3x1xf32>
    %427 = arith.select %425, %417, %414 : vector<3x1xi1>, vector<3x1xf32>
    %428 = arith.addf %426, %427 : vector<3x1xf32>
    %cst_118 = arith.constant 5.000000e-01 : f32
    %429 = vector.broadcast %cst_118 : f32 to vector<3x1xf32>
    %430 = arith.mulf %429, %428 : vector<3x1xf32>
    %431 = vector.broadcast %430 : vector<3x1xf32> to vector<3x128xf32>
    %432 = arith.cmpf ogt, %351, %431 : vector<3x128xf32>
    %cst_119 = arith.constant 0.000000e+00 : f32
    %433 = vector.broadcast %cst_119 : f32 to vector<3x128xf32>
    %434 = arith.select %432, %360, %433 : vector<3x128xi1>, vector<3x128xf32>
    %cst_120 = arith.constant dense<0.000000e+00> : vector<3xf32>
    %435 = vector.multi_reduction <add>, %434, %cst_120 [1] : vector<3x128xf32> to vector<3xf32>
    %436 = vector.shape_cast %435 : vector<3xf32> to vector<3x1xf32>
    %cst_121 = arith.constant 0.899999976 : f32
    %437 = vector.broadcast %cst_121 : f32 to vector<3x1xf32>
    %438 = arith.cmpf ole, %436, %437 : vector<3x1xf32>
    %439 = arith.select %438, %426, %430 : vector<3x1xi1>, vector<3x1xf32>
    %440 = arith.select %438, %430, %427 : vector<3x1xi1>, vector<3x1xf32>
    %441 = arith.addf %439, %440 : vector<3x1xf32>
    %cst_122 = arith.constant 5.000000e-01 : f32
    %442 = vector.broadcast %cst_122 : f32 to vector<3x1xf32>
    %443 = arith.mulf %442, %441 : vector<3x1xf32>
    %444 = vector.broadcast %443 : vector<3x1xf32> to vector<3x128xf32>
    %445 = arith.cmpf ogt, %351, %444 : vector<3x128xf32>
    %cst_123 = arith.constant 0.000000e+00 : f32
    %446 = vector.broadcast %cst_123 : f32 to vector<3x128xf32>
    %447 = arith.select %445, %360, %446 : vector<3x128xi1>, vector<3x128xf32>
    %cst_124 = arith.constant dense<0.000000e+00> : vector<3xf32>
    %448 = vector.multi_reduction <add>, %447, %cst_124 [1] : vector<3x128xf32> to vector<3xf32>
    %449 = vector.shape_cast %448 : vector<3xf32> to vector<3x1xf32>
    %cst_125 = arith.constant 0.899999976 : f32
    %450 = vector.broadcast %cst_125 : f32 to vector<3x1xf32>
    %451 = arith.cmpf ole, %449, %450 : vector<3x1xf32>
    %452 = arith.select %451, %439, %443 : vector<3x1xi1>, vector<3x1xf32>
    %453 = arith.select %451, %443, %440 : vector<3x1xi1>, vector<3x1xf32>
    %454 = arith.addf %452, %453 : vector<3x1xf32>
    %cst_126 = arith.constant 5.000000e-01 : f32
    %455 = vector.broadcast %cst_126 : f32 to vector<3x1xf32>
    %456 = arith.mulf %455, %454 : vector<3x1xf32>
    %457 = vector.broadcast %456 : vector<3x1xf32> to vector<3x128xf32>
    %458 = arith.cmpf ogt, %351, %457 : vector<3x128xf32>
    %cst_127 = arith.constant 0.000000e+00 : f32
    %459 = vector.broadcast %cst_127 : f32 to vector<3x128xf32>
    %460 = arith.select %458, %360, %459 : vector<3x128xi1>, vector<3x128xf32>
    %cst_128 = arith.constant dense<0.000000e+00> : vector<3xf32>
    %461 = vector.multi_reduction <add>, %460, %cst_128 [1] : vector<3x128xf32> to vector<3xf32>
    %462 = vector.shape_cast %461 : vector<3xf32> to vector<3x1xf32>
    %cst_129 = arith.constant 0.899999976 : f32
    %463 = vector.broadcast %cst_129 : f32 to vector<3x1xf32>
    %464 = arith.cmpf ole, %462, %463 : vector<3x1xf32>
    %465 = arith.select %464, %452, %456 : vector<3x1xi1>, vector<3x1xf32>
    %466 = arith.select %464, %456, %453 : vector<3x1xi1>, vector<3x1xf32>
    %467 = arith.addf %465, %466 : vector<3x1xf32>
    %cst_130 = arith.constant 5.000000e-01 : f32
    %468 = vector.broadcast %cst_130 : f32 to vector<3x1xf32>
    %469 = arith.mulf %468, %467 : vector<3x1xf32>
    %470 = vector.broadcast %469 : vector<3x1xf32> to vector<3x128xf32>
    %471 = arith.cmpf ogt, %351, %470 : vector<3x128xf32>
    %cst_131 = arith.constant 0.000000e+00 : f32
    %472 = vector.broadcast %cst_131 : f32 to vector<3x128xf32>
    %473 = arith.select %471, %360, %472 : vector<3x128xi1>, vector<3x128xf32>
    %cst_132 = arith.constant dense<0.000000e+00> : vector<3xf32>
    %474 = vector.multi_reduction <add>, %473, %cst_132 [1] : vector<3x128xf32> to vector<3xf32>
    %475 = vector.shape_cast %474 : vector<3xf32> to vector<3x1xf32>
    %cst_133 = arith.constant 0.899999976 : f32
    %476 = vector.broadcast %cst_133 : f32 to vector<3x1xf32>
    %477 = arith.cmpf ole, %475, %476 : vector<3x1xf32>
    %478 = arith.select %477, %465, %469 : vector<3x1xi1>, vector<3x1xf32>
    %479 = arith.select %477, %469, %466 : vector<3x1xi1>, vector<3x1xf32>
    %480 = arith.addf %478, %479 : vector<3x1xf32>
    %cst_134 = arith.constant 5.000000e-01 : f32
    %481 = vector.broadcast %cst_134 : f32 to vector<3x1xf32>
    %482 = arith.mulf %481, %480 : vector<3x1xf32>
    %483 = vector.broadcast %482 : vector<3x1xf32> to vector<3x128xf32>
    %484 = arith.cmpf ogt, %351, %483 : vector<3x128xf32>
    %cst_135 = arith.constant 0.000000e+00 : f32
    %485 = vector.broadcast %cst_135 : f32 to vector<3x128xf32>
    %486 = arith.select %484, %360, %485 : vector<3x128xi1>, vector<3x128xf32>
    %cst_136 = arith.constant dense<0.000000e+00> : vector<3xf32>
    %487 = vector.multi_reduction <add>, %486, %cst_136 [1] : vector<3x128xf32> to vector<3xf32>
    %488 = vector.shape_cast %487 : vector<3xf32> to vector<3x1xf32>
    %cst_137 = arith.constant 0.899999976 : f32
    %489 = vector.broadcast %cst_137 : f32 to vector<3x1xf32>
    %490 = arith.cmpf ole, %488, %489 : vector<3x1xf32>
    %491 = arith.select %490, %478, %482 : vector<3x1xi1>, vector<3x1xf32>
    %492 = arith.select %490, %482, %479 : vector<3x1xi1>, vector<3x1xf32>
    %493 = arith.addf %491, %492 : vector<3x1xf32>
    %cst_138 = arith.constant 5.000000e-01 : f32
    %494 = vector.broadcast %cst_138 : f32 to vector<3x1xf32>
    %495 = arith.mulf %494, %493 : vector<3x1xf32>
    %496 = vector.broadcast %495 : vector<3x1xf32> to vector<3x128xf32>
    %497 = arith.cmpf ogt, %351, %496 : vector<3x128xf32>
    %cst_139 = arith.constant 0.000000e+00 : f32
    %498 = vector.broadcast %cst_139 : f32 to vector<3x128xf32>
    %499 = arith.select %497, %360, %498 : vector<3x128xi1>, vector<3x128xf32>
    %cst_140 = arith.constant dense<0.000000e+00> : vector<3xf32>
    %500 = vector.multi_reduction <add>, %499, %cst_140 [1] : vector<3x128xf32> to vector<3xf32>
    %501 = vector.shape_cast %500 : vector<3xf32> to vector<3x1xf32>
    %cst_141 = arith.constant 0.899999976 : f32
    %502 = vector.broadcast %cst_141 : f32 to vector<3x1xf32>
    %503 = arith.cmpf ole, %501, %502 : vector<3x1xf32>
    %504 = arith.select %503, %491, %495 : vector<3x1xi1>, vector<3x1xf32>
    %505 = arith.select %503, %495, %492 : vector<3x1xi1>, vector<3x1xf32>
    %506 = arith.addf %504, %505 : vector<3x1xf32>
    %cst_142 = arith.constant 5.000000e-01 : f32
    %507 = vector.broadcast %cst_142 : f32 to vector<3x1xf32>
    %508 = arith.mulf %507, %506 : vector<3x1xf32>
    %509 = vector.broadcast %508 : vector<3x1xf32> to vector<3x128xf32>
    %510 = arith.cmpf ogt, %351, %509 : vector<3x128xf32>
    %cst_143 = arith.constant 0.000000e+00 : f32
    %511 = vector.broadcast %cst_143 : f32 to vector<3x128xf32>
    %512 = arith.select %510, %360, %511 : vector<3x128xi1>, vector<3x128xf32>
    %cst_144 = arith.constant dense<0.000000e+00> : vector<3xf32>
    %513 = vector.multi_reduction <add>, %512, %cst_144 [1] : vector<3x128xf32> to vector<3xf32>
    %514 = vector.shape_cast %513 : vector<3xf32> to vector<3x1xf32>
    %cst_145 = arith.constant 0.899999976 : f32
    %515 = vector.broadcast %cst_145 : f32 to vector<3x1xf32>
    %516 = arith.cmpf ole, %514, %515 : vector<3x1xf32>
    %517 = arith.select %516, %504, %508 : vector<3x1xi1>, vector<3x1xf32>
    %518 = arith.select %516, %508, %505 : vector<3x1xi1>, vector<3x1xf32>
    %519 = arith.addf %517, %518 : vector<3x1xf32>
    %cst_146 = arith.constant 5.000000e-01 : f32
    %520 = vector.broadcast %cst_146 : f32 to vector<3x1xf32>
    %521 = arith.mulf %520, %519 : vector<3x1xf32>
    %522 = vector.broadcast %521 : vector<3x1xf32> to vector<3x128xf32>
    %523 = arith.cmpf ogt, %351, %522 : vector<3x128xf32>
    %cst_147 = arith.constant 0.000000e+00 : f32
    %524 = vector.broadcast %cst_147 : f32 to vector<3x128xf32>
    %525 = arith.select %523, %360, %524 : vector<3x128xi1>, vector<3x128xf32>
    %cst_148 = arith.constant dense<0.000000e+00> : vector<3xf32>
    %526 = vector.multi_reduction <add>, %525, %cst_148 [1] : vector<3x128xf32> to vector<3xf32>
    %527 = vector.shape_cast %526 : vector<3xf32> to vector<3x1xf32>
    %cst_149 = arith.constant 0.899999976 : f32
    %528 = vector.broadcast %cst_149 : f32 to vector<3x1xf32>
    %529 = arith.cmpf ole, %527, %528 : vector<3x1xf32>
    %530 = arith.select %529, %517, %521 : vector<3x1xi1>, vector<3x1xf32>
    %531 = arith.select %529, %521, %518 : vector<3x1xi1>, vector<3x1xf32>
    %532 = arith.addf %530, %531 : vector<3x1xf32>
    %cst_150 = arith.constant 5.000000e-01 : f32
    %533 = vector.broadcast %cst_150 : f32 to vector<3x1xf32>
    %534 = arith.mulf %533, %532 : vector<3x1xf32>
    %535 = vector.broadcast %534 : vector<3x1xf32> to vector<3x128xf32>
    %536 = arith.cmpf ogt, %351, %535 : vector<3x128xf32>
    %cst_151 = arith.constant 0.000000e+00 : f32
    %537 = vector.broadcast %cst_151 : f32 to vector<3x128xf32>
    %538 = arith.select %536, %360, %537 : vector<3x128xi1>, vector<3x128xf32>
    %cst_152 = arith.constant dense<0.000000e+00> : vector<3xf32>
    %539 = vector.multi_reduction <add>, %538, %cst_152 [1] : vector<3x128xf32> to vector<3xf32>
    %540 = vector.shape_cast %539 : vector<3xf32> to vector<3x1xf32>
    %cst_153 = arith.constant 0.899999976 : f32
    %541 = vector.broadcast %cst_153 : f32 to vector<3x1xf32>
    %542 = arith.cmpf ole, %540, %541 : vector<3x1xf32>
    %543 = arith.select %542, %530, %534 : vector<3x1xi1>, vector<3x1xf32>
    %544 = arith.select %542, %534, %531 : vector<3x1xi1>, vector<3x1xf32>
    %545 = arith.addf %543, %544 : vector<3x1xf32>
    %cst_154 = arith.constant 5.000000e-01 : f32
    %546 = vector.broadcast %cst_154 : f32 to vector<3x1xf32>
    %547 = arith.mulf %546, %545 : vector<3x1xf32>
    %548 = vector.broadcast %547 : vector<3x1xf32> to vector<3x128xf32>
    %549 = arith.cmpf ogt, %351, %548 : vector<3x128xf32>
    %cst_155 = arith.constant 0.000000e+00 : f32
    %550 = vector.broadcast %cst_155 : f32 to vector<3x128xf32>
    %551 = arith.select %549, %360, %550 : vector<3x128xi1>, vector<3x128xf32>
    %cst_156 = arith.constant dense<0.000000e+00> : vector<3xf32>
    %552 = vector.multi_reduction <add>, %551, %cst_156 [1] : vector<3x128xf32> to vector<3xf32>
    %553 = vector.shape_cast %552 : vector<3xf32> to vector<3x1xf32>
    %cst_157 = arith.constant 0.899999976 : f32
    %554 = vector.broadcast %cst_157 : f32 to vector<3x1xf32>
    %555 = arith.cmpf ole, %553, %554 : vector<3x1xf32>
    %556 = arith.select %555, %543, %547 : vector<3x1xi1>, vector<3x1xf32>
    %557 = arith.select %555, %547, %544 : vector<3x1xi1>, vector<3x1xf32>
    %558 = arith.addf %556, %557 : vector<3x1xf32>
    %cst_158 = arith.constant 5.000000e-01 : f32
    %559 = vector.broadcast %cst_158 : f32 to vector<3x1xf32>
    %560 = arith.mulf %559, %558 : vector<3x1xf32>
    %561 = vector.broadcast %560 : vector<3x1xf32> to vector<3x128xf32>
    %562 = arith.cmpf ogt, %351, %561 : vector<3x128xf32>
    %cst_159 = arith.constant 0.000000e+00 : f32
    %563 = vector.broadcast %cst_159 : f32 to vector<3x128xf32>
    %564 = arith.select %562, %360, %563 : vector<3x128xi1>, vector<3x128xf32>
    %cst_160 = arith.constant dense<0.000000e+00> : vector<3xf32>
    %565 = vector.multi_reduction <add>, %564, %cst_160 [1] : vector<3x128xf32> to vector<3xf32>
    %566 = vector.shape_cast %565 : vector<3xf32> to vector<3x1xf32>
    %cst_161 = arith.constant 0.899999976 : f32
    %567 = vector.broadcast %cst_161 : f32 to vector<3x1xf32>
    %568 = arith.cmpf ole, %566, %567 : vector<3x1xf32>
    %569 = arith.select %568, %556, %560 : vector<3x1xi1>, vector<3x1xf32>
    %570 = arith.select %568, %560, %557 : vector<3x1xi1>, vector<3x1xf32>
    %571 = arith.addf %569, %570 : vector<3x1xf32>
    %cst_162 = arith.constant 5.000000e-01 : f32
    %572 = vector.broadcast %cst_162 : f32 to vector<3x1xf32>
    %573 = arith.mulf %572, %571 : vector<3x1xf32>
    %574 = vector.broadcast %573 : vector<3x1xf32> to vector<3x128xf32>
    %575 = arith.cmpf ogt, %351, %574 : vector<3x128xf32>
    %cst_163 = arith.constant 0.000000e+00 : f32
    %576 = vector.broadcast %cst_163 : f32 to vector<3x128xf32>
    %577 = arith.select %575, %360, %576 : vector<3x128xi1>, vector<3x128xf32>
    %cst_164 = arith.constant dense<0.000000e+00> : vector<3xf32>
    %578 = vector.multi_reduction <add>, %577, %cst_164 [1] : vector<3x128xf32> to vector<3xf32>
    %579 = vector.shape_cast %578 : vector<3xf32> to vector<3x1xf32>
    %cst_165 = arith.constant 0.899999976 : f32
    %580 = vector.broadcast %cst_165 : f32 to vector<3x1xf32>
    %581 = arith.cmpf ole, %579, %580 : vector<3x1xf32>
    %582 = arith.select %581, %569, %573 : vector<3x1xi1>, vector<3x1xf32>
    %583 = arith.select %581, %573, %570 : vector<3x1xi1>, vector<3x1xf32>
    %584 = arith.addf %582, %583 : vector<3x1xf32>
    %cst_166 = arith.constant 5.000000e-01 : f32
    %585 = vector.broadcast %cst_166 : f32 to vector<3x1xf32>
    %586 = arith.mulf %585, %584 : vector<3x1xf32>
    %587 = vector.broadcast %586 : vector<3x1xf32> to vector<3x128xf32>
    %588 = arith.cmpf ogt, %351, %587 : vector<3x128xf32>
    %cst_167 = arith.constant 0.000000e+00 : f32
    %589 = vector.broadcast %cst_167 : f32 to vector<3x128xf32>
    %590 = arith.select %588, %360, %589 : vector<3x128xi1>, vector<3x128xf32>
    %cst_168 = arith.constant dense<0.000000e+00> : vector<3xf32>
    %591 = vector.multi_reduction <add>, %590, %cst_168 [1] : vector<3x128xf32> to vector<3xf32>
    %592 = vector.shape_cast %591 : vector<3xf32> to vector<3x1xf32>
    %cst_169 = arith.constant 0.899999976 : f32
    %593 = vector.broadcast %cst_169 : f32 to vector<3x1xf32>
    %594 = arith.cmpf ole, %592, %593 : vector<3x1xf32>
    %595 = arith.select %594, %582, %586 : vector<3x1xi1>, vector<3x1xf32>
    %596 = arith.select %594, %586, %583 : vector<3x1xi1>, vector<3x1xf32>
    %597 = arith.addf %595, %596 : vector<3x1xf32>
    %cst_170 = arith.constant 5.000000e-01 : f32
    %598 = vector.broadcast %cst_170 : f32 to vector<3x1xf32>
    %599 = arith.mulf %598, %597 : vector<3x1xf32>
    %600 = vector.broadcast %599 : vector<3x1xf32> to vector<3x128xf32>
    %601 = arith.cmpf ogt, %351, %600 : vector<3x128xf32>
    %cst_171 = arith.constant 0.000000e+00 : f32
    %602 = vector.broadcast %cst_171 : f32 to vector<3x128xf32>
    %603 = arith.select %601, %360, %602 : vector<3x128xi1>, vector<3x128xf32>
    %cst_172 = arith.constant dense<0.000000e+00> : vector<3xf32>
    %604 = vector.multi_reduction <add>, %603, %cst_172 [1] : vector<3x128xf32> to vector<3xf32>
    %605 = vector.shape_cast %604 : vector<3xf32> to vector<3x1xf32>
    %cst_173 = arith.constant 0.899999976 : f32
    %606 = vector.broadcast %cst_173 : f32 to vector<3x1xf32>
    %607 = arith.cmpf ole, %605, %606 : vector<3x1xf32>
    %608 = arith.select %607, %595, %599 : vector<3x1xi1>, vector<3x1xf32>
    %609 = arith.select %607, %599, %596 : vector<3x1xi1>, vector<3x1xf32>
    %610 = arith.addf %608, %609 : vector<3x1xf32>
    %cst_174 = arith.constant 5.000000e-01 : f32
    %611 = vector.broadcast %cst_174 : f32 to vector<3x1xf32>
    %612 = arith.mulf %611, %610 : vector<3x1xf32>
    %613 = vector.broadcast %612 : vector<3x1xf32> to vector<3x128xf32>
    %614 = arith.cmpf ogt, %351, %613 : vector<3x128xf32>
    %cst_175 = arith.constant 0.000000e+00 : f32
    %615 = vector.broadcast %cst_175 : f32 to vector<3x128xf32>
    %616 = arith.select %614, %360, %615 : vector<3x128xi1>, vector<3x128xf32>
    %cst_176 = arith.constant dense<0.000000e+00> : vector<3xf32>
    %617 = vector.multi_reduction <add>, %616, %cst_176 [1] : vector<3x128xf32> to vector<3xf32>
    %618 = vector.shape_cast %617 : vector<3xf32> to vector<3x1xf32>
    %cst_177 = arith.constant 0.899999976 : f32
    %619 = vector.broadcast %cst_177 : f32 to vector<3x1xf32>
    %620 = arith.cmpf ole, %618, %619 : vector<3x1xf32>
    %621 = arith.select %620, %608, %612 : vector<3x1xi1>, vector<3x1xf32>
    %622 = arith.select %620, %612, %609 : vector<3x1xi1>, vector<3x1xf32>
    %623 = arith.addf %621, %622 : vector<3x1xf32>
    %cst_178 = arith.constant 5.000000e-01 : f32
    %624 = vector.broadcast %cst_178 : f32 to vector<3x1xf32>
    %625 = arith.mulf %624, %623 : vector<3x1xf32>
    %626 = vector.broadcast %625 : vector<3x1xf32> to vector<3x128xf32>
    %627 = arith.cmpf ogt, %351, %626 : vector<3x128xf32>
    %cst_179 = arith.constant 0.000000e+00 : f32
    %628 = vector.broadcast %cst_179 : f32 to vector<3x128xf32>
    %629 = arith.select %627, %360, %628 : vector<3x128xi1>, vector<3x128xf32>
    %cst_180 = arith.constant dense<0.000000e+00> : vector<3xf32>
    %630 = vector.multi_reduction <add>, %629, %cst_180 [1] : vector<3x128xf32> to vector<3xf32>
    %631 = vector.shape_cast %630 : vector<3xf32> to vector<3x1xf32>
    %cst_181 = arith.constant 0.899999976 : f32
    %632 = vector.broadcast %cst_181 : f32 to vector<3x1xf32>
    %633 = arith.cmpf ole, %631, %632 : vector<3x1xf32>
    %634 = arith.select %633, %621, %625 : vector<3x1xi1>, vector<3x1xf32>
    %635 = arith.select %633, %625, %622 : vector<3x1xi1>, vector<3x1xf32>
    %636 = arith.addf %634, %635 : vector<3x1xf32>
    %cst_182 = arith.constant 5.000000e-01 : f32
    %637 = vector.broadcast %cst_182 : f32 to vector<3x1xf32>
    %638 = arith.mulf %637, %636 : vector<3x1xf32>
    %639 = vector.broadcast %638 : vector<3x1xf32> to vector<3x128xf32>
    %640 = arith.cmpf ogt, %351, %639 : vector<3x128xf32>
    %cst_183 = arith.constant 0.000000e+00 : f32
    %641 = vector.broadcast %cst_183 : f32 to vector<3x128xf32>
    %642 = arith.select %640, %360, %641 : vector<3x128xi1>, vector<3x128xf32>
    %cst_184 = arith.constant dense<0.000000e+00> : vector<3xf32>
    %643 = vector.multi_reduction <add>, %642, %cst_184 [1] : vector<3x128xf32> to vector<3xf32>
    %644 = vector.shape_cast %643 : vector<3xf32> to vector<3x1xf32>
    %cst_185 = arith.constant 0.899999976 : f32
    %645 = vector.broadcast %cst_185 : f32 to vector<3x1xf32>
    %646 = arith.cmpf ole, %644, %645 : vector<3x1xf32>
    %647 = arith.select %646, %634, %638 : vector<3x1xi1>, vector<3x1xf32>
    %648 = arith.select %646, %638, %635 : vector<3x1xi1>, vector<3x1xf32>
    %649 = arith.addf %647, %648 : vector<3x1xf32>
    %cst_186 = arith.constant 5.000000e-01 : f32
    %650 = vector.broadcast %cst_186 : f32 to vector<3x1xf32>
    %651 = arith.mulf %650, %649 : vector<3x1xf32>
    %652 = vector.broadcast %651 : vector<3x1xf32> to vector<3x128xf32>
    %653 = arith.cmpf ogt, %351, %652 : vector<3x128xf32>
    %cst_187 = arith.constant 0.000000e+00 : f32
    %654 = vector.broadcast %cst_187 : f32 to vector<3x128xf32>
    %655 = arith.select %653, %360, %654 : vector<3x128xi1>, vector<3x128xf32>
    %cst_188 = arith.constant dense<0.000000e+00> : vector<3xf32>
    %656 = vector.multi_reduction <add>, %655, %cst_188 [1] : vector<3x128xf32> to vector<3xf32>
    %657 = vector.shape_cast %656 : vector<3xf32> to vector<3x1xf32>
    %cst_189 = arith.constant 0.899999976 : f32
    %658 = vector.broadcast %cst_189 : f32 to vector<3x1xf32>
    %659 = arith.cmpf ole, %657, %658 : vector<3x1xf32>
    %660 = arith.select %659, %647, %651 : vector<3x1xi1>, vector<3x1xf32>
    %661 = arith.select %659, %651, %648 : vector<3x1xi1>, vector<3x1xf32>
    %662 = arith.addf %660, %661 : vector<3x1xf32>
    %cst_190 = arith.constant 5.000000e-01 : f32
    %663 = vector.broadcast %cst_190 : f32 to vector<3x1xf32>
    %664 = arith.mulf %663, %662 : vector<3x1xf32>
    %665 = vector.broadcast %664 : vector<3x1xf32> to vector<3x128xf32>
    %666 = arith.cmpf ogt, %351, %665 : vector<3x128xf32>
    %cst_191 = arith.constant 0.000000e+00 : f32
    %667 = vector.broadcast %cst_191 : f32 to vector<3x128xf32>
    %668 = arith.select %666, %360, %667 : vector<3x128xi1>, vector<3x128xf32>
    %cst_192 = arith.constant dense<0.000000e+00> : vector<3xf32>
    %669 = vector.multi_reduction <add>, %668, %cst_192 [1] : vector<3x128xf32> to vector<3xf32>
    %670 = vector.shape_cast %669 : vector<3xf32> to vector<3x1xf32>
    %cst_193 = arith.constant 0.899999976 : f32
    %671 = vector.broadcast %cst_193 : f32 to vector<3x1xf32>
    %672 = arith.cmpf ole, %670, %671 : vector<3x1xf32>
    %673 = arith.select %672, %660, %664 : vector<3x1xi1>, vector<3x1xf32>
    %674 = vector.broadcast %673 : vector<3x1xf32> to vector<3x128xf32>
    %675 = arith.cmpf ogt, %351, %674 : vector<3x128xf32>
    %cst_194 = arith.constant -1.000000e+30 : f32
    %676 = vector.broadcast %cst_194 : f32 to vector<3x128xf32>
    %677 = arith.select %675, %351, %676 : vector<3x128xi1>, vector<3x128xf32>
    %c0_195 = arith.constant 0 : index
    %c0_196 = arith.constant 0 : index
    %c0_197 = arith.constant 0 : index
    %c0_198 = arith.constant 0 : index
    %678 = vector.load %arg4[%c0_195, %c0_196, %c0_197, %c0_198] : memref<1x1x3x128xf32, #tpu.memory_space<vmem>>, vector<1x1x3x128xf32>
    %679 = vector.shape_cast %678 : vector<1x1x3x128xf32> to vector<3x128xf32>
    %680 = arith.addf %677, %679 : vector<3x128xf32>
    %cst_199 = arith.constant dense<0xFF800000> : vector<3xf32>
    %681 = vector.multi_reduction <maximumf>, %680, %cst_199 [1] : vector<3x128xf32> to vector<3xf32>
    %682 = vector.shape_cast %681 : vector<3xf32> to vector<3x1xf32>
    %683 = tpu.iota {dimensions = array<i32: 1>} : vector<3x128xi32>
    %684 = vector.broadcast %682 : vector<3x1xf32> to vector<3x128xf32>
    %685 = arith.cmpf oge, %680, %684 : vector<3x128xf32>
    %c128_i32 = arith.constant 128 : i32
    %686 = vector.broadcast %c128_i32 : i32 to vector<3x128xi32>
    %687 = arith.select %685, %683, %686 : vector<3x128xi1>, vector<3x128xi32>
    %cst_200 = arith.constant dense<2147483647> : vector<3xi32>
    %688 = vector.multi_reduction <minsi>, %687, %cst_200 [1] : vector<3x128xi32> to vector<3xi32>
    %689 = vector.shape_cast %688 : vector<3xi32> to vector<3x1xi32>
    %690 = tpu.iota {dimensions = array<i32: 2>} : vector<1x3x4xi32>
    %691 = vector.broadcast %arg1 : i32 to vector<1x3x4xi32>
    %692 = arith.cmpi eq, %690, %691 : vector<1x3x4xi32>
    %693 = vector.shape_cast %689 : vector<3x1xi32> to vector<1x3x1xi32>
    %c0_201 = arith.constant 0 : index
    %c0_202 = arith.constant 0 : index
    %c0_203 = arith.constant 0 : index
    %694 = vector.load %arg13[%c0_201, %c0_202, %c0_203] : memref<1x3x4xi32, #tpu.memory_space<vmem>>, vector<1x3x4xi32>
    %695 = vector.shape_cast %693 : vector<1x3x1xi32> to vector<1x3x1xi32>
    %696 = vector.broadcast %695 : vector<1x3x1xi32> to vector<1x3x4xi32>
    %697 = arith.select %692, %696, %694 : vector<1x3x4xi1>, vector<1x3x4xi32>
    %c0_204 = arith.constant 0 : index
    %c0_205 = arith.constant 0 : index
    %c0_206 = arith.constant 0 : index
    %698 = vector.load %arg13[%c0_204, %c0_205, %c0_206] : memref<1x3x4xi32, #tpu.memory_space<vmem>>, vector<1x3x4xi32>
    tpu.vector_store %arg13[%c0_204, %c0_205, %c0_206], %697 {strides = array<i32>} : memref<1x3x4xi32, #tpu.memory_space<vmem>>, vector<1x3x4xi32>,
    %699 = vector.broadcast %689 : vector<3x1xi32> to vector<3x128xi32>
    %700 = arith.cmpi eq, %683, %699 : vector<3x128xi32>
    %701 = arith.extui %700 : vector<3x128xi1> to vector<3x128xi32>
    %702 = arith.sitofp %701 : vector<3x128xi32> to vector<3x128xf32>
    %703 = arith.truncf %702 : vector<3x128xf32> to vector<3x128xbf16>
    %c0_207 = arith.constant 0 : index
    %c0_208 = arith.constant 0 : index
    %704 = vector.load %arg18[%c0_207, %c0_208] : memref<3x128xbf16, #tpu.memory_space<vmem>>, vector<3x128xbf16>
    tpu.vector_store %arg18[%c0_207, %c0_208], %703 {strides = array<i32>} : memref<3x128xbf16, #tpu.memory_space<vmem>>, vector<3x128xbf16>,
    return
  }
  func.func @transform_0(%arg0: i32, %arg1: i32) -> (i32, i32, i32) {
    %c0_i32 = arith.constant 0 : i32
    %c0_i32_0 = arith.constant 0 : i32
    %c0_i32_1 = arith.constant 0 : i32
    return %arg0, %c0_i32, %c0_i32_0 : i32, i32, i32
  }
  func.func @transform_1(%arg0: i32, %arg1: i32) -> (i32, i32, i32) {
    %c0_i32 = arith.constant 0 : i32
    %c0_i32_0 = arith.constant 0 : i32
    %c0_i32_1 = arith.constant 0 : i32
    return %arg0, %c0_i32, %c0_i32_0 : i32, i32, i32
  }
  func.func @transform_2(%arg0: i32, %arg1: i32) -> (i32, i32, i32, i32) {
    %c0_i32 = arith.constant 0 : i32
    %c0_i32_0 = arith.constant 0 : i32
    %c0_i32_1 = arith.constant 0 : i32
    return %arg0, %arg1, %c0_i32, %c0_i32_0 : i32, i32, i32, i32
  }
  func.func @transform_3(%arg0: i32, %arg1: i32) -> (i32, i32) {
    %c0_i32 = arith.constant 0 : i32
    %c0_i32_0 = arith.constant 0 : i32
    %c0_i32_1 = arith.constant 0 : i32
    return %c0_i32, %c0_i32_0 : i32, i32
  }
  func.func @transform_4(%arg0: i32, %arg1: i32) -> (i32, i32) {
    %c0_i32 = arith.constant 0 : i32
    %c0_i32_0 = arith.constant 0 : i32
    %c0_i32_1 = arith.constant 0 : i32
    return %c0_i32, %c0_i32_0 : i32, i32
  }
  func.func @transform_5(%arg0: i32, %arg1: i32) -> (i32, i32) {
    %c0_i32 = arith.constant 0 : i32
    %c0_i32_0 = arith.constant 0 : i32
    %c0_i32_1 = arith.constant 0 : i32
    return %c0_i32, %c0_i32_0 : i32, i32
  }
  func.func @transform_6(%arg0: i32, %arg1: i32) -> (i32, i32) {
    %c0_i32 = arith.constant 0 : i32
    %c0_i32_0 = arith.constant 0 : i32
    %c0_i32_1 = arith.constant 0 : i32
    return %c0_i32, %c0_i32_0 : i32, i32
  }
  func.func @transform_7(%arg0: i32, %arg1: i32) -> (i32, i32) {
    %c0_i32 = arith.constant 0 : i32
    %c0_i32_0 = arith.constant 0 : i32
    %c0_i32_1 = arith.constant 0 : i32
    return %c0_i32, %c0_i32_0 : i32, i32
  }
  func.func @transform_8(%arg0: i32, %arg1: i32) -> (i32, i32) {
    %c0_i32 = arith.constant 0 : i32
    %c0_i32_0 = arith.constant 0 : i32
    %c0_i32_1 = arith.constant 0 : i32
    return %c0_i32, %c0_i32_0 : i32, i32
  }
  func.func @transform_9(%arg0: i32, %arg1: i32) -> (i32, i32) {
    %c0_i32 = arith.constant 0 : i32
    %c0_i32_0 = arith.constant 0 : i32
    %c0_i32_1 = arith.constant 0 : i32
    return %c0_i32, %c0_i32_0 : i32, i32
  }
  func.func @transform_10(%arg0: i32, %arg1: i32) -> (i32, i32) {
    %c0_i32 = arith.constant 0 : i32
    %c0_i32_0 = arith.constant 0 : i32
    %c0_i32_1 = arith.constant 0 : i32
    return %c0_i32, %c0_i32_0 : i32, i32
  }
  func.func @transform_11(%arg0: i32, %arg1: i32) -> (i32, i32, i32) {
    %c0_i32 = arith.constant 0 : i32
    %c0_i32_0 = arith.constant 0 : i32
    %c0_i32_1 = arith.constant 0 : i32
    return %arg0, %c0_i32, %c0_i32_0 : i32, i32, i32
  }
}

</mosaic_0001>

<bundles_post_ra>
// kernel: tpu_custom_call.1
= control target key start
LH: loop header
LB: loop body
LE: loop exit
PB: predicated region body
PF: predicated region fallthrough
CT: control target
= control target key end

     0   :  { %s2324_s17 = smov 0   ;;  %s2326_s18 = smov 0   ;;  %s2841_s0 = inlined_call_operand.vmem [shape: s32[2,8,1], index: 0, kind: input, shape index: {}]   ;;  %s2842_s1 = inlined_call_operand.vmem [shape: f32[2,1,8], index: 1, kind: input, shape index: {}]   ;;  %s2843_s2 = inlined_call_operand.vmem [shape: f32[2,4,3,128], index: 2, kind: input, shape index: {}]   ;;  %s2844_s3 = inlined_call_operand.vmem [shape: f32[128,32], index: 3, kind: input, shape index: {}]   ;;  %s2845_s4 = inlined_call_operand.vmem [shape: f32[32,128], index: 4, kind: input, shape index: {}]   ;;  %s2846_s5 = inlined_call_operand.vmem [shape: f32[32,32], index: 5, kind: input, shape index: {}]   ;;  %s2847_s6 = inlined_call_operand.vmem [shape: f32[32,64], index: 6, kind: input, shape index: {}]   ;;  %s2848_s7 = inlined_call_operand.vmem [shape: f32[64,32], index: 7, kind: input, shape index: {}]   ;;  %s2849_s8 = inlined_call_operand.vmem [shape: f32[32,128], index: 8, kind: input, shape index: {}]   ;;  %s2850_s9 = inlined_call_operand.vmem [shape: f32[32,32], index: 9, kind: input, shape index: {}]   ;;  %s2851_s10 = inlined_call_operand.vmem [shape: f32[32,32], index: 10, kind: input, shape index: {}]   ;;  %s2852_s11 = inlined_call_operand.vmem [shape: s32[2,3,4], index: 11, kind: output, shape index: {}]  }
   0x1   :  { %s2328_s19 = smov 0   ;;  %s2330_s20 = smov 0  }
   0x2   :  { %s2332_s21 = smov 0  }
   0x3 LB: > { %2856 = sst [smem:[#allocation7_spill]] %s2248_s19  ;;  %s30_s22 = sadd.s32 1, %s2248_s19  ;;  %s2256_s21 = sphi %s2332_s21, %s21_s21   ;;  %s2252_s20 = sphi %s2330_s20, %s2865_s20   ;;  %s2248_s19 = sphi %s2328_s19, %s2864_s19   ;;  %s2244_s18 = sphi %s2326_s18, %s2863_s18   ;;  %s2240_s17 = sphi %s2324_s17, %s2862_s17  }
   0x4   : > { %2857 = sst [smem:[#allocation8_spill]] %s2252_s20  ;;  %s33_s23 = sadd.s32 1, %s2252_s20 }
   0x5   : > { %2858 = sst [smem:[#allocation9_spill]] %s2256_s21  ;;  %p31_p0 = scmp.ge.s32.totalorder %s30_s22, 4 }
   0x6   : > { %p1930_p1 = scmp.ge.s32.totalorder %s2256_s21, 1  ;;  %p371_p2 = scmp.lt.s32.totalorder %s2256_s21, 9 }
   0x7   : > { %s2867_s22 = smov (%p31_p0, %s30_s22), 0  ;;  %s2869_s23 = smov (!%p31_p0, %s33_s23), %s2252_s20 }
   0x8   : > { %2859 = sst [smem:[#allocation10_spill]] %s2867_s22  ;;  %p372_p3 = pnand %p1930_p1, %p371_p2 }
   0x9   : > { %p35_p4 = scmp.ge.s32.totalorder %s2869_s23, 2  ;;  %p420_p5 = scmp.lt.s32.totalorder (!%p372_p3), %s2244_s18, 1 }
   0xa   : > { %375 = sbr.rel (%p372_p3) target bundleno = 9298 (0x2452), region = 64  ;;  %p429_p6 = scmp.lt.s32.totalorder (!%p372_p3), %s2240_s17, 3 }
   0xb   : > { %s2871_s23 = smov (%p35_p4, %s2869_s23), 0  ;;  %p1935_p7 = scmp.ne.s32.totalorder (!%p372_p3), %s2240_s17, 0 }
   0xc   : > { %2860 = sst [smem:[#allocation11_spill]] %s2871_s23 }
   0xf   : > { %s2873_s18 = smov (!%p420_p5, %s2244_s18), 1  ;;  %s2262_s29 = smov (!%p1935_p7), 96  }
  0x10   : > { %s430_s24 = scalar_select %p429_p6, %s2240_s17, 3 }
  0x11   : > { %s1931_s25 = sshll.u32 %s2873_s18, 3  ;;  %s426_s28 = scalar_lea.vmem %s2842_s1, %s2873_s18 }
  0x12   : > { %s423_s12 = scalar_lea.vmem %s2841_s0, %s1931_s25  ;;  %s1932_s13 = sshll.u32 %s2873_s18, 2  ;;  %v2364_v0 = vld [vmem:[%s426_s28] sm:$0x1] }
  0x13   : > { %s432_s14 = sadd.s32 %s1932_s13, %s430_s24  ;;  %s2369_s23 = scalar_lea.vmem %s2852_s11, %s1932_s13 }
  0x14   : > { %s1933_s22 = sshll.u32 %s432_s14, 2  ;;  %444 = sbr.rel (%p1935_p7) target bundleno = 1856 (0x740), region = 68 }
  0x15   : > { %s2374_s21 = scalar_lea.vmem %s2843_s2, %s1933_s22  ;;  %s2261_s28 = smov (!%p1935_p7), 64  }
  0x19   : > { %vm1030_vm0 = vcmask 26624   ;;  %v469_v1 = vld [vmem:[%s423_s12] sm:$0xff]  ;;  %v459_v2 = vld [vmem:[%s2844_s3 + $0x70] sm:$0xff]  ;;  %v460_v3 = vld [vmem:[%s2844_s3 + $0x78] sm:$0xff]  ;;  %v470_v4 = vlaneseq  ;;  %v2258_v5 = vmov 0   ;;  %vm1024_vm1 = vcmask 1041408  }
  0x1a   : > { %2205 = vset.pattern.permute.xlu0 %v2258_v5  ;;  %1031 = vst.msk [vmem:[%s2369_s23] sm:$0x7] %vm1030_vm0, %v2258_v5  ;;  %v2384_v6 = vpack.c.bf16 %v460_v3, %v459_v2  ;;  %v457_v7 = vld [vmem:[%s2844_s3 + $0x60] sm:$0xff]  ;;  %v458_v8 = vld [vmem:[%s2844_s3 + $0x68] sm:$0xff]  ;;  %vm1025_vm2 = vsmask.f32 1280 }
  0x1b   : > { %473 = vperm.xlu0 %2205, %v469_v1   ;;  %v471_v9 = vand.u32 127, %v470_v4  ;;  %v2393_v10 = vpack.c.bf16 %v458_v8, %v457_v7  ;;  %v455_v11 = vld [vmem:[%s2844_s3 + $0x50] sm:$0xff]  ;;  %v456_v12 = vld [vmem:[%s2844_s3 + $0x58] sm:$0xff]  ;;  %v2259_v13 = vmov 0.0   ;;  %vm1026_vm4 = vmand %vm1024_vm1, %vm1025_vm2  ;;  %v2260_v38 = vmov 1.0|1.0  }
  0x1c   : > { %479 = vmatpush.bf16.msra.mxu3 %v2384_v6  ;;  %v1027_v15 = vld [vmem:[#allocation6] sm:$0x3]  ;;  %v2402_v17 = vpack.c.bf16 %v456_v12, %v455_v11  ;;  %v453_v18 = vld [vmem:[%s2844_s3 + $0x40] sm:$0xff]  ;;  %v454_v19 = vld [vmem:[%s2844_s3 + $0x48] sm:$0xff]  ;;  %vm499_vm7 = vcmask 261120   ;;  %vm562_vm8 = vcmask 1043456  }
  0x1d   : > { %vm1020_vm3 = vcmp.eq.s32.totalorder %v471_v9, 0  ;;  %v2411_v21 = vpack.c.bf16 %v454_v19, %v453_v18  ;;  %v451_v22 = vld [vmem:[%s2844_s3 + $0x30] sm:$0xff]  ;;  %v452_v23 = vld [vmem:[%s2844_s3 + $0x38] sm:$0xff]  ;;  %v449_v25 = vld [vmem:[%s2844_s3 + $0x20] sm:$0xff]  ;;  %v541_v52 = vperm.slane %v2364_v0, 0  ;;  %vm544_vm9 = vcmask 64512  }
  0x1e   : > { %v1972_v14 = vsel %vm1020_vm3, 1.0, %v2259_v13  ;;  %v2420_v24 = vpack.c.bf16 %v452_v23, %v451_v22  ;;  %v450_v26 = vld [vmem:[%s2844_s3 + $0x28] sm:$0xff]  ;;  %v447_v28 = vld [vmem:[%s2844_s3 + $0x10] sm:$0xff]  ;;  %v448_v29 = vld [vmem:[%s2844_s3 + $0x18] sm:$0xff]  ;;  %vm640_vm10 = vcmask 523264   ;;  %vm686_vm11 = vcmask 257024  }
  0x1f   : > { %v1023_v16 = vpack.c.bf16 %v1972_v14, %v1972_v14  ;;  %v2429_v27 = vpack.c.bf16 %v450_v26, %v449_v25  ;;  %v2438_v30 = vpack.c.bf16 %v448_v29, %v447_v28  ;;  %v445_v31 = vld [vmem:[%s2844_s3] sm:$0xff]  ;;  %v446_v32 = vld [vmem:[%s2844_s3 + $0x8] sm:$0xff]  ;;  %v495_v34 = vld [vmem:[%s2845_s4 + $0x10] sm:$0xff]  ;;  %vm883_vm12 = vcmask 60416  }
  0x20   : > { %480 = vmatpush.bf16.msra.mxu3 %v2393_v10  ;;  %v2447_v33 = vpack.c.bf16 %v446_v32, %v445_v31  ;;  %v496_v35 = vld [vmem:[%s2845_s4 + $0x18] sm:$0xff]  ;;  %v493_v39 = vld [vmem:[%s2845_s4] sm:$0xff]  ;;  %v494_v40 = vld [vmem:[%s2845_s4 + $0x8] sm:$0xff] }
  0x21   : > { %v1028_v20 = vsel %vm1026_vm4, %v1023_v16, %v1027_v15  ;;  %v498_v36 = vpack.c.bf16 %v496_v35, %v495_v34  ;;  %v497_v41 = vpack.c.bf16 %v494_v40, %v493_v39  ;;  %v582_v63 = vld [vmem:[%s2846_s5 + $0x10] sm:$0xff]  ;;  %v583_v1 = vld [vmem:[%s2846_s5 + $0x18] sm:$0xff]  ;;  %v580_v8 = vld [vmem:[%s2846_s5] sm:$0xff] }
  0x22   : > { %1029 = vst [vmem:[#allocation6] sm:$0x3] %v1028_v20  ;;  %v585_v2 = vpack.c.bf16 %v583_v1, %v582_v63  ;;  %v606_v12 = vld [vmem:[%s2847_s6 + $0x10] sm:$0xff]  ;;  %v607_v13 = vld [vmem:[%s2847_s6 + $0x18] sm:$0xff]  ;;  %v604_v19 = vld [vmem:[%s2847_s6] sm:$0xff]  ;;  %v716_v63 = vsel %vm499_vm7, %v2384_v6, 0 }
  0x23   : > { %509 = vmatpush.bf16.msra.mxu1 %v498_v36  ;;  %v609_v14 = vpack.c.bf16 %v607_v13, %v606_v12  ;;  %v605_v20 = vld [vmem:[%s2847_s6 + $0x8] sm:$0xff]  ;;  %v634_v23 = vld [vmem:[%s2848_s7 + $0x30] sm:$0xff]  ;;  %v635_v25 = vld [vmem:[%s2848_s7 + $0x38] sm:$0xff]  ;;  %900 = vmatpush.bf16.xpose.msra.mxu0 %v716_v63  ;;  %v713_v1 = vsel %vm499_vm7, %v2393_v10, 0 }
  0x24   : > { %481 = vmatpush.bf16.msra.mxu3 %v2402_v17  ;;  %v608_v22 = vpack.c.bf16 %v605_v20, %v604_v19  ;;  %v632_v26 = vld [vmem:[%s2848_s7 + $0x20] sm:$0xff]  ;;  %v639_v28 = vpack.c.bf16 %v635_v25, %v634_v23  ;;  %v633_v29 = vld [vmem:[%s2848_s7 + $0x28] sm:$0xff]  ;;  %v630_v32 = vld [vmem:[%s2848_s7 + $0x10] sm:$0xff] }
  0x25   : > { %v638_v31 = vpack.c.bf16 %v633_v29, %v632_v26  ;;  %v631_v34 = vld [vmem:[%s2848_s7 + $0x18] sm:$0xff]  ;;  %v628_v40 = vld [vmem:[%s2848_s7] sm:$0xff] }
  0x26   : > { %v637_v35 = vpack.c.bf16 %v631_v34, %v630_v32 }
  0x27   : > { %510 = vmatpush.bf16.msra.mxu1 %v497_v41  ;;  %v629_v41 = vld [vmem:[%s2848_s7 + $0x8] sm:$0xff] }
  0x28   : > { %482 = vmatpush.bf16.msra.mxu3 %v2411_v21 }
  0x2b   : > { %619 = vmatpush.bf16.msrb.mxu1 %v609_v14  ;;  %901 = vmatpush.bf16.xpose.msra.mxu0 %v713_v1 }
  0x2c   : > { %483 = vmatpush.bf16.msra.mxu3 %v2420_v24 }
  0x2f   : > { %620 = vmatpush.bf16.msrb.mxu1 %v608_v22 }
  0x30   : > { %484 = vmatpush.bf16.msra.mxu3 %v2429_v27 }
  0x34   : > { %485 = vmatpush.bf16.msra.mxu3 %v2438_v30 }
  0x38   : > { %486 = vmatpush.bf16.msra.mxu3 %v2447_v33 }
  0x8d   : > { %v474_v37 = vpop.permute.xlu0 %473 }
  0x8e   : > { %vm475_vm5 = vcmp.eq.s32.totalorder %v471_v9, %v474_v37  ;;  %v581_v9 = vld [vmem:[%s2846_s5 + $0x8] sm:$0xff] }
  0x8f   : > { %vm1937_vm6 = vmpackc.low %vm475_vm5, %vm475_vm5  ;;  %v584_v11 = vpack.c.bf16 %v581_v9, %v580_v8  ;;  %v698_v9 = vsel %vm499_vm7, %v2438_v30, 0 }
  0x90   : > { %1938 = vmatmul.msk.bf16.vlgmr.msra.gmra.mxu3 %vm1937_vm6, %v2260_v38 }
 0x113   : > { %v2462_v42 = vpop.f32.mrf.mxu3 }
 0x114   : > { %v492_v43 = vpack.c.bf16 %v2462_v42, %v2462_v42 }
 0x116   : > { %1939 = vmatmul.msk.bf16.vlgmr.msra.gmra.mxu1 %vm499_vm7, %v492_v43  ;;  %v636_v43 = vpack.c.bf16 %v629_v41, %v628_v40 }
 0x11b   : > { %v490_v44 = vpop.f32.mrf.mxu3 }
 0x11c   : > { %v661_v44 = vld [vmem:[%s2849_s8 + $0x10] sm:$0xff] }
 0x193   : > { %v512_v45 = vpop.f32.mrf.mxu1 }
 0x194   : > { %v516_v46 = vpack.c.bf16 %v512_v45, %v512_v45 }
 0x196   : > { %557 = vrot.lane.b32.xlu2 %v516_v46, %s2261_s28  ;;  %518 = vrot.lane.b32.xlu0 %v516_v46, %s2262_s29 }
 0x19b   : > { %v514_v47 = vpop.f32.mrf.mxu1 }
 0x1f0   : > { %v558_v48 = vpop.permute.xlu2 %557 }
 0x1f1   : > { %v564_v49 = vsel %vm562_vm8, %v558_v48, 0 }
 0x1f2   : > { %573 = vmatpush.bf16.msrb.mxu3 %v564_v49 }
 0x1f6   : > { %595 = vmatpush.bf16.msra.mxu3 %v585_v2  ;;  %v710_v2 = vsel %vm499_vm7, %v2402_v17, 0 }
 0x1f7   : > { %902 = vmatpush.bf16.xpose.msra.mxu0 %v710_v2 }
 0x1fa   : > { %596 = vmatpush.bf16.msra.mxu3 %v584_v11  ;;  %v695_v11 = vsel %vm499_vm7, %v2447_v33, 0 }
 0x208   : > { %v519_v50 = vpop.permute.xlu0 %518 }
 0x209   : > { %v524_v51 = vsel %vm499_vm7, %v519_v50, 0  ;;  %v690_v50 = vld [vmem:[%s2850_s9 + $0x10] sm:$0xff] }
 0x20a   : > { %533 = vmatpush.bf16.xpose.msra.mxu2 %v524_v51  ;;  %v691_v51 = vld [vmem:[%s2850_s9 + $0x18] sm:$0xff] }
 0x211   : > { %1940 = vmatmul.msk.bf16.vlgmr.msra.gmra.mxu2 %vm499_vm7, %v516_v46 }
 0x212   : > { %648 = vmatpush.bf16.msrb.mxu2 %v639_v28 }
 0x216   : > { %649 = vmatpush.bf16.msrb.mxu2 %v638_v31 }
 0x21a   : > { %650 = vmatpush.bf16.msrb.mxu2 %v637_v35  ;;  %v984_v35 = vld [vmem:[%s2851_s10 + $0x18] sm:$0xff] }
 0x21e   : > { %651 = vmatpush.bf16.msrb.mxu2 %v636_v43 }
 0x294   : > { %v535_v53 = vpop.f32.mrf.mxu2 }
 0x295   : > { %v539_v54 = vmul.f32 0.17677669, %v535_v53  ;;  %v688_v53 = vld [vmem:[%s2850_s9] sm:$0xff] }
 0x297   : > { %v543_v55 = vadd.f32 %v541_v52, %v539_v54  ;;  %v693_v52 = vpack.c.bf16 %v691_v51, %v690_v50  ;;  %v689_v54 = vld [vmem:[%s2850_s9 + $0x8] sm:$0xff] }
 0x299   : > { %v545_v56 = vsel %vm544_vm9, %v543_v55, -inf  ;;  %724 = vmatpush.bf16.msra.mxu1 %v693_v52 }
 0x29a   : > { %546 = vmax.xlane.f32.xlu1 %v545_v56  ;;  %v659_v56 = vld [vmem:[%s2849_s8] sm:$0xff] }
 0x29c   : > { %v537_v57 = vpop.f32.mrf.mxu2 }
 0x29d   : > { %v660_v57 = vld [vmem:[%s2849_s8 + $0x8] sm:$0xff] }
 0x30d   : > { %v547_v58 = vpop.xlane.xlu1 %546 }
 0x30e   : > { %v548_v59 = vsub.f32 %v543_v55, %v547_v58  ;;  %v692_v55 = vpack.c.bf16 %v689_v54, %v688_v53  ;;  %v663_v58 = vpack.c.bf16 %v660_v57, %v659_v56 }
 0x310   : > { %v549_v60 = vmul.f32 1.442695, %v548_v59  ;;  %725 = vmatpush.bf16.msra.mxu1 %v692_v55 }
 0x312   : > { %2206 = vpow2.f32 %v549_v60 }
 0x318   : > { %v2207_v61 = vpop.eup %2206 }
 0x319   : > { %v551_v62 = vsel %vm544_vm9, %v2207_v61, 0.0 }
 0x31a   : > { %552 = vadd.xlane.f32.xlu1 %v551_v62 }
 0x38d   : > { %v553_v3 = vpop.xlane.xlu1 %552 }
 0x38e   : > { %2208 = vrcp.f32 %v553_v3  ;;  %v707_v3 = vsel %vm499_vm7, %v2411_v21, 0 }
 0x38f   : > { %903 = vmatpush.bf16.xpose.msra.mxu0 %v707_v3 }
 0x394   : > { %v2209_v4 = vpop.eup %2208 }
 0x395   : > { %v555_v5 = vmul.f32 %v2209_v4, %v2207_v61  ;;  %v704_v4 = vsel %vm499_vm7, %v2420_v24, 0 }
 0x397   : > { %v556_v7 = vpack.c.bf16 %v555_v5, %v555_v5  ;;  %904 = vmatpush.bf16.xpose.msra.mxu0 %v704_v4 }
 0x399   : > { %1941 = vmatmul.msk.bf16.vlgmr.msrb.gmra.mxu3 %vm544_vm9, %v556_v7  ;;  %v701_v7 = vsel %vm499_vm7, %v2429_v27, 0 }
 0x39f   : > { %905 = vmatpush.bf16.xpose.msra.mxu0 %v701_v7 }
 0x3a7   : > { %906 = vmatpush.bf16.xpose.msra.mxu0 %v698_v9 }
 0x3af   : > { %907 = vmatpush.bf16.xpose.msra.mxu0 %v695_v11 }
 0x3b6   : > { %1962 = vmatmul.msk.bf16.vlgmr.msra.gmra.mxu0 %vm499_vm7, %v2447_v33 }
 0x3c6   : > { %1963 = vmatmul.msk.bf16.gmra.mxu0 %vm499_vm7, %v2438_v30 }
 0x3d6   : > { %1964 = vmatmul.msk.bf16.gmra.mxu0 %vm499_vm7, %v2429_v27 }
 0x3e6   : > { %1965 = vmatmul.msk.bf16.gmra.mxu0 %vm499_vm7, %v2420_v24 }
 0x3f6   : > { %1966 = vmatmul.msk.bf16.gmra.mxu0 %vm499_vm7, %v2411_v21 }
 0x406   : > { %1967 = vmatmul.msk.bf16.gmra.mxu0 %vm499_vm7, %v2402_v17 }
 0x416   : > { %1968 = vmatmul.msk.bf16.gmra.mxu0 %vm499_vm7, %v2393_v10 }
 0x41c   : > { %v575_v15 = vpop.f32.mrf.mxu3 }
 0x41d   : > { %v579_v16 = vpack.c.bf16 %v575_v15, %v575_v15 }
 0x41f   : > { %1942 = vmatmul.msk.bf16.vlgmr.msra.gmra.mxu3 %vm499_vm7, %v579_v16 }
 0x424   : > { %v577_v18 = vpop.f32.mrf.mxu3 }
 0x4a2   : > { %v598_v36 = vpop.f32.mrf.mxu3 }
 0x4a3   : > { %v602_v37 = vadd.f32 %v598_v36, %v2462_v42  ;;  %v662_v42 = vld [vmem:[%s2849_s8 + $0x18] sm:$0xff] }
 0x4a4   : > { %v664_v45 = vpack.c.bf16 %v662_v42, %v661_v44  ;;  %v909_v44 = vpop.f32.mrf.mxu0 }
 0x4a5   : > { %v603_v38 = vpack.c.bf16 %v602_v37, %v602_v37 }
 0x4a6   : > { %674 = vmatpush.bf16.msrb.mxu3 %v664_v45 }
 0x4a7   : > { %1943 = vmatmul.msk.bf16.vlgmr.msrb.gmra.mxu1 %vm499_vm7, %v603_v38 }
 0x4a8   : > { %2151 = vmatpush.bf16.xpose.msrb.mxu1 %v716_v63 }
 0x4aa   : > { %v600_v39 = vpop.f32.mrf.mxu3  ;;  %675 = vmatpush.bf16.msrb.mxu3 %v663_v58 }
 0x4ac   : > { %v911_v45 = vpop.f32.mrf.mxu0 }
 0x4ae   : > { %993 = vmatpush.bf16.xpose.msra.mxu3 %v716_v63 }
 0x4b0   : > { %2152 = vmatpush.bf16.xpose.msrb.mxu1 %v713_v1 }
 0x4b6   : > { %994 = vmatpush.bf16.xpose.msra.mxu3 %v713_v1 }
 0x4b7   : > { %1946 = vmatmul.msk.bf16.vlgmr.msra.gmra.mxu1 %vm499_vm7, %v2447_v33 }
 0x4b8   : > { %2153 = vmatpush.bf16.xpose.msrb.mxu1 %v710_v2 }
 0x4be   : > { %995 = vmatpush.bf16.xpose.msra.mxu3 %v710_v2 }
 0x4c0   : > { %2154 = vmatpush.bf16.xpose.msrb.mxu1 %v707_v3 }
 0x4c6   : > { %996 = vmatpush.bf16.xpose.msra.mxu3 %v707_v3 }
 0x4c7   : > { %1947 = vmatmul.msk.bf16.gmra.mxu1 %vm499_vm7, %v2438_v30  ;;  %v982_v30 = vld [vmem:[%s2851_s10 + $0x8] sm:$0xff] }
 0x4c8   : > { %2155 = vmatpush.bf16.xpose.msrb.mxu1 %v704_v4 }
 0x4ce   : > { %997 = vmatpush.bf16.xpose.msra.mxu3 %v704_v4 }
 0x4d0   : > { %2156 = vmatpush.bf16.xpose.msrb.mxu1 %v701_v7 }
 0x4d6   : > { %998 = vmatpush.bf16.xpose.msra.mxu3 %v701_v7 }
 0x4d7   : > { %1948 = vmatmul.msk.bf16.gmra.mxu1 %vm499_vm7, %v2429_v27  ;;  %v981_v27 = vld [vmem:[%s2851_s10] sm:$0xff] }
 0x4d8   : > { %2157 = vmatpush.bf16.xpose.msrb.mxu1 %v698_v9  ;;  %v985_v31 = vpack.c.bf16 %v982_v30, %v981_v27 }
 0x4de   : > { %999 = vmatpush.bf16.xpose.msra.mxu3 %v698_v9 }
 0x4e0   : > { %2158 = vmatpush.bf16.xpose.msrb.mxu1 %v695_v11 }
 0x4e6   : > { %1000 = vmatpush.bf16.xpose.msra.mxu3 %v695_v11 }
 0x4e7   : > { %1949 = vmatmul.msk.bf16.gmra.mxu1 %vm499_vm7, %v2420_v24 }
 0x4f7   : > { %1950 = vmatmul.msk.bf16.gmra.mxu1 %vm499_vm7, %v2411_v21  ;;  %v983_v21 = vld [vmem:[%s2851_s10 + $0x10] sm:$0xff] }
 0x4f8   : > { %v986_v36 = vpack.c.bf16 %v984_v35, %v983_v21 }
 0x507   : > { %1951 = vmatmul.msk.bf16.gmra.mxu1 %vm499_vm7, %v2402_v17 }
 0x517   : > { %1952 = vmatmul.msk.bf16.gmra.mxu1 %vm499_vm7, %v2393_v10 }
 0x524   : > { %v622_v46 = vpop.f32.mrf.mxu1 }
 0x525   : > { %v626_v47 = vmax.f32 %v622_v46, 0.0  ;;  %v2096_v46 = vpack.c.bf16 %v911_v45, %v909_v44 }
 0x527   : > { %v627_v48 = vpack.c.bf16 %v626_v47, %v626_v47  ;;  %1953 = vmatmul.msk.bf16.gmra.mxu1 %vm499_vm7, %v2384_v6  ;;  %2097 = vst [vmem:[#allocation3 + $0x30] sm:$0xff] %v2096_v46   ;;  %v914_v47 = vpop.f32.mrf.mxu0 }
 0x529   : > { %1944 = vmatmul.msk.bf16.vlgmr.msrb.gmra.mxu2 %vm640_vm10, %v627_v48 }
 0x52c   : > { %v624_v49 = vpop.f32.mrf.mxu1 }
 0x52f   : > { %v916_v10 = vpop.f32.mrf.mxu0 }
 0x530   : > { %v2101_v51 = vpack.c.bf16 %v916_v10, %v914_v47 }
 0x532   : > { %2143 = vst [vmem:[#allocation3] sm:$0xff] %v2101_v51  }
 0x534   : > { %v727_v5 = vpop.f32.mrf.mxu1 }
 0x537   : > { %1969 = vmatmul.msk.bf16.vlgmr.msrb.gmra.mxu1 %vm499_vm7, %v2384_v6  ;;  %v919_v54 = vpop.f32.mrf.mxu0 }
 0x53c   : > { %v729_v8 = vpop.f32.mrf.mxu1 }
 0x53d   : > { %v767_v20 = vpack.c.bf16 %v729_v8, %v727_v5 }
 0x53f   : > { %v921_v58 = vpop.f32.mrf.mxu0 }
 0x544   : > { %v732_v12 = vpop.f32.mrf.mxu1 }
 0x547   : > { %v924_v63 = vpop.f32.mrf.mxu0 }
 0x54c   : > { %v734_v13 = vpop.f32.mrf.mxu1 }
 0x54d   : > { %v768_v22 = vpack.c.bf16 %v734_v13, %v732_v12 }
 0x54f   : > { %v926_v4 = vpop.f32.mrf.mxu0 }
 0x550   : > { %v2111_v7 = vpack.c.bf16 %v926_v4, %v924_v63 }
 0x552   : > { %2145 = vst [vmem:[#allocation3 + $0x10] sm:$0xff] %v2111_v7  }
 0x554   : > { %v737_v19 = vpop.f32.mrf.mxu1 }
 0x557   : > { %v929_v11 = vpop.f32.mrf.mxu0 }
 0x55c   : > { %v739_v33 = vpop.f32.mrf.mxu1 }
 0x55d   : > { %v769_v25 = vpack.c.bf16 %v739_v33, %v737_v19 }
 0x564   : > { %v742_v6 = vpop.f32.mrf.mxu1 }
 0x56c   : > { %v744_v23 = vpop.f32.mrf.mxu1 }
 0x56d   : > { %v770_v28 = vpack.c.bf16 %v744_v23, %v742_v6 }
 0x574   : > { %v747_v26 = vpop.f32.mrf.mxu1 }
 0x57c   : > { %v749_v29 = vpop.f32.mrf.mxu1 }
 0x57d   : > { %v771_v24 = vpack.c.bf16 %v749_v29, %v747_v26 }
 0x584   : > { %v752_v32 = vpop.f32.mrf.mxu1 }
 0x58c   : > { %v754_v34 = vpop.f32.mrf.mxu1 }
 0x58d   : > { %v772_v38 = vpack.c.bf16 %v754_v34, %v752_v32 }
 0x5ac   : > { %v653_v59 = vpop.f32.mrf.mxu2 }
 0x5ad   : > { %v657_v60 = vadd.f32 %v653_v59, %v602_v37  ;;  %v757_v37 = vpop.f32.mrf.mxu1 }
 0x5af   : > { %v658_v61 = vpack.c.bf16 %v657_v60, %v657_v60  ;;  %v2106_v60 = vpack.c.bf16 %v921_v58, %v919_v54 }
 0x5b1   : > { %1945 = vmatmul.msk.bf16.vlgmr.msrb.gmra.mxu3 %vm499_vm7, %v658_v61  ;;  %2144 = vst [vmem:[#allocation3 + $0x18] sm:$0xff] %v2106_v60  }
 0x5b4   : > { %v655_v62 = vpop.f32.mrf.mxu2 }
 0x5b5   : > { %v759_v39 = vpop.f32.mrf.mxu1 }
 0x5b6   : > { %v773_v40 = vpack.c.bf16 %v759_v39, %v757_v37 }
 0x5bd   : > { %v762_v41 = vpop.f32.mrf.mxu1 }
 0x5c1   : > { %1970 = vmatmul.msk.bf16.vlgmr.msra.gmra.mxu3 %vm499_vm7, %v985_v31 }
 0x5c5   : > { %v764_v43 = vpop.f32.mrf.mxu1 }
 0x5c6   : > { %v774_v42 = vpack.c.bf16 %v764_v43, %v762_v41 }
 0x5cd   : > { %v944_v34 = vpop.f32.mrf.mxu1 }
 0x5d1   : > { %1971 = vmatmul.msk.bf16.gmra.mxu3 %vm499_vm7, %v986_v36 }
 0x634   : > { %v677_v14 = vpop.f32.mrf.mxu3 }
 0x635   : > { %v681_v15 = vpack.c.bf16 %v677_v14, %v677_v14 }
 0x637   : > { %v800_v16 = vsel %vm499_vm7, %v681_v15, 0  ;;  %683 = vrot.lane.b32.xlu2 %v681_v15, %s2262_s29  ;;  %v931_v15 = vpop.f32.mrf.mxu0 }
 0x638   : > { %809 = vmatpush.bf16.xpose.msra.mxu2 %v800_v16 }
 0x63c   : > { %v679_v18 = vpop.f32.mrf.mxu3 }
 0x63d   : > { %v2116_v18 = vpack.c.bf16 %v931_v15, %v929_v11 }
 0x63f   : > { %1954 = vmatmul.msk.bf16.vlgmr.msra.gmra.mxu2 %vm499_vm7, %v767_v20  ;;  %2146 = vst [vmem:[#allocation3 + $0x8] sm:$0xff] %v2116_v18   ;;  %v934_v33 = vpop.f32.mrf.mxu0 }
 0x647   : > { %v936_v26 = vpop.f32.mrf.mxu0 }
 0x648   : > { %v2121_v27 = vpack.c.bf16 %v936_v26, %v934_v33 }
 0x64a   : > { %2147 = vst [vmem:[#allocation3 + $0x20] sm:$0xff] %v2121_v27  }
 0x64f   : > { %1955 = vmatmul.msk.bf16.gmra.mxu2 %vm499_vm7, %v768_v22  ;;  %v1002_v22 = vpop.f32.mrf.mxu3 }
 0x65f   : > { %1956 = vmatmul.msk.bf16.gmra.mxu2 %vm499_vm7, %v769_v25 }
 0x66f   : > { %1957 = vmatmul.msk.bf16.gmra.mxu2 %vm499_vm7, %v770_v28  ;;  %v1004_v28 = vpop.f32.mrf.mxu3 }
 0x670   : > { %v2136_v30 = vpack.c.bf16 %v1004_v28, %v1002_v22 }
 0x672   : > { %2137 = vst [vmem:[#allocation4] sm:$0xff] %v2136_v30  }
 0x677   : > { %v1007_v35 = vpop.f32.mrf.mxu3 }
 0x67f   : > { %1958 = vmatmul.msk.bf16.gmra.mxu2 %vm499_vm7, %v771_v24  ;;  %v939_v24 = vpop.f32.mrf.mxu0  ;;  %v1009_v43 = vpop.f32.mrf.mxu3 }
 0x680   : > { %v2141_v44 = vpack.c.bf16 %v1009_v43, %v1007_v35 }
 0x682   : > { %2150 = vst [vmem:[#allocation4 + $0x8] sm:$0xff] %v2141_v44  }
 0x68f   : > { %1959 = vmatmul.msk.bf16.gmra.mxu2 %vm499_vm7, %v772_v38  ;;  %v941_v38 = vpop.f32.mrf.mxu0 }
 0x691   : > { %v684_v17 = vpop.permute.xlu2 %683 }
 0x692   : > { %687 = vst.msk [vmem:[#allocation5] sm:$0xf] %vm686_vm11, %v684_v17  ;;  %v946_v17 = vpop.f32.mrf.mxu1 }
 0x693   : > { %v2131_v41 = vpack.c.bf16 %v946_v17, %v944_v34 }
 0x695   : > { %2149 = vst [vmem:[#allocation3 + $0x38] sm:$0xff] %v2131_v41  }
 0x69f   : > { %1960 = vmatmul.msk.bf16.gmra.mxu2 %vm499_vm7, %v773_v40  ;;  %v2126_v40 = vpack.c.bf16 %v941_v38, %v939_v24 }
 0x6a1   : > { %2148 = vst [vmem:[#allocation3 + $0x28] sm:$0xff] %v2126_v40  }
 0x6af   : > { %1961 = vmatmul.msk.bf16.gmra.mxu2 %vm499_vm7, %v774_v42 }
 0x6c2   : > { %v811_v48 = vpop.f32.mrf.mxu2 }
 0x6c3   : > { %v851_v49 = vmul.f32 0.17677669, %v811_v48 }
 0x6c5   : > { %v867_v50 = vpack.c.bf16 %v851_v49, %v851_v49 }
 0x6c7   : > { %884 = vst.msk [vmem:[#allocation2] sm:$0xf] %vm883_vm12, %v867_v50 }
 0x6ca   : > { %v813_v52 = vpop.f32.mrf.mxu2 }
 0x6cb   : > { %v852_v53 = vmul.f32 0.17677669, %v813_v52 }
 0x6cd   : > { %v868_v55 = vpack.c.bf16 %v852_v53, %v852_v53 }
 0x6cf   : > { %885 = vst.msk [vmem:[#allocation2 + $0x4] sm:$0xf] %vm883_vm12, %v868_v55 }
 0x6d2   : > { %v816_v56 = vpop.f32.mrf.mxu2 }
 0x6d3   : > { %v853_v57 = vmul.f32 0.17677669, %v816_v56 }
 0x6d5   : > { %v869_v59 = vpack.c.bf16 %v853_v57, %v853_v57 }
 0x6d7   : > { %886 = vst.msk [vmem:[#allocation2 + $0x8] sm:$0xf] %vm883_vm12, %v869_v59 }
 0x6da   : > { %v818_v61 = vpop.f32.mrf.mxu2 }
 0x6db   : > { %v854_v62 = vmul.f32 0.17677669, %v818_v61 }
 0x6dd   : > { %v870_v1 = vpack.c.bf16 %v854_v62, %v854_v62 }
 0x6df   : > { %887 = vst.msk [vmem:[#allocation2 + $0xc] sm:$0xf] %vm883_vm12, %v870_v1 }
 0x6e2   : > { %v821_v2 = vpop.f32.mrf.mxu2 }
 0x6e3   : > { %v855_v3 = vmul.f32 0.17677669, %v821_v2 }
 0x6e5   : > { %v871_v5 = vpack.c.bf16 %v855_v3, %v855_v3 }
 0x6e7   : > { %888 = vst.msk [vmem:[#allocation2 + $0x10] sm:$0xf] %vm883_vm12, %v871_v5 }
 0x6ea   : > { %v823_v8 = vpop.f32.mrf.mxu2 }
 0x6eb   : > { %v856_v9 = vmul.f32 0.17677669, %v823_v8 }
 0x6ed   : > { %v872_v12 = vpack.c.bf16 %v856_v9, %v856_v9 }
 0x6ef   : > { %889 = vst.msk [vmem:[#allocation2 + $0x14] sm:$0xf] %vm883_vm12, %v872_v12 }
 0x6f2   : > { %v826_v13 = vpop.f32.mrf.mxu2 }
 0x6f3   : > { %v857_v14 = vmul.f32 0.17677669, %v826_v13 }
 0x6f5   : > { %v873_v16 = vpack.c.bf16 %v857_v14, %v857_v14 }
 0x6f7   : > { %890 = vst.msk [vmem:[#allocation2 + $0x18] sm:$0xf] %vm883_vm12, %v873_v16 }
 0x6fa   : > { %v828_v19 = vpop.f32.mrf.mxu2 }
 0x6fb   : > { %v858_v20 = vmul.f32 0.17677669, %v828_v19 }
 0x6fd   : > { %v874_v6 = vpack.c.bf16 %v858_v20, %v858_v20 }
 0x6ff   : > { %891 = vst.msk [vmem:[#allocation2 + $0x1c] sm:$0xf] %vm883_vm12, %v874_v6 }
 0x702   : > { %v831_v23 = vpop.f32.mrf.mxu2 }
 0x703   : > { %v859_v25 = vmul.f32 0.17677669, %v831_v23 }
 0x705   : > { %v875_v29 = vpack.c.bf16 %v859_v25, %v859_v25 }
 0x707   : > { %892 = vst.msk [vmem:[#allocation2 + $0x20] sm:$0xf] %vm883_vm12, %v875_v29 }
 0x70a   : > { %v833_v31 = vpop.f32.mrf.mxu2 }
 0x70b   : > { %v860_v32 = vmul.f32 0.17677669, %v833_v31 }
 0x70d   : > { %v876_v21 = vpack.c.bf16 %v860_v32, %v860_v32 }
 0x70f   : > { %893 = vst.msk [vmem:[#allocation2 + $0x24] sm:$0xf] %vm883_vm12, %v876_v21 }
 0x712   : > { %v836_v36 = vpop.f32.mrf.mxu2 }
 0x713   : > { %v861_v37 = vmul.f32 0.17677669, %v836_v36 }
 0x715   : > { %v877_v39 = vpack.c.bf16 %v861_v37, %v861_v37 }
 0x717   : > { %894 = vst.msk [vmem:[#allocation2 + $0x28] sm:$0xf] %vm883_vm12, %v877_v39 }
 0x71a   : > { %v838_v42 = vpop.f32.mrf.mxu2 }
 0x71b   : > { %v862_v45 = vmul.f32 0.17677669, %v838_v42 }
 0x71d   : > { %v878_v46 = vpack.c.bf16 %v862_v45, %v862_v45 }
 0x71f   : > { %895 = vst.msk [vmem:[#allocation2 + $0x2c] sm:$0xf] %vm883_vm12, %v878_v46 }
 0x722   : > { %v841_v47 = vpop.f32.mrf.mxu2 }
 0x723   : > { %v863_v48 = vmul.f32 0.17677669, %v841_v47 }
 0x725   : > { %v879_v49 = vpack.c.bf16 %v863_v48, %v863_v48 }
 0x727   : > { %896 = vst.msk [vmem:[#allocation2 + $0x30] sm:$0xf] %vm883_vm12, %v879_v49 }
 0x72a   : > { %v843_v10 = vpop.f32.mrf.mxu2 }
 0x72b   : > { %v864_v50 = vmul.f32 0.17677669, %v843_v10 }
 0x72d   : > { %v880_v51 = vpack.c.bf16 %v864_v50, %v864_v50 }
 0x72f   : > { %897 = vst.msk [vmem:[#allocation2 + $0x34] sm:$0xf] %vm883_vm12, %v880_v51 }
 0x732   : > { %v846_v52 = vpop.f32.mrf.mxu2 }
 0x733   : > { %v865_v53 = vmul.f32 0.17677669, %v846_v52 }
 0x735   : > { %v881_v54 = vpack.c.bf16 %v865_v53, %v865_v53 }
 0x737   : > { %898 = vst.msk [vmem:[#allocation2 + $0x38] sm:$0xf] %vm883_vm12, %v881_v54 }
 0x73a   : > { %v848_v55 = vpop.f32.mrf.mxu2 }
 0x73b   : > { %v866_v56 = vmul.f32 0.17677669, %v848_v55 }
 0x73d   : > { %v882_v57 = vpack.c.bf16 %v866_v56, %v866_v56 }
 0x73f   : > { %899 = vst.msk [vmem:[#allocation2 + $0x3c] sm:$0xf] %vm883_vm12, %v882_v57 }
 0x740 PF: > { %v2081_v59 = vld [vmem:[#allocation2 + $0x30] sm:$0xff]  ;;  %v2080_v60 = vld [vmem:[#allocation2 + $0x28] sm:$0xff]  ;;  %v2079_v61 = vld [vmem:[#allocation2 + $0x20] sm:$0xff]  ;;  %v1050_v4 = vperm.slane %v2364_v0, 0  ;;  %vm1113_vm13 = vcmask 59392   ;;  %vm1131_vm14 = vcmask 1043456  }
 0x741   : > { %v2078_v62 = vld [vmem:[#allocation2 + $0x18] sm:$0xff]  ;;  %v2077_v63 = vld [vmem:[#allocation2 + $0x10] sm:$0xff]  ;;  %v2076_v1 = vld [vmem:[#allocation2 + $0x8] sm:$0xff]  ;;  %vm1127_vm15 = vcmask 64512   ;;  %vm1181_vm0 = vcmask 261120   ;;  %vm1259_vm1 = vcmask 1042432  }
 0x742   : > { %v2075_v2 = vld [vmem:[#allocation2] sm:$0xff]  ;;  %v1032_v3 = vld [vmem:[#allocation6] sm:$0x3]  ;;  %v1126_v16 = vld [vmem:[#allocation5] sm:$0xf]  ;;  %v2263_v45 = vmov 0.0  }
 0x743   : > { %v1133_v18 = vsel %vm1131_vm14, %v1126_v16, 0  ;;  %v2090_v19 = vld [vmem:[#allocation3 + $0x38] sm:$0xff]  ;;  %v2089_v0 = vld [vmem:[#allocation3 + $0x28] sm:$0xff]  ;;  %v2088_v33 = vld [vmem:[#allocation3 + $0x20] sm:$0xff] }
 0x744   : > { %1142 = vmatpush.bf16.msra.mxu1 %v1133_v18  ;;  %1246 = vmatpush.bf16.msra.mxu3 %v2090_v19  ;;  %v2092_v20 = vld [vmem:[#allocation4 + $0x8] sm:$0xff]  ;;  %v2086_v6 = vld [vmem:[#allocation3 + $0x10] sm:$0xff]  ;;  %v2085_v23 = vld [vmem:[#allocation3 + $0x18] sm:$0xff] }
 0x745   : > { %1191 = vmatpush.bf16.msra.mxu2 %v2092_v20  ;;  %v2087_v22 = vld [vmem:[#allocation3 + $0x8] sm:$0xff]  ;;  %v2084_v26 = vld [vmem:[#allocation3] sm:$0xff]  ;;  %v2083_v28 = vld [vmem:[#allocation3 + $0x30] sm:$0xff] }
 0x746   : > { %v2082_v58 = vld [vmem:[#allocation2 + $0x38] sm:$0xff]  ;;  %v2091_v31 = vld [vmem:[#allocation4] sm:$0xff] }
 0x747   : > { %1100 = vmatpush.bf16.msra.mxu0 %v2082_v58 }
 0x748   : > { %1247 = vmatpush.bf16.msra.mxu3 %v2089_v0 }
 0x749   : > { %1192 = vmatpush.bf16.msra.mxu2 %v2091_v31 }
 0x74b   : > { %1101 = vmatpush.bf16.msra.mxu0 %v2081_v59 }
 0x74c   : > { %1248 = vmatpush.bf16.msra.mxu3 %v2088_v33 }
 0x74f   : > { %1102 = vmatpush.bf16.msra.mxu0 %v2080_v60 }
 0x750   : > { %1249 = vmatpush.bf16.msra.mxu3 %v2087_v22 }
 0x753   : > { %1103 = vmatpush.bf16.msra.mxu0 %v2079_v61 }
 0x754   : > { %1250 = vmatpush.bf16.msra.mxu3 %v2086_v6 }
 0x757   : > { %1104 = vmatpush.bf16.msra.mxu0 %v2078_v62 }
 0x758   : > { %1251 = vmatpush.bf16.msra.mxu3 %v2085_v23 }
 0x75b   : > { %1105 = vmatpush.bf16.msra.mxu0 %v2077_v63 }
 0x75c   : > { %1252 = vmatpush.bf16.msra.mxu3 %v2084_v26 }
 0x75f   : > { %1106 = vmatpush.bf16.msra.mxu0 %v2076_v1 }
 0x760   : > { %1253 = vmatpush.bf16.msra.mxu3 %v2083_v28 }
 0x763   : > { %1107 = vmatpush.bf16.msra.mxu0 %v2075_v2  ;;  %1254 = vmatmul.bf16.vlgmr.msra.gmra.mxu3 %v1032_v3 }
 0x766   : > { %1108 = vmatmul.bf16.vlgmr.msra.gmra.mxu0 %v1032_v3 }
 0x7e3   : > { %v1109_v5 = vpop.f32.mrf.mxu0 }
 0x7e4   : > { %v1110_v7 = vadd.f32 %v1109_v5, %v1050_v4 }
 0x7e6   : > { %v1114_v8 = vsel %vm1113_vm13, %v1110_v7, -inf  ;;  %v1255_v34 = vpop.f32.mrf.mxu3 }
 0x7e7   : > { %1115 = vmax.xlane.f32.xlu0 %v1114_v8 }
 0x7eb   : > { %v1111_v9 = vpop.f32.mrf.mxu0 }
 0x7ee   : > { %v1257_v35 = vpop.f32.mrf.mxu3 }
 0x85a   : > { %v1116_v11 = vpop.xlane.xlu0 %1115 }
 0x85b   : > { %v1117_v12 = vsub.f32 %v1110_v7, %v1116_v11 }
 0x85d   : > { %v1118_v13 = vmul.f32 1.442695, %v1117_v12 }
 0x85f   : > { %2210 = vpow2.f32 %v1118_v13 }
 0x865   : > { %v2211_v14 = vpop.eup %2210 }
 0x866   : > { %v1120_v15 = vsel %vm1113_vm13, %v2211_v14, 0.0 }
 0x867   : > { %1121 = vadd.xlane.f32.xlu0 %v1120_v15 }
 0x8da   : > { %v1122_v25 = vpop.xlane.xlu0 %1121 }
 0x8db   : > { %2212 = vrcp.f32 %v1122_v25 }
 0x8e1   : > { %v2213_v29 = vpop.eup %2212 }
 0x8e2   : > { %v1124_v27 = vmul.f32 %v2213_v29, %v2211_v14 }
 0x8e4   : > { %v1125_v30 = vpack.c.bf16 %v1124_v27, %v1124_v27 }
 0x8e6   : > { %2005 = vmatmul.msk.bf16.vlgmr.msra.gmra.mxu1 %vm1127_vm15, %v1125_v30 }
 0x963   : > { %v1144_v32 = vpop.f32.mrf.mxu1 }
 0x964   : > { %v1164_v24 = vpack.c.bf16 %v1144_v32, %v1144_v32 }
 0x966   : > { %2014 = vmatmul.msk.bf16.vlgmr.msra.gmra.mxu2 %vm1181_vm0, %v1164_v24 }
 0x96b   : > { %v1146_v21 = vpop.f32.mrf.mxu1 }
 0x9e9   : > { %v1194_v36 = vpop.f32.mrf.mxu2 }
 0x9ea   : > { %v2639_v37 = vadd.f32 %v1255_v34, %v1194_v36 }
 0x9ec   : > { %v1260_v38 = vsel %vm1259_vm1, %v2639_v37, inf  ;;  %v1263_v39 = vsel %vm1259_vm1, %v2639_v37, -inf }
 0x9ed   : > { %1261 = vmin.xlane.f32.xlu1 %v1260_v38 }
 0x9f1   : > { %v1196_v17 = vpop.f32.mrf.mxu2 }
 0x9f5   : > { %1264 = vmax.xlane.f32.xlu1 %v1263_v39 }
 0xa60   : > { %v1262_v40 = vpop.xlane.xlu1 %1261 }
 0xa61   : > { %v2645_v41 = vadd.f32 -1.0, %v1262_v40 }
 0xa68   : > { %v2647_v43 = vpop.xlane.xlu1 %1264 }
 0xa69   : > { %v1267_v44 = vadd.f32 %v2645_v41, %v2647_v43 }
 0xa6b   : > { %v2651_v42 = vmul.f32 0.5, %v1267_v44 }
 0xa6d   : > { %vm1269_vm2 = vcmp.gt.f32.partialorder %v2639_v37, %v2651_v42 }
 0xa6e   : > { %v2048_v46 = vsel %vm1269_vm2, 1.0, %v2263_v45 }
 0xa6f   : > { %v1272_v47 = vsel %vm1259_vm1, %v2048_v46, 0.0 }
 0xa70   : > { %1273 = vadd.xlane.f32.xlu2 %v1272_v47 }
 0xae3   : > { %v1274_v48 = vpop.xlane.xlu2 %1273 }
 0xae4   : > { %vm1275_vm3 = vcmp.lt.f32.partialorder %v1274_v48, 50.0 }
 0xae5   : > { %v1276_v49 = vsel %vm1275_vm3, %v2645_v41, %v2651_v42  ;;  %v1277_v10 = vsel %vm1275_vm3, %v2651_v42, %v2647_v43 }
 0xae6   : > { %v1278_v50 = vadd.f32 %v1277_v10, %v1276_v49 }
 0xae8   : > { %v1279_v51 = vmul.f32 0.5, %v1278_v50 }
 0xaea   : > { %vm1280_vm4 = vcmp.gt.f32.partialorder %v2639_v37, %v1279_v51 }
 0xaeb   : > { %v2049_v52 = vsel %vm1280_vm4, 1.0, %v2263_v45 }
 0xaec   : > { %v1283_v53 = vsel %vm1259_vm1, %v2049_v52, 0.0 }
 0xaed   : > { %1284 = vadd.xlane.f32.xlu2 %v1283_v53 }
 0xb60   : > { %v1285_v54 = vpop.xlane.xlu2 %1284 }
 0xb61   : > { %vm1286_vm5 = vcmp.lt.f32.partialorder %v1285_v54, 50.0 }
 0xb62   : > { %v1287_v55 = vsel %vm1286_vm5, %v1276_v49, %v1279_v51  ;;  %v1288_v56 = vsel %vm1286_vm5, %v1279_v51, %v1277_v10 }
 0xb63   : > { %v1289_v57 = vadd.f32 %v1288_v56, %v1287_v55 }
 0xb65   : > { %v1290_v58 = vmul.f32 0.5, %v1289_v57 }
 0xb67   : > { %vm1291_vm6 = vcmp.gt.f32.partialorder %v2639_v37, %v1290_v58 }
 0xb68   : > { %v2050_v59 = vsel %vm1291_vm6, 1.0, %v2263_v45 }
 0xb69   : > { %v1294_v60 = vsel %vm1259_vm1, %v2050_v59, 0.0 }
 0xb6a   : > { %1295 = vadd.xlane.f32.xlu0 %v1294_v60 }
 0xbdd   : > { %v1296_v61 = vpop.xlane.xlu0 %1295 }
 0xbde   : > { %vm1297_vm7 = vcmp.lt.f32.partialorder %v1296_v61, 50.0 }
 0xbdf   : > { %v1298_v62 = vsel %vm1297_vm7, %v1287_v55, %v1290_v58  ;;  %v1299_v63 = vsel %vm1297_vm7, %v1290_v58, %v1288_v56 }
 0xbe0   : > { %v1300_v1 = vadd.f32 %v1299_v63, %v1298_v62 }
 0xbe2   : > { %v1301_v2 = vmul.f32 0.5, %v1300_v1 }
 0xbe4   : > { %vm1302_vm8 = vcmp.gt.f32.partialorder %v2639_v37, %v1301_v2 }
 0xbe5   : > { %v2051_v3 = vsel %vm1302_vm8, 1.0, %v2263_v45 }
 0xbe6   : > { %v1305_v4 = vsel %vm1259_vm1, %v2051_v3, 0.0 }
 0xbe7   : > { %1306 = vadd.xlane.f32.xlu1 %v1305_v4 }
 0xc5a   : > { %v1307_v5 = vpop.xlane.xlu1 %1306 }
 0xc5b   : > { %vm1308_vm9 = vcmp.lt.f32.partialorder %v1307_v5, 50.0 }
 0xc5c   : > { %v1309_v7 = vsel %vm1308_vm9, %v1298_v62, %v1301_v2  ;;  %v1310_v8 = vsel %vm1308_vm9, %v1301_v2, %v1299_v63 }
 0xc5d   : > { %v1311_v9 = vadd.f32 %v1310_v8, %v1309_v7 }
 0xc5f   : > { %v1312_v11 = vmul.f32 0.5, %v1311_v9 }
 0xc61   : > { %vm1313_vm10 = vcmp.gt.f32.partialorder %v2639_v37, %v1312_v11 }
 0xc62   : > { %v2052_v12 = vsel %vm1313_vm10, 1.0, %v2263_v45 }
 0xc63   : > { %v1316_v13 = vsel %vm1259_vm1, %v2052_v12, 0.0 }
 0xc64   : > { %1317 = vadd.xlane.f32.xlu2 %v1316_v13 }
 0xcd7   : > { %v1318_v14 = vpop.xlane.xlu2 %1317 }
 0xcd8   : > { %vm1319_vm11 = vcmp.lt.f32.partialorder %v1318_v14, 50.0 }
 0xcd9   : > { %v1320_v15 = vsel %vm1319_vm11, %v1309_v7, %v1312_v11  ;;  %v1321_v16 = vsel %vm1319_vm11, %v1312_v11, %v1310_v8 }
 0xcda   : > { %v1322_v18 = vadd.f32 %v1321_v16, %v1320_v15 }
 0xcdc   : > { %v1323_v19 = vmul.f32 0.5, %v1322_v18 }
 0xcde   : > { %vm1324_vm12 = vcmp.gt.f32.partialorder %v2639_v37, %v1323_v19 }
 0xcdf   : > { %v2053_v0 = vsel %vm1324_vm12, 1.0, %v2263_v45 }
 0xce0   : > { %v1327_v20 = vsel %vm1259_vm1, %v2053_v0, 0.0 }
 0xce1   : > { %1328 = vadd.xlane.f32.xlu0 %v1327_v20 }
 0xd54   : > { %v1329_v33 = vpop.xlane.xlu0 %1328 }
 0xd55   : > { %vm1330_vm13 = vcmp.lt.f32.partialorder %v1329_v33, 50.0 }
 0xd56   : > { %v1331_v22 = vsel %vm1330_vm13, %v1320_v15, %v1323_v19  ;;  %v1332_v6 = vsel %vm1330_vm13, %v1323_v19, %v1321_v16 }
 0xd57   : > { %v1333_v23 = vadd.f32 %v1332_v6, %v1331_v22 }
 0xd59   : > { %v1334_v25 = vmul.f32 0.5, %v1333_v23 }
 0xd5b   : > { %vm1335_vm14 = vcmp.gt.f32.partialorder %v2639_v37, %v1334_v25 }
 0xd5c   : > { %v2054_v26 = vsel %vm1335_vm14, 1.0, %v2263_v45 }
 0xd5d   : > { %v1338_v28 = vsel %vm1259_vm1, %v2054_v26, 0.0 }
 0xd5e   : > { %1339 = vadd.xlane.f32.xlu1 %v1338_v28 }
 0xdd1   : > { %v1340_v29 = vpop.xlane.xlu1 %1339 }
 0xdd2   : > { %vm1341_vm15 = vcmp.lt.f32.partialorder %v1340_v29, 50.0 }
 0xdd3   : > { %v1342_v27 = vsel %vm1341_vm15, %v1331_v22, %v1334_v25  ;;  %v1343_v30 = vsel %vm1341_vm15, %v1334_v25, %v1332_v6 }
 0xdd4   : > { %v1344_v31 = vadd.f32 %v1343_v30, %v1342_v27 }
 0xdd6   : > { %v1345_v32 = vmul.f32 0.5, %v1344_v31 }
 0xdd8   : > { %vm1346_vm0 = vcmp.gt.f32.partialorder %v2639_v37, %v1345_v32 }
 0xdd9   : > { %v2055_v24 = vsel %vm1346_vm0, 1.0, %v2263_v45 }
 0xdda   : > { %v1349_v34 = vsel %vm1259_vm1, %v2055_v24, 0.0 }
 0xddb   : > { %1350 = vadd.xlane.f32.xlu2 %v1349_v34 }
 0xe4e   : > { %v1351_v21 = vpop.xlane.xlu2 %1350 }
 0xe4f   : > { %vm1352_vm2 = vcmp.lt.f32.partialorder %v1351_v21, 50.0 }
 0xe50   : > { %v1353_v35 = vsel %vm1352_vm2, %v1342_v27, %v1345_v32  ;;  %v1354_v36 = vsel %vm1352_vm2, %v1345_v32, %v1343_v30 }
 0xe51   : > { %v1355_v38 = vadd.f32 %v1354_v36, %v1353_v35 }
 0xe53   : > { %v1356_v17 = vmul.f32 0.5, %v1355_v38 }
 0xe55   : > { %vm1357_vm3 = vcmp.gt.f32.partialorder %v2639_v37, %v1356_v17 }
 0xe56   : > { %v2056_v39 = vsel %vm1357_vm3, 1.0, %v2263_v45 }
 0xe57   : > { %v1360_v40 = vsel %vm1259_vm1, %v2056_v39, 0.0 }
 0xe58   : > { %1361 = vadd.xlane.f32.xlu0 %v1360_v40 }
 0xecb   : > { %v1362_v44 = vpop.xlane.xlu0 %1361 }
 0xecc   : > { %vm1363_vm4 = vcmp.lt.f32.partialorder %v1362_v44, 50.0 }
 0xecd   : > { %v1364_v46 = vsel %vm1363_vm4, %v1353_v35, %v1356_v17  ;;  %v1365_v47 = vsel %vm1363_vm4, %v1356_v17, %v1354_v36 }
 0xece   : > { %v1366_v48 = vadd.f32 %v1365_v47, %v1364_v46 }
 0xed0   : > { %v1367_v49 = vmul.f32 0.5, %v1366_v48 }
 0xed2   : > { %vm1368_vm5 = vcmp.gt.f32.partialorder %v2639_v37, %v1367_v49 }
 0xed3   : > { %v2057_v10 = vsel %vm1368_vm5, 1.0, %v2263_v45 }
 0xed4   : > { %v1371_v50 = vsel %vm1259_vm1, %v2057_v10, 0.0 }
 0xed5   : > { %1372 = vadd.xlane.f32.xlu1 %v1371_v50 }
 0xf48   : > { %v1373_v51 = vpop.xlane.xlu1 %1372 }
 0xf49   : > { %vm1374_vm6 = vcmp.lt.f32.partialorder %v1373_v51, 50.0 }
 0xf4a   : > { %v1375_v52 = vsel %vm1374_vm6, %v1364_v46, %v1367_v49  ;;  %v1376_v53 = vsel %vm1374_vm6, %v1367_v49, %v1365_v47 }
 0xf4b   : > { %v1377_v54 = vadd.f32 %v1376_v53, %v1375_v52 }
 0xf4d   : > { %v1378_v55 = vmul.f32 0.5, %v1377_v54 }
 0xf4f   : > { %vm1379_vm7 = vcmp.gt.f32.partialorder %v2639_v37, %v1378_v55 }
 0xf50   : > { %v2058_v56 = vsel %vm1379_vm7, 1.0, %v2263_v45 }
 0xf51   : > { %v1382_v57 = vsel %vm1259_vm1, %v2058_v56, 0.0 }
 0xf52   : > { %1383 = vadd.xlane.f32.xlu2 %v1382_v57 }
 0xfc5   : > { %v1384_v58 = vpop.xlane.xlu2 %1383 }
 0xfc6   : > { %vm1385_vm8 = vcmp.lt.f32.partialorder %v1384_v58, 50.0 }
 0xfc7   : > { %v1386_v59 = vsel %vm1385_vm8, %v1375_v52, %v1378_v55  ;;  %v1387_v60 = vsel %vm1385_vm8, %v1378_v55, %v1376_v53 }
 0xfc8   : > { %v1388_v61 = vadd.f32 %v1387_v60, %v1386_v59 }
 0xfca   : > { %v1389_v62 = vmul.f32 0.5, %v1388_v61 }
 0xfcc   : > { %vm1390_vm9 = vcmp.gt.f32.partialorder %v2639_v37, %v1389_v62 }
 0xfcd   : > { %v2059_v63 = vsel %vm1390_vm9, 1.0, %v2263_v45 }
 0xfce   : > { %v1393_v1 = vsel %vm1259_vm1, %v2059_v63, 0.0 }
 0xfcf   : > { %1394 = vadd.xlane.f32.xlu0 %v1393_v1 }
0x1042   : > { %v1395_v2 = vpop.xlane.xlu0 %1394 }
0x1043   : > { %vm1396_vm10 = vcmp.lt.f32.partialorder %v1395_v2, 50.0 }
0x1044   : > { %v1397_v3 = vsel %vm1396_vm10, %v1386_v59, %v1389_v62  ;;  %v1398_v4 = vsel %vm1396_vm10, %v1389_v62, %v1387_v60 }
0x1045   : > { %v1399_v5 = vadd.f32 %v1398_v4, %v1397_v3 }
0x1047   : > { %v1400_v7 = vmul.f32 0.5, %v1399_v5 }
0x1049   : > { %vm1401_vm11 = vcmp.gt.f32.partialorder %v2639_v37, %v1400_v7 }
0x104a   : > { %v2060_v8 = vsel %vm1401_vm11, 1.0, %v2263_v45 }
0x104b   : > { %v1404_v9 = vsel %vm1259_vm1, %v2060_v8, 0.0 }
0x104c   : > { %1405 = vadd.xlane.f32.xlu1 %v1404_v9 }
0x10bf   : > { %v1406_v11 = vpop.xlane.xlu1 %1405 }
0x10c0   : > { %vm1407_vm12 = vcmp.lt.f32.partialorder %v1406_v11, 50.0 }
0x10c1   : > { %v1408_v12 = vsel %vm1407_vm12, %v1397_v3, %v1400_v7  ;;  %v1409_v13 = vsel %vm1407_vm12, %v1400_v7, %v1398_v4 }
0x10c2   : > { %v1410_v14 = vadd.f32 %v1409_v13, %v1408_v12 }
0x10c4   : > { %v1411_v15 = vmul.f32 0.5, %v1410_v14 }
0x10c6   : > { %vm1412_vm13 = vcmp.gt.f32.partialorder %v2639_v37, %v1411_v15 }
0x10c7   : > { %v2061_v16 = vsel %vm1412_vm13, 1.0, %v2263_v45 }
0x10c8   : > { %v1415_v18 = vsel %vm1259_vm1, %v2061_v16, 0.0 }
0x10c9   : > { %1416 = vadd.xlane.f32.xlu2 %v1415_v18 }
0x113c   : > { %v1417_v19 = vpop.xlane.xlu2 %1416 }
0x113d   : > { %vm1418_vm14 = vcmp.lt.f32.partialorder %v1417_v19, 50.0 }
0x113e   : > { %v1419_v0 = vsel %vm1418_vm14, %v1408_v12, %v1411_v15  ;;  %v1420_v20 = vsel %vm1418_vm14, %v1411_v15, %v1409_v13 }
0x113f   : > { %v1421_v33 = vadd.f32 %v1420_v20, %v1419_v0 }
0x1141   : > { %v1422_v22 = vmul.f32 0.5, %v1421_v33 }
0x1143   : > { %vm1423_vm15 = vcmp.gt.f32.partialorder %v2639_v37, %v1422_v22 }
0x1144   : > { %v2062_v6 = vsel %vm1423_vm15, 1.0, %v2263_v45 }
0x1145   : > { %v1426_v23 = vsel %vm1259_vm1, %v2062_v6, 0.0 }
0x1146   : > { %1427 = vadd.xlane.f32.xlu0 %v1426_v23 }
0x11b9   : > { %v1428_v25 = vpop.xlane.xlu0 %1427 }
0x11ba   : > { %vm1429_vm0 = vcmp.lt.f32.partialorder %v1428_v25, 50.0 }
0x11bb   : > { %v1430_v26 = vsel %vm1429_vm0, %v1419_v0, %v1422_v22  ;;  %v1431_v28 = vsel %vm1429_vm0, %v1422_v22, %v1420_v20 }
0x11bc   : > { %v1432_v29 = vadd.f32 %v1431_v28, %v1430_v26 }
0x11be   : > { %v1433_v27 = vmul.f32 0.5, %v1432_v29 }
0x11c0   : > { %vm1434_vm2 = vcmp.gt.f32.partialorder %v2639_v37, %v1433_v27 }
0x11c1   : > { %v2063_v30 = vsel %vm1434_vm2, 1.0, %v2263_v45 }
0x11c2   : > { %v1437_v31 = vsel %vm1259_vm1, %v2063_v30, 0.0 }
0x11c3   : > { %1438 = vadd.xlane.f32.xlu1 %v1437_v31 }
0x1236   : > { %v1439_v32 = vpop.xlane.xlu1 %1438 }
0x1237   : > { %vm1440_vm3 = vcmp.lt.f32.partialorder %v1439_v32, 50.0 }
0x1238   : > { %v1441_v24 = vsel %vm1440_vm3, %v1430_v26, %v1433_v27  ;;  %v1442_v34 = vsel %vm1440_vm3, %v1433_v27, %v1431_v28 }
0x1239   : > { %v1443_v21 = vadd.f32 %v1442_v34, %v1441_v24 }
0x123b   : > { %v1444_v35 = vmul.f32 0.5, %v1443_v21 }
0x123d   : > { %vm1445_vm4 = vcmp.gt.f32.partialorder %v2639_v37, %v1444_v35 }
0x123e   : > { %v2064_v36 = vsel %vm1445_vm4, 1.0, %v2263_v45 }
0x123f   : > { %v1448_v38 = vsel %vm1259_vm1, %v2064_v36, 0.0 }
0x1240   : > { %1449 = vadd.xlane.f32.xlu2 %v1448_v38 }
0x12b3   : > { %v1450_v17 = vpop.xlane.xlu2 %1449 }
0x12b4   : > { %vm1451_vm5 = vcmp.lt.f32.partialorder %v1450_v17, 50.0 }
0x12b5   : > { %v1452_v39 = vsel %vm1451_vm5, %v1441_v24, %v1444_v35  ;;  %v1453_v40 = vsel %vm1451_vm5, %v1444_v35, %v1442_v34 }
0x12b6   : > { %v1454_v44 = vadd.f32 %v1453_v40, %v1452_v39 }
0x12b8   : > { %v1455_v46 = vmul.f32 0.5, %v1454_v44 }
0x12ba   : > { %vm1456_vm6 = vcmp.gt.f32.partialorder %v2639_v37, %v1455_v46 }
0x12bb   : > { %v2065_v47 = vsel %vm1456_vm6, 1.0, %v2263_v45 }
0x12bc   : > { %v1459_v48 = vsel %vm1259_vm1, %v2065_v47, 0.0 }
0x12bd   : > { %1460 = vadd.xlane.f32.xlu0 %v1459_v48 }
0x1330   : > { %v1461_v49 = vpop.xlane.xlu0 %1460 }
0x1331   : > { %vm1462_vm7 = vcmp.lt.f32.partialorder %v1461_v49, 50.0 }
0x1332   : > { %v1463_v10 = vsel %vm1462_vm7, %v1452_v39, %v1455_v46  ;;  %v1464_v50 = vsel %vm1462_vm7, %v1455_v46, %v1453_v40 }
0x1333   : > { %v1465_v51 = vadd.f32 %v1464_v50, %v1463_v10 }
0x1335   : > { %v1466_v52 = vmul.f32 0.5, %v1465_v51 }
0x1337   : > { %vm1467_vm8 = vcmp.gt.f32.partialorder %v2639_v37, %v1466_v52 }
0x1338   : > { %v2066_v53 = vsel %vm1467_vm8, 1.0, %v2263_v45 }
0x1339   : > { %v1470_v54 = vsel %vm1259_vm1, %v2066_v53, 0.0 }
0x133a   : > { %1471 = vadd.xlane.f32.xlu1 %v1470_v54 }
0x13ad   : > { %v1472_v55 = vpop.xlane.xlu1 %1471 }
0x13ae   : > { %vm1473_vm9 = vcmp.lt.f32.partialorder %v1472_v55, 50.0 }
0x13af   : > { %v1474_v56 = vsel %vm1473_vm9, %v1463_v10, %v1466_v52  ;;  %v1475_v57 = vsel %vm1473_vm9, %v1466_v52, %v1464_v50 }
0x13b0   : > { %v1476_v58 = vadd.f32 %v1475_v57, %v1474_v56 }
0x13b2   : > { %v1477_v59 = vmul.f32 0.5, %v1476_v58 }
0x13b4   : > { %vm1478_vm10 = vcmp.gt.f32.partialorder %v2639_v37, %v1477_v59 }
0x13b5   : > { %v2067_v60 = vsel %vm1478_vm10, 1.0, %v2263_v45 }
0x13b6   : > { %v1481_v61 = vsel %vm1259_vm1, %v2067_v60, 0.0 }
0x13b7   : > { %1482 = vadd.xlane.f32.xlu2 %v1481_v61 }
0x142a   : > { %v1483_v62 = vpop.xlane.xlu2 %1482 }
0x142b   : > { %vm1484_vm11 = vcmp.lt.f32.partialorder %v1483_v62, 50.0 }
0x142c   : > { %v1485_v63 = vsel %vm1484_vm11, %v1474_v56, %v1477_v59  ;;  %v1486_v1 = vsel %vm1484_vm11, %v1477_v59, %v1475_v57 }
0x142d   : > { %v1487_v2 = vadd.f32 %v1486_v1, %v1485_v63 }
0x142f   : > { %v1488_v3 = vmul.f32 0.5, %v1487_v2 }
0x1431   : > { %vm1489_vm12 = vcmp.gt.f32.partialorder %v2639_v37, %v1488_v3 }
0x1432   : > { %v2068_v4 = vsel %vm1489_vm12, 1.0, %v2263_v45 }
0x1433   : > { %v1492_v5 = vsel %vm1259_vm1, %v2068_v4, 0.0 }
0x1434   : > { %1493 = vadd.xlane.f32.xlu0 %v1492_v5 }
0x14a7   : > { %v1494_v7 = vpop.xlane.xlu0 %1493 }
0x14a8   : > { %vm1495_vm13 = vcmp.lt.f32.partialorder %v1494_v7, 50.0 }
0x14a9   : > { %v1496_v8 = vsel %vm1495_vm13, %v1485_v63, %v1488_v3  ;;  %v1497_v9 = vsel %vm1495_vm13, %v1488_v3, %v1486_v1 }
0x14aa   : > { %v1498_v11 = vadd.f32 %v1497_v9, %v1496_v8 }
0x14ac   : > { %v1499_v12 = vmul.f32 0.5, %v1498_v11 }
0x14ae   : > { %vm1500_vm14 = vcmp.gt.f32.partialorder %v2639_v37, %v1499_v12 }
0x14af   : > { %v2069_v13 = vsel %vm1500_vm14, 1.0, %v2263_v45 }
0x14b0   : > { %v1503_v14 = vsel %vm1259_vm1, %v2069_v13, 0.0 }
0x14b1   : > { %1504 = vadd.xlane.f32.xlu1 %v1503_v14 }
0x1524   : > { %v1505_v15 = vpop.xlane.xlu1 %1504 }
0x1525   : > { %vm1506_vm15 = vcmp.lt.f32.partialorder %v1505_v15, 50.0 }
0x1526   : > { %v1507_v16 = vsel %vm1506_vm15, %v1496_v8, %v1499_v12  ;;  %v1508_v18 = vsel %vm1506_vm15, %v1499_v12, %v1497_v9 }
0x1527   : > { %v1509_v19 = vadd.f32 %v1508_v18, %v1507_v16 }
0x1529   : > { %v1510_v0 = vmul.f32 0.5, %v1509_v19 }
0x152b   : > { %vm1511_vm0 = vcmp.gt.f32.partialorder %v2639_v37, %v1510_v0 }
0x152c   : > { %v2070_v20 = vsel %vm1511_vm0, 1.0, %v2263_v45 }
0x152d   : > { %v1514_v33 = vsel %vm1259_vm1, %v2070_v20, 0.0 }
0x152e   : > { %1515 = vadd.xlane.f32.xlu2 %v1514_v33 }
0x15a1   : > { %v1516_v22 = vpop.xlane.xlu2 %1515 }
0x15a2   : > { %vm1517_vm2 = vcmp.lt.f32.partialorder %v1516_v22, 50.0 }
0x15a3   : > { %v1518_v6 = vsel %vm1517_vm2, %v1507_v16, %v1510_v0  ;;  %v1519_v23 = vsel %vm1517_vm2, %v1510_v0, %v1508_v18 }
0x15a4   : > { %v1520_v25 = vadd.f32 %v1519_v23, %v1518_v6 }
0x15a6   : > { %v1521_v26 = vmul.f32 0.5, %v1520_v25 }
0x15a8   : > { %vm1522_vm3 = vcmp.gt.f32.partialorder %v2639_v37, %v1521_v26 }
0x15a9   : > { %v2071_v28 = vsel %vm1522_vm3, 1.0, %v2263_v45 }
0x15aa   : > { %v1525_v29 = vsel %vm1259_vm1, %v2071_v28, 0.0 }
0x15ab   : > { %1526 = vadd.xlane.f32.xlu0 %v1525_v29 }
0x161e   : > { %v1527_v27 = vpop.xlane.xlu0 %1526 }
0x161f   : > { %vm1528_vm4 = vcmp.lt.f32.partialorder %v1527_v27, 50.0 }
0x1620   : > { %v1529_v30 = vsel %vm1528_vm4, %v1518_v6, %v1521_v26 }
0x1621   : > { %vm1530_vm5 = vcmp.gt.f32.partialorder %v2639_v37, %v1529_v30 }
0x1622   : > { %v2732_v31 = vsel %vm1530_vm5, %v2639_v37, -1e+30 }
0x1623   : > { %v1532_v32 = vsel %vm1259_vm1, %v2732_v31, -inf  ;;  %vm1556_vm10 = vcmp.gt.f32.partialorder %v2732_v31, %v2651_v42 }
0x1624   : > { %1533 = vmax.xlane.f32.xlu1 %v1532_v32 }
0x1697   : > { %v1534_v24 = vpop.xlane.xlu1 %1533 }
0x1698   : > { %v1535_v34 = vsub.f32 %v2732_v31, %v1534_v24 }
0x169a   : > { %v1536_v21 = vmul.f32 1.442695, %v1535_v34 }
0x169c   : > { %2214 = vpow2.f32 %v1536_v21 }
0x16a2   : > { %v2215_v35 = vpop.eup %2214 }
0x16a3   : > { %v1538_v36 = vsel %vm1259_vm1, %v2215_v35, 0.0 }
0x16a4   : > { %1539 = vadd.xlane.f32.xlu2 %v1538_v36 }
0x1717   : > { %v1540_v38 = vpop.xlane.xlu2 %1539 }
0x1718   : > { %2216 = vrcp.f32 %v1540_v38  ;;  %v1552_v37 = vand.u32 2147483648, %v1540_v38  ;;  %v1550_v46 = vand.u32 2147483647, %v1540_v38  ;;  %vm1546_vm7 = vweird.f32 %v1540_v38 }
0x171a   : > { %v1553_v48 = vor.u32 1.1754944e-38, %v1552_v37  ;;  %vm1551_vm9 = vcmp.eq.f32.partialorder %v1550_v46, 8.507059e+37 }
0x171e   : > { %v2217_v17 = vpop.eup %2216 }
0x171f   : > { %v1542_v39 = vmul.f32 %v2217_v17, %v1540_v38  ;;  %vm1547_vm6 = vweird.f32 %v2217_v17 }
0x1720   : > { %vm1548_vm8 = vmor %vm1546_vm7, %vm1547_vm6 }
0x1721   : > { %v1543_v40 = vsub.f32 1.0, %v1542_v39 }
0x1723   : > { %v1544_v44 = vmul.f32 %v2217_v17, %v1543_v40 }
0x1725   : > { %v1545_v47 = vadd.f32 %v2217_v17, %v1544_v44 }
0x1727   : > { %v1549_v49 = vsel %vm1548_vm8, %v2217_v17, %v1545_v47 }
0x1728   : > { %v1554_v10 = vsel %vm1551_vm9, %v1553_v48, %v1549_v49 }
0x1729   : > { %v2738_v50 = vmul.f32 %v2215_v35, %v1554_v10 }
0x172b   : > { %v1557_v51 = vsel %vm1556_vm10, %v2738_v50, 0.0 }
0x172c   : > { %v1558_v52 = vsel %vm1259_vm1, %v1557_v51, 0.0 }
0x172d   : > { %1559 = vadd.xlane.f32.xlu0 %v1558_v52 }
0x17a0   : > { %v1560_v53 = vpop.xlane.xlu0 %1559 }
0x17a1   : > { %vm1561_vm11 = vcmp.le.f32.partialorder %v1560_v53, 0.9 }
0x17a2   : > { %v1562_v54 = vsel %vm1561_vm11, %v2645_v41, %v2651_v42  ;;  %v1563_v55 = vsel %vm1561_vm11, %v2651_v42, %v2647_v43 }
0x17a3   : > { %v1564_v56 = vadd.f32 %v1563_v55, %v1562_v54 }
0x17a5   : > { %v1565_v57 = vmul.f32 0.5, %v1564_v56 }
0x17a7   : > { %vm1566_vm12 = vcmp.gt.f32.partialorder %v2732_v31, %v1565_v57 }
0x17a8   : > { %v1567_v58 = vsel %vm1566_vm12, %v2738_v50, 0.0 }
0x17a9   : > { %v1568_v59 = vsel %vm1259_vm1, %v1567_v58, 0.0 }
0x17aa   : > { %1569 = vadd.xlane.f32.xlu1 %v1568_v59 }
0x181d   : > { %v1570_v60 = vpop.xlane.xlu1 %1569 }
0x181e   : > { %vm1571_vm13 = vcmp.le.f32.partialorder %v1570_v60, 0.9 }
0x181f   : > { %v1572_v61 = vsel %vm1571_vm13, %v1562_v54, %v1565_v57  ;;  %v1573_v62 = vsel %vm1571_vm13, %v1565_v57, %v1563_v55 }
0x1820   : > { %v1574_v63 = vadd.f32 %v1573_v62, %v1572_v61 }
0x1822   : > { %v1575_v1 = vmul.f32 0.5, %v1574_v63 }
0x1824   : > { %vm1576_vm14 = vcmp.gt.f32.partialorder %v2732_v31, %v1575_v1 }
0x1825   : > { %v1577_v41 = vsel %vm1576_vm14, %v2738_v50, 0.0 }
0x1826   : > { %v1578_v43 = vsel %vm1259_vm1, %v1577_v41, 0.0 }
0x1827   : > { %1579 = vadd.xlane.f32.xlu2 %v1578_v43 }
0x189a   : > { %v1580_v42 = vpop.xlane.xlu2 %1579 }
0x189b   : > { %vm1581_vm15 = vcmp.le.f32.partialorder %v1580_v42, 0.9 }
0x189c   : > { %v1582_v2 = vsel %vm1581_vm15, %v1572_v61, %v1575_v1  ;;  %v1583_v3 = vsel %vm1581_vm15, %v1575_v1, %v1573_v62 }
0x189d   : > { %v1584_v4 = vadd.f32 %v1583_v3, %v1582_v2 }
0x189f   : > { %v1585_v5 = vmul.f32 0.5, %v1584_v4 }
0x18a1   : > { %vm1586_vm0 = vcmp.gt.f32.partialorder %v2732_v31, %v1585_v5 }
0x18a2   : > { %v1587_v7 = vsel %vm1586_vm0, %v2738_v50, 0.0 }
0x18a3   : > { %v1588_v8 = vsel %vm1259_vm1, %v1587_v7, 0.0 }
0x18a4   : > { %1589 = vadd.xlane.f32.xlu0 %v1588_v8 }
0x1917   : > { %v1590_v9 = vpop.xlane.xlu0 %1589 }
0x1918   : > { %vm1591_vm2 = vcmp.le.f32.partialorder %v1590_v9, 0.9 }
0x1919   : > { %v1592_v11 = vsel %vm1591_vm2, %v1582_v2, %v1585_v5  ;;  %v1593_v12 = vsel %vm1591_vm2, %v1585_v5, %v1583_v3 }
0x191a   : > { %v1594_v13 = vadd.f32 %v1593_v12, %v1592_v11 }
0x191c   : > { %v1595_v14 = vmul.f32 0.5, %v1594_v13 }
0x191e   : > { %vm1596_vm3 = vcmp.gt.f32.partialorder %v2732_v31, %v1595_v14 }
0x191f   : > { %v1597_v15 = vsel %vm1596_vm3, %v2738_v50, 0.0 }
0x1920   : > { %v1598_v16 = vsel %vm1259_vm1, %v1597_v15, 0.0 }
0x1921   : > { %1599 = vadd.xlane.f32.xlu1 %v1598_v16 }
0x1994   : > { %v1600_v18 = vpop.xlane.xlu1 %1599 }
0x1995   : > { %vm1601_vm4 = vcmp.le.f32.partialorder %v1600_v18, 0.9 }
0x1996   : > { %v1602_v19 = vsel %vm1601_vm4, %v1592_v11, %v1595_v14  ;;  %v1603_v0 = vsel %vm1601_vm4, %v1595_v14, %v1593_v12 }
0x1997   : > { %v1604_v20 = vadd.f32 %v1603_v0, %v1602_v19 }
0x1999   : > { %v1605_v33 = vmul.f32 0.5, %v1604_v20 }
0x199b   : > { %vm1606_vm5 = vcmp.gt.f32.partialorder %v2732_v31, %v1605_v33 }
0x199c   : > { %v1607_v22 = vsel %vm1606_vm5, %v2738_v50, 0.0 }
0x199d   : > { %v1608_v6 = vsel %vm1259_vm1, %v1607_v22, 0.0 }
0x199e   : > { %1609 = vadd.xlane.f32.xlu2 %v1608_v6 }
0x1a11   : > { %v1610_v23 = vpop.xlane.xlu2 %1609 }
0x1a12   : > { %vm1611_vm6 = vcmp.le.f32.partialorder %v1610_v23, 0.9 }
0x1a13   : > { %v1612_v25 = vsel %vm1611_vm6, %v1602_v19, %v1605_v33  ;;  %v1613_v26 = vsel %vm1611_vm6, %v1605_v33, %v1603_v0 }
0x1a14   : > { %v1614_v28 = vadd.f32 %v1613_v26, %v1612_v25 }
0x1a16   : > { %v1615_v29 = vmul.f32 0.5, %v1614_v28 }
0x1a18   : > { %vm1616_vm7 = vcmp.gt.f32.partialorder %v2732_v31, %v1615_v29 }
0x1a19   : > { %v1617_v27 = vsel %vm1616_vm7, %v2738_v50, 0.0 }
0x1a1a   : > { %v1618_v30 = vsel %vm1259_vm1, %v1617_v27, 0.0 }
0x1a1b   : > { %1619 = vadd.xlane.f32.xlu0 %v1618_v30 }
0x1a8e   : > { %v1620_v32 = vpop.xlane.xlu0 %1619 }
0x1a8f   : > { %vm1621_vm8 = vcmp.le.f32.partialorder %v1620_v32, 0.9 }
0x1a90   : > { %v1622_v24 = vsel %vm1621_vm8, %v1612_v25, %v1615_v29  ;;  %v1623_v34 = vsel %vm1621_vm8, %v1615_v29, %v1613_v26 }
0x1a91   : > { %v1624_v21 = vadd.f32 %v1623_v34, %v1622_v24 }
0x1a93   : > { %v1625_v35 = vmul.f32 0.5, %v1624_v21 }
0x1a95   : > { %vm1626_vm9 = vcmp.gt.f32.partialorder %v2732_v31, %v1625_v35 }
0x1a96   : > { %v1627_v36 = vsel %vm1626_vm9, %v2738_v50, 0.0 }
0x1a97   : > { %v1628_v38 = vsel %vm1259_vm1, %v1627_v36, 0.0 }
0x1a98   : > { %1629 = vadd.xlane.f32.xlu1 %v1628_v38 }
0x1b0b   : > { %v1630_v17 = vpop.xlane.xlu1 %1629 }
0x1b0c   : > { %vm1631_vm10 = vcmp.le.f32.partialorder %v1630_v17, 0.9 }
0x1b0d   : > { %v1632_v39 = vsel %vm1631_vm10, %v1622_v24, %v1625_v35  ;;  %v1633_v40 = vsel %vm1631_vm10, %v1625_v35, %v1623_v34 }
0x1b0e   : > { %v1634_v37 = vadd.f32 %v1633_v40, %v1632_v39 }
0x1b10   : > { %v1635_v44 = vmul.f32 0.5, %v1634_v37 }
0x1b12   : > { %vm1636_vm11 = vcmp.gt.f32.partialorder %v2732_v31, %v1635_v44 }
0x1b13   : > { %v1637_v46 = vsel %vm1636_vm11, %v2738_v50, 0.0 }
0x1b14   : > { %v1638_v47 = vsel %vm1259_vm1, %v1637_v46, 0.0 }
0x1b15   : > { %1639 = vadd.xlane.f32.xlu2 %v1638_v47 }
0x1b88   : > { %v1640_v48 = vpop.xlane.xlu2 %1639 }
0x1b89   : > { %vm1641_vm12 = vcmp.le.f32.partialorder %v1640_v48, 0.9 }
0x1b8a   : > { %v1642_v49 = vsel %vm1641_vm12, %v1632_v39, %v1635_v44  ;;  %v1643_v10 = vsel %vm1641_vm12, %v1635_v44, %v1633_v40 }
0x1b8b   : > { %v1644_v51 = vadd.f32 %v1643_v10, %v1642_v49 }
0x1b8d   : > { %v1645_v52 = vmul.f32 0.5, %v1644_v51 }
0x1b8f   : > { %vm1646_vm13 = vcmp.gt.f32.partialorder %v2732_v31, %v1645_v52 }
0x1b90   : > { %v1647_v53 = vsel %vm1646_vm13, %v2738_v50, 0.0 }
0x1b91   : > { %v1648_v54 = vsel %vm1259_vm1, %v1647_v53, 0.0 }
0x1b92   : > { %1649 = vadd.xlane.f32.xlu0 %v1648_v54 }
0x1c05   : > { %v1650_v55 = vpop.xlane.xlu0 %1649 }
0x1c06   : > { %vm1651_vm14 = vcmp.le.f32.partialorder %v1650_v55, 0.9 }
0x1c07   : > { %v1652_v56 = vsel %vm1651_vm14, %v1642_v49, %v1645_v52  ;;  %v1653_v57 = vsel %vm1651_vm14, %v1645_v52, %v1643_v10 }
0x1c08   : > { %v1654_v58 = vadd.f32 %v1653_v57, %v1652_v56 }
0x1c0a   : > { %v1655_v59 = vmul.f32 0.5, %v1654_v58 }
0x1c0c   : > { %vm1656_vm15 = vcmp.gt.f32.partialorder %v2732_v31, %v1655_v59 }
0x1c0d   : > { %v1657_v60 = vsel %vm1656_vm15, %v2738_v50, 0.0 }
0x1c0e   : > { %v1658_v61 = vsel %vm1259_vm1, %v1657_v60, 0.0 }
0x1c0f   : > { %1659 = vadd.xlane.f32.xlu1 %v1658_v61 }
0x1c82   : > { %v1660_v62 = vpop.xlane.xlu1 %1659 }
0x1c83   : > { %vm1661_vm0 = vcmp.le.f32.partialorder %v1660_v62, 0.9 }
0x1c84   : > { %v1662_v63 = vsel %vm1661_vm0, %v1652_v56, %v1655_v59  ;;  %v1663_v1 = vsel %vm1661_vm0, %v1655_v59, %v1653_v57 }
0x1c85   : > { %v1664_v41 = vadd.f32 %v1663_v1, %v1662_v63 }
0x1c87   : > { %v1665_v43 = vmul.f32 0.5, %v1664_v41 }
0x1c89   : > { %vm1666_vm2 = vcmp.gt.f32.partialorder %v2732_v31, %v1665_v43 }
0x1c8a   : > { %v1667_v42 = vsel %vm1666_vm2, %v2738_v50, 0.0 }
0x1c8b   : > { %v1668_v2 = vsel %vm1259_vm1, %v1667_v42, 0.0 }
0x1c8c   : > { %1669 = vadd.xlane.f32.xlu2 %v1668_v2 }
0x1cff   : > { %v1670_v3 = vpop.xlane.xlu2 %1669 }
0x1d00   : > { %vm1671_vm3 = vcmp.le.f32.partialorder %v1670_v3, 0.9 }
0x1d01   : > { %v1672_v4 = vsel %vm1671_vm3, %v1662_v63, %v1665_v43  ;;  %v1673_v5 = vsel %vm1671_vm3, %v1665_v43, %v1663_v1 }
0x1d02   : > { %v1674_v7 = vadd.f32 %v1673_v5, %v1672_v4 }
0x1d04   : > { %v1675_v8 = vmul.f32 0.5, %v1674_v7 }
0x1d06   : > { %vm1676_vm4 = vcmp.gt.f32.partialorder %v2732_v31, %v1675_v8 }
0x1d07   : > { %v1677_v9 = vsel %vm1676_vm4, %v2738_v50, 0.0 }
0x1d08   : > { %v1678_v11 = vsel %vm1259_vm1, %v1677_v9, 0.0 }
0x1d09   : > { %1679 = vadd.xlane.f32.xlu0 %v1678_v11 }
0x1d7c   : > { %v1680_v12 = vpop.xlane.xlu0 %1679 }
0x1d7d   : > { %vm1681_vm5 = vcmp.le.f32.partialorder %v1680_v12, 0.9 }
0x1d7e   : > { %v1682_v13 = vsel %vm1681_vm5, %v1672_v4, %v1675_v8  ;;  %v1683_v14 = vsel %vm1681_vm5, %v1675_v8, %v1673_v5 }
0x1d7f   : > { %v1684_v15 = vadd.f32 %v1683_v14, %v1682_v13 }
0x1d81   : > { %v1685_v16 = vmul.f32 0.5, %v1684_v15 }
0x1d83   : > { %vm1686_vm6 = vcmp.gt.f32.partialorder %v2732_v31, %v1685_v16 }
0x1d84   : > { %v1687_v18 = vsel %vm1686_vm6, %v2738_v50, 0.0 }
0x1d85   : > { %v1688_v19 = vsel %vm1259_vm1, %v1687_v18, 0.0 }
0x1d86   : > { %1689 = vadd.xlane.f32.xlu1 %v1688_v19 }
0x1df9   : > { %v1690_v0 = vpop.xlane.xlu1 %1689 }
0x1dfa   : > { %vm1691_vm7 = vcmp.le.f32.partialorder %v1690_v0, 0.9 }
0x1dfb   : > { %v1692_v20 = vsel %vm1691_vm7, %v1682_v13, %v1685_v16  ;;  %v1693_v33 = vsel %vm1691_vm7, %v1685_v16, %v1683_v14 }
0x1dfc   : > { %v1694_v22 = vadd.f32 %v1693_v33, %v1692_v20 }
0x1dfe   : > { %v1695_v6 = vmul.f32 0.5, %v1694_v22 }
0x1e00   : > { %vm1696_vm8 = vcmp.gt.f32.partialorder %v2732_v31, %v1695_v6 }
0x1e01   : > { %v1697_v23 = vsel %vm1696_vm8, %v2738_v50, 0.0 }
0x1e02   : > { %v1698_v25 = vsel %vm1259_vm1, %v1697_v23, 0.0 }
0x1e03   : > { %1699 = vadd.xlane.f32.xlu2 %v1698_v25 }
0x1e76   : > { %v1700_v26 = vpop.xlane.xlu2 %1699 }
0x1e77   : > { %vm1701_vm9 = vcmp.le.f32.partialorder %v1700_v26, 0.9 }
0x1e78   : > { %v1702_v28 = vsel %vm1701_vm9, %v1692_v20, %v1695_v6  ;;  %v1703_v29 = vsel %vm1701_vm9, %v1695_v6, %v1693_v33 }
0x1e79   : > { %v1704_v27 = vadd.f32 %v1703_v29, %v1702_v28 }
0x1e7b   : > { %v1705_v30 = vmul.f32 0.5, %v1704_v27 }
0x1e7d   : > { %vm1706_vm10 = vcmp.gt.f32.partialorder %v2732_v31, %v1705_v30 }
0x1e7e   : > { %v1707_v32 = vsel %vm1706_vm10, %v2738_v50, 0.0 }
0x1e7f   : > { %v1708_v24 = vsel %vm1259_vm1, %v1707_v32, 0.0 }
0x1e80   : > { %1709 = vadd.xlane.f32.xlu0 %v1708_v24 }
0x1ef3   : > { %v1710_v34 = vpop.xlane.xlu0 %1709 }
0x1ef4   : > { %vm1711_vm11 = vcmp.le.f32.partialorder %v1710_v34, 0.9 }
0x1ef5   : > { %v1712_v21 = vsel %vm1711_vm11, %v1702_v28, %v1705_v30  ;;  %v1713_v35 = vsel %vm1711_vm11, %v1705_v30, %v1703_v29  ;;  %v1795_v30 = vld [vmem:[%s2374_s21] sm:$0x7] }
0x1ef6   : > { %v1714_v36 = vadd.f32 %v1713_v35, %v1712_v21 }
0x1ef8   : > { %v1715_v38 = vmul.f32 0.5, %v1714_v36 }
0x1efa   : > { %vm1716_vm12 = vcmp.gt.f32.partialorder %v2732_v31, %v1715_v38 }
0x1efb   : > { %v1717_v17 = vsel %vm1716_vm12, %v2738_v50, 0.0 }
0x1efc   : > { %v1718_v39 = vsel %vm1259_vm1, %v1717_v17, 0.0 }
0x1efd   : > { %1719 = vadd.xlane.f32.xlu1 %v1718_v39 }
0x1f70   : > { %v1720_v40 = vpop.xlane.xlu1 %1719 }
0x1f71   : > { %vm1721_vm13 = vcmp.le.f32.partialorder %v1720_v40, 0.9 }
0x1f72   : > { %v1722_v37 = vsel %vm1721_vm13, %v1712_v21, %v1715_v38  ;;  %v1723_v44 = vsel %vm1721_vm13, %v1715_v38, %v1713_v35  ;;  %v1800_v21 = vlaneseq }
0x1f73   : > { %v1724_v46 = vadd.f32 %v1723_v44, %v1722_v37 }
0x1f74   : > { %v1801_v35 = vand.u32 127, %v1800_v21 }
0x1f75   : > { %v1725_v47 = vmul.f32 0.5, %v1724_v46 }
0x1f77   : > { %vm1726_vm14 = vcmp.gt.f32.partialorder %v2732_v31, %v1725_v47 }
0x1f78   : > { %v1727_v48 = vsel %vm1726_vm14, %v2738_v50, 0.0 }
0x1f79   : > { %v1728_v49 = vsel %vm1259_vm1, %v1727_v48, 0.0 }
0x1f7a   : > { %1729 = vadd.xlane.f32.xlu2 %v1728_v49 }
0x1fed   : > { %v1730_v10 = vpop.xlane.xlu2 %1729 }
0x1fee   : > { %vm1731_vm15 = vcmp.le.f32.partialorder %v1730_v10, 0.9 }
0x1fef   : > { %v1732_v51 = vsel %vm1731_vm15, %v1722_v37, %v1725_v47  ;;  %v1733_v52 = vsel %vm1731_vm15, %v1725_v47, %v1723_v44  ;;  %v1819_v47 = vstv %s2240_s17 }
0x1ff0   : > { %v1734_v53 = vadd.f32 %v1733_v52, %v1732_v51 }
0x1ff2   : > { %v1735_v54 = vmul.f32 0.5, %v1734_v53 }
0x1ff4   : > { %vm1736_vm0 = vcmp.gt.f32.partialorder %v2732_v31, %v1735_v54 }
0x1ff5   : > { %v1737_v55 = vsel %vm1736_vm0, %v2738_v50, 0.0  ;;  %vm1820_vm0 = vcmp.eq.s32.totalorder %v1801_v35, %v1819_v47 }
0x1ff6   : > { %v1738_v56 = vsel %vm1259_vm1, %v1737_v55, 0.0 }
0x1ff7   : > { %1739 = vadd.xlane.f32.xlu0 %v1738_v56 }
0x206a   : > { %v1740_v57 = vpop.xlane.xlu0 %1739 }
0x206b   : > { %vm1741_vm2 = vcmp.le.f32.partialorder %v1740_v57, 0.9 }
0x206c   : > { %v1742_v58 = vsel %vm1741_vm2, %v1732_v51, %v1735_v54  ;;  %v1743_v59 = vsel %vm1741_vm2, %v1735_v54, %v1733_v52  ;;  %v1821_v51 = vld [vmem:[%s2369_s23] sm:$0x7]  ;;  %vm1823_vm2 = vcmask 26624   ;;  %v1832_v54 = vld [vmem:[#allocation6] sm:$0x3] }
0x206d   : > { %v1744_v60 = vadd.f32 %v1743_v59, %v1742_v58 }
0x206f   : > { %v1745_v61 = vmul.f32 0.5, %v1744_v60 }
0x2071   : > { %vm1746_vm3 = vcmp.gt.f32.partialorder %v2732_v31, %v1745_v61 }
0x2072   : > { %v1747_v62 = vsel %vm1746_vm3, %v2738_v50, 0.0  ;;  %vm1830_vm3 = vsmask.f32 1280 }
0x2073   : > { %v1748_v63 = vsel %vm1259_vm1, %v1747_v62, 0.0 }
0x2074   : > { %1749 = vadd.xlane.f32.xlu1 %v1748_v63 }
0x20e7   : > { %v1750_v1 = vpop.xlane.xlu1 %1749 }
0x20e8   : > { %vm1751_vm4 = vcmp.le.f32.partialorder %v1750_v1, 0.9 }
0x20e9   : > { %v1752_v41 = vsel %vm1751_vm4, %v1742_v58, %v1745_v61  ;;  %v1753_v43 = vsel %vm1751_vm4, %v1745_v61, %v1743_v59 }
0x20ea   : > { %v1754_v42 = vadd.f32 %v1753_v43, %v1752_v41 }
0x20ec   : > { %v1755_v2 = vmul.f32 0.5, %v1754_v42 }
0x20ee   : > { %vm1756_vm5 = vcmp.gt.f32.partialorder %v2732_v31, %v1755_v2 }
0x20ef   : > { %v1757_v3 = vsel %vm1756_vm5, %v2738_v50, 0.0 }
0x20f0   : > { %v1758_v4 = vsel %vm1259_vm1, %v1757_v3, 0.0 }
0x20f1   : > { %1759 = vadd.xlane.f32.xlu2 %v1758_v4 }
0x2164   : > { %v1760_v5 = vpop.xlane.xlu2 %1759 }
0x2165   : > { %vm1761_vm6 = vcmp.le.f32.partialorder %v1760_v5, 0.9 }
0x2166   : > { %v1762_v7 = vsel %vm1761_vm6, %v1752_v41, %v1755_v2  ;;  %v1763_v8 = vsel %vm1761_vm6, %v1755_v2, %v1753_v43 }
0x2167   : > { %v1764_v9 = vadd.f32 %v1763_v8, %v1762_v7 }
0x2169   : > { %v1765_v11 = vmul.f32 0.5, %v1764_v9 }
0x216b   : > { %vm1766_vm7 = vcmp.gt.f32.partialorder %v2732_v31, %v1765_v11 }
0x216c   : > { %v1767_v12 = vsel %vm1766_vm7, %v2738_v50, 0.0 }
0x216d   : > { %v1768_v13 = vsel %vm1259_vm1, %v1767_v12, 0.0 }
0x216e   : > { %1769 = vadd.xlane.f32.xlu0 %v1768_v13 }
0x21e1   : > { %v1770_v14 = vpop.xlane.xlu0 %1769 }
0x21e2   : > { %vm1771_vm8 = vcmp.le.f32.partialorder %v1770_v14, 0.9 }
0x21e3   : > { %v1772_v15 = vsel %vm1771_vm8, %v1762_v7, %v1765_v11  ;;  %v1773_v16 = vsel %vm1771_vm8, %v1765_v11, %v1763_v8 }
0x21e4   : > { %v1774_v18 = vadd.f32 %v1773_v16, %v1772_v15 }
0x21e6   : > { %v1775_v19 = vmul.f32 0.5, %v1774_v18 }
0x21e8   : > { %vm1776_vm9 = vcmp.gt.f32.partialorder %v2732_v31, %v1775_v19 }
0x21e9   : > { %v1777_v0 = vsel %vm1776_vm9, %v2738_v50, 0.0 }
0x21ea   : > { %v1778_v20 = vsel %vm1259_vm1, %v1777_v0, 0.0 }
0x21eb   : > { %1779 = vadd.xlane.f32.xlu1 %v1778_v20 }
0x225e   : > { %v1780_v33 = vpop.xlane.xlu1 %1779 }
0x225f   : > { %vm1781_vm10 = vcmp.le.f32.partialorder %v1780_v33, 0.9 }
0x2260   : > { %v1782_v22 = vsel %vm1781_vm10, %v1772_v15, %v1775_v19  ;;  %v1783_v6 = vsel %vm1781_vm10, %v1775_v19, %v1773_v16 }
0x2261   : > { %v1784_v23 = vadd.f32 %v1783_v6, %v1782_v22 }
0x2263   : > { %v1785_v25 = vmul.f32 0.5, %v1784_v23 }
0x2265   : > { %vm1786_vm11 = vcmp.gt.f32.partialorder %v2732_v31, %v1785_v25 }
0x2266   : > { %v1787_v26 = vsel %vm1786_vm11, %v2738_v50, 0.0 }
0x2267   : > { %v1788_v28 = vsel %vm1259_vm1, %v1787_v26, 0.0 }
0x2268   : > { %1789 = vadd.xlane.f32.xlu2 %v1788_v28 }
0x22db   : > { %v1790_v29 = vpop.xlane.xlu2 %1789 }
0x22dc   : > { %vm1791_vm12 = vcmp.le.f32.partialorder %v1790_v29, 0.9 }
0x22dd   : > { %v1792_v27 = vsel %vm1791_vm12, %v1782_v22, %v1785_v25 }
0x22de   : > { %vm1793_vm13 = vcmp.gt.f32.partialorder %v2732_v31, %v1792_v27 }
0x22df   : > { %v1794_v32 = vsel %vm1793_vm13, %v2732_v31, -1e+30 }
0x22e0   : > { %v1796_v24 = vadd.f32 %v1795_v30, %v1794_v32 }
0x22e2   : > { %v1797_v34 = vsel %vm1259_vm1, %v1796_v24, -inf }
0x22e3   : > { %1798 = vmax.xlane.f32.xlu0 %v1797_v34 }
0x2356   : > { %v1799_v36 = vpop.xlane.xlu0 %1798 }
0x2357   : > { %vm1802_vm14 = vcmp.ge.f32.partialorder %v1796_v24, %v1799_v36 }
0x2358   : > { %v1803_v50 = vsel %vm1802_vm14, %v1801_v35, 128 }
0x2359   : > { %v1804_v38 = vsel %vm1259_vm1, %v1803_v50, 2147483647  ;;  %vm1829_vm1 = vcmask 1041408  }
0x235a   : > { %v1806_v17 = vshra.s32 %v1804_v38, 16  ;;  %v1805_v40 = vand.u32 65535, %v1804_v38  ;;  %vm1831_vm5 = vmand %vm1829_vm1, %vm1830_vm3 }
0x235c   : > { %v1808_v39 = vcvt.s32.f32 %v1806_v17  ;;  %v1807_v44 = vcvt.s32.f32 %v1805_v40 }
0x235e   : > { %1809 = vmin.xlane.f32.xlu1 %v1808_v39 }
0x23d1   : > { %v1810_v37 = vpop.xlane.xlu1 %1809 }
0x23d2   : > { %vm1811_vm15 = vcmp.eq.f32.partialorder %v1808_v39, %v1810_v37  ;;  %v1816_v46 = vcvt.f32.s32 %v1810_v37 }
0x23d3   : > { %v1812_v31 = vsel %vm1811_vm15, %v1807_v44, inf }
0x23d4   : > { %1813 = vmin.xlane.f32.xlu2 %v1812_v31  ;;  %v1817_v49 = vshll.u32 %v1816_v46, 16 }
0x2447   : > { %v1814_v48 = vpop.xlane.xlu2 %1813 }
0x2448   : > { %v1815_v10 = vcvt.f32.s32 %v1814_v48 }
0x244a   : > { %v1818_v52 = vadd.s32 %v1817_v49, %v1815_v10 }
0x244c   : > { %v1822_v53 = vsel %vm1820_vm0, %v1818_v52, %v1821_v51  ;;  %vm1825_vm4 = vcmp.eq.s32.totalorder %v1801_v35, %v1818_v52 }
0x244d   : > { %1824 = vst.msk [vmem:[%s2369_s23] sm:$0x7] %vm1823_vm2, %v1822_v53  ;;  %v2072_v55 = vsel %vm1825_vm4, 1.0, %v2263_v45 }
0x244e   : > { %v1828_v56 = vpack.c.bf16 %v2072_v55, %v2072_v55 }
0x2450   : > { %v1833_v57 = vsel %vm1831_vm5, %v1828_v56, %v1832_v54 }
0x2451   : > { %1834 = vst [vmem:[#allocation6] sm:$0x3] %v1833_v57 }
0x2452 PF: > { %s2861_s17 = sld [smem:[#allocation9_spill]] }
0x2453   : > { %s2863_s18 = sld [smem:[#allocation8_spill]] }
0x2454   : > { %s2864_s19 = sld [smem:[#allocation10_spill]] }
0x2455   : > { %s2865_s20 = sld [smem:[#allocation11_spill]] }
0x2458   : > { %s21_s21 = sadd.s32 1, %s2861_s17   ;;  %s2862_s17 = sld [smem:[#allocation7_spill]] }
0x2459   : > { %p18_p8 = scmp.ge.s32.totalorder %s21_s21, 10  }
0x245b   :  { %20 = sbr.rel (!%p18_p8) target bundleno = 3 (0x3), region = 104 }

</bundles_post_ra>
